<compile_context>
chip_gen: v7x
topology: tpu7x:2x2x1
jax: 0.10.0
libtpu: 0.0.40
codegen_flags: <defaults>
</compile_context>

<pallas_src>
import functools

import jax
import jax.numpy as jnp
from jax.experimental import pallas as pl
from jax.experimental.pallas import tpu as pltpu


def _pick_tq(n, tq_max):
    """Largest query-tile size <= tq_max that divides n (multiple of 8 if tiled)."""
    if n <= tq_max:
        return n
    start = tq_max - (tq_max % 8)
    for t in range(start, 7, -8):
        if n % t == 0:
            return t
    return n


# ------------------------------ fused kernel --------------------------------

def _fused_attention_kernel(*refs, num_heads, scale, ln_eps, has_sr, tq):
    if has_sr:
        (x_ref, patches_ref,
         qw_ref, qb_ref,
         srw_ref, srb_ref, lng_ref, lnb_ref,
         kvw_ref, kvb_ref,
         pw_ref, pb_ref,
         o_ref) = refs
    else:
        (x_ref,
         qw_ref, qb_ref,
         kvw_ref, kvb_ref,
         pw_ref, pb_ref,
         o_ref) = refs

    f32 = jnp.float32

    # ---- query rows for this (batch, q-tile) grid step ----------------------
    if has_sr:
        xq = x_ref[0]                                        # (TQ, C) bf16 block
    else:
        # x is the full resident (N, C) block (it is also the k/v source);
        # slice this step's query rows out of it -> x is DMA'd once per batch.
        row0 = pl.multiple_of(pl.program_id(1) * tq, tq)
        xq = x_ref[0, pl.ds(row0, tq), :]                    # (TQ, C)

    cdt = xq.dtype
    TQ, C = xq.shape
    d = C // num_heads

    # ---- q projection (scale folded into the q tile, not the scores) --------
    q = jnp.dot(xq, qw_ref[...], preferred_element_type=f32)
    q = ((q + qb_ref[...]) * scale).astype(cdt)              # (TQ, C)

    # ---- k/v source: spatial-reduction conv (as matmul) + LayerNorm ---------
    if has_sr:
        patches = patches_ref[0]                             # (Nr, s*s*C) bf16
        xr = jnp.dot(patches, srw_ref[...], preferred_element_type=f32)
        xr = xr + srb_ref[...]
        mu = jnp.mean(xr, axis=-1, keepdims=True)
        var = jnp.mean(jnp.square(xr - mu), axis=-1, keepdims=True)
        xr = (xr - mu) * jax.lax.rsqrt(var + ln_eps)
        xr = (xr * lng_ref[...] + lnb_ref[...]).astype(cdt)  # (Nr, C)
    else:
        xr = x_ref[0]                                        # (N, C) bf16

    # ---- fused k/v projection: one (C, 2C) matmul ----------------------------
    kv = jnp.dot(xr, kvw_ref[...], preferred_element_type=f32) + kvb_ref[...]
    kv = kv.astype(cdt)                                      # (Nr, 2C)
    k = kv[:, :C]
    v = kv[:, C:]

    # ---- per-head attention with the output projection folded per head ------
    # No concatenate / attn_out tensor: y += (softmax(q_h k_h^T) v_h) @ W_p[h].
    # k is consumed in stored layout (contracting dims (1,1)); no transpose.
    y = jnp.zeros((TQ, C), f32)
    for h in range(num_heads):
        lo, hi = h * d, (h + 1) * d
        qh = q[:, lo:hi]                                     # (TQ, d)
        kh = k[:, lo:hi]                                     # (Nr, d)
        vh = v[:, lo:hi]                                     # (Nr, d)
        s = jax.lax.dot_general(qh, kh, (((1,), (1,)), ((), ())),
                                preferred_element_type=f32)  # (TQ, Nr)
        s = s - jnp.max(s, axis=-1, keepdims=True)
        p = jnp.exp(s)                                       # f32 exp (v5e-safe)
        p = p * pl.reciprocal(jnp.sum(p, axis=-1, keepdims=True), approx=False)
        oh = jnp.dot(p.astype(cdt), vh, preferred_element_type=f32)   # (TQ, d)
        y = y + jnp.dot(oh.astype(cdt), pw_ref[lo:hi, :],
                        preferred_element_type=f32)          # (TQ, C)

    o_ref[0] = (y + pb_ref[...]).astype(o_ref.dtype)


# ------------------------------ wrapper --------------------------------------

def attention_forward(params, x, H, W, num_heads, sr_ratio, *,
                      compute_dtype=jnp.bfloat16, tq_max=512):
    """PVT-style SR attention forward.  x: (B, N, C) with N == H*W -> (B, N, C)."""
    B, N, C = x.shape
    assert N == H * W and C % num_heads == 0
    out_dtype = x.dtype
    d = C // num_heads
    scale = d ** -0.5
    has_sr = sr_ratio > 1

    tq = _pick_tq(N, tq_max)
    nqt = N // tq

    # Activations + matmul weights fed in bf16 (halves HBM DMA, removes in-kernel
    # VPU casts); biases / LN params stay f32.
    xc = x.astype(compute_dtype)

    inputs, in_specs = [], []
    if has_sr:
        s = sr_ratio
        assert H % s == 0 and W % s == 0
        Hr, Wr = H // s, W // s
        Nr = Hr * Wr
        # TODO(synk): construct this patch view inside the kernel from the
        # resident x block (strided sublane reads) to remove the extra HBM
        # materialization + read of a pure permutation of x.
        patches = (xc.reshape(B, Hr, s, Wr, s, C)
                     .transpose(0, 1, 3, 2, 4, 5)
                     .reshape(B, Nr, s * s * C))
        inputs += [xc, patches]
        in_specs += [
            pl.BlockSpec((1, tq, C), lambda b, qi: (b, qi, 0)),         # q rows
            pl.BlockSpec((1, Nr, s * s * C), lambda b, qi: (b, 0, 0)),  # resident
        ]
    else:
        Nr = N
        # Full x stays resident per batch: it is both the k/v source and the pool
        # the q-tile rows are sliced from in-kernel (x is DMA'd once per batch).
        inputs += [xc]
        in_specs += [pl.BlockSpec((1, N, C), lambda b, qi: (b, 0, 0))]

    weight_names = ["q_w", "q_b"]
    if has_sr:
        weight_names += ["sr_w", "sr_b", "ln_g", "ln_b"]
    weight_names += ["kv_w", "kv_b", "proj_w", "proj_b"]
    matmul_weights = {"q_w", "sr_w", "kv_w", "proj_w"}
    for name in weight_names:
        w = params[name]
        if w.ndim == 1:
            w = w.reshape(1, -1)
        w = w.astype(compute_dtype if name in matmul_weights else jnp.float32)
        inputs.append(w)
        # Full-array block, constant index -> resident across all grid steps.
        in_specs.append(pl.BlockSpec(w.shape, lambda b, qi: (0, 0)))

    kernel = functools.partial(
        _fused_attention_kernel,
        num_heads=num_heads, scale=scale, ln_eps=1e-5, has_sr=has_sr, tq=tq)

    # Advisory cost estimate so XLA schedules surrounding ops sensibly.
    flops = 2 * B * (N * C * C                                    # q proj
                     + (Nr * (sr_ratio ** 2) * C * C if has_sr else 0)  # SR conv
                     + Nr * C * 2 * C                             # kv proj
                     + 2 * N * Nr * C                             # scores + attn@v
                     + N * C * C)                                 # out proj
    bytes_accessed = int(sum(int(a.size) * a.dtype.itemsize for a in inputs)
                         + B * N * C * jnp.dtype(out_dtype).itemsize)
    cost = pl.CostEstimate(flops=int(flops),
                           transcendentals=int(B * N * Nr * num_heads),
                           bytes_accessed=bytes_accessed)

    return pl.pallas_call(
        kernel,
        out_shape=jax.ShapeDtypeStruct((B, N, C), out_dtype),
        grid=(B, nqt),
        in_specs=in_specs,
        out_specs=pl.BlockSpec((1, tq, C), lambda b, qi: (b, qi, 0)),
        compiler_params=pltpu.CompilerParams(
            # Both axes are embarrassingly parallel -> megacore has work even
            # when B == 1 (v7x).  Explicit VMEM cap leaves headroom on v7x.
            dimension_semantics=("parallel", "parallel"),
            vmem_limit_bytes=64 * 1024 * 1024),
        cost_estimate=cost,
    )(*inputs)


# ------------------------------ parameter init -------------------------------

def init_attention_params(key, dim, num_heads, sr_ratio, dtype=jnp.float32):
    """Synthetic params matching the PyTorch module's shapes.

    Linear weights stored as (in, out) so the kernel computes x @ W + b.  The SR
    conv weight (C_out, C_in, kh, kw) is pre-reshaped to a (kh*kw*C_in, C_out)
    matmul weight.
    """
    keys = jax.random.split(key, 8)
    std = 0.02
    p = {}
    p["q_w"] = jax.random.normal(keys[0], (dim, dim), dtype) * std
    p["q_b"] = jax.random.normal(keys[1], (dim,), dtype) * 0.02
    p["kv_w"] = jax.random.normal(keys[2], (dim, 2 * dim), dtype) * std
    p["kv_b"] = jax.random.normal(keys[3], (2 * dim,), dtype) * 0.02
    p["proj_w"] = jax.random.normal(keys[4], (dim, dim), dtype) * std
    p["proj_b"] = jax.random.normal(keys[5], (dim,), dtype) * 0.02
    if sr_ratio > 1:
        fan_out = sr_ratio * sr_ratio * dim
        w_conv = jax.random.normal(keys[6], (dim, dim, sr_ratio, sr_ratio), dtype)
        w_conv = w_conv * jnp.sqrt(2.0 / fan_out)
        # (C_out, C_in, kh, kw) -> (kh, kw, C_in, C_out) -> (kh*kw*C_in, C_out)
        p["sr_w"] = jnp.transpose(w_conv, (2, 3, 1, 0)).reshape(
            sr_ratio * sr_ratio * dim, dim)
        p["sr_b"] = jax.random.normal(keys[7], (dim,), dtype) * 0.02
        p["ln_g"] = jnp.ones((dim,), dtype)
        p["ln_b"] = jnp.zeros((dim,), dtype)
    return p


# ------------------------------ pure-JAX reference ----------------------------

def attention_reference(params, x, H, W, num_heads, sr_ratio):
    B, N, C = x.shape
    d = C // num_heads
    scale = d ** -0.5
    q = (x @ params["q_w"] + params["q_b"]).reshape(B, N, num_heads, d)
    q = q.transpose(0, 2, 1, 3)                                       # (B, h, N, d)
    if sr_ratio > 1:
        s = sr_ratio
        Hr, Wr = H // s, W // s
        Nr = Hr * Wr
        patches = (x.reshape(B, Hr, s, Wr, s, C)
                     .transpose(0, 1, 3, 2, 4, 5)
                     .reshape(B, Nr, s * s * C))
        x_ = patches @ params["sr_w"] + params["sr_b"]
        mu = x_.mean(-1, keepdims=True)
        var = ((x_ - mu) ** 2).mean(-1, keepdims=True)
        x_ = (x_ - mu) / jnp.sqrt(var + 1e-5) * params["ln_g"] + params["ln_b"]
    else:
        Nr = N
        x_ = x
    kv = (x_ @ params["kv_w"] + params["kv_b"]).reshape(B, Nr, 2, num_heads, d)
    kv = kv.transpose(2, 0, 3, 1, 4)
    k, v = kv[0], kv[1]                                               # (B, h, Nr, d)
    attn = jnp.einsum("bhnd,bhmd->bhnm", q, k) * scale
    attn = jax.nn.softmax(attn, axis=-1)
    out = jnp.einsum("bhnm,bhmd->bhnd", attn, v).transpose(0, 2, 1, 3)
    out = out.reshape(B, N, C) @ params["proj_w"] + params["proj_b"]
    return out


# ----------------------------------- main -------------------------------------

if __name__ == "__main__":
    key = jax.random.PRNGKey(0)

    # (dim, heads, sr, B, H, W, tq_max): small shapes covering both the SR and
    # no-SR paths, and single- vs multi-q-tile grids (N tiling).
    configs = [
        (64, 8, 2, 2, 8, 8, 512),   # SR path, one q tile
        (64, 8, 2, 2, 8, 8, 32),    # SR path, 2 q tiles
        (64, 8, 1, 2, 8, 8, 32),    # no-SR path, 2 q tiles (in-kernel row slice)
    ]
    for i, (dim, heads, sr, B, H, W, tq_max) in enumerate(configs):
        kp, kx, key = jax.random.split(key, 3)
        params = init_attention_params(kp, dim, heads, sr)
        x = jax.random.normal(kx, (B, H * W, dim), jnp.float32)

        out = jax.block_until_ready(
            attention_forward(params, x, H, W, heads, sr, tq_max=tq_max))
        ref = jax.block_until_ready(
            attention_reference(params, x, H, W, heads, sr))

        assert out.shape == x.shape
        max_err = float(jnp.max(jnp.abs(out - ref)))
        # bf16 activations/weights on the MXU (f32 accumulation) -> loose tol.
        assert jnp.allclose(out, ref, rtol=2e-2, atol=2e-2), (i, max_err)

    print("KERNEL_OK")
</pallas_src>

<mosaic_0001>
module attributes {stable_mosaic.version = 11 : i64} {
  func.func @_fused_attention_kernel(%arg0: i32, %arg1: i32, %arg2: memref<1x64x64xbf16, #tpu.memory_space<vmem>>, %arg3: memref<1x16x256xbf16, #tpu.memory_space<vmem>>, %arg4: memref<64x64xbf16, #tpu.memory_space<vmem>>, %arg5: memref<1x64xf32, #tpu.memory_space<vmem>>, %arg6: memref<256x64xbf16, #tpu.memory_space<vmem>>, %arg7: memref<1x64xf32, #tpu.memory_space<vmem>>, %arg8: memref<1x64xf32, #tpu.memory_space<vmem>>, %arg9: memref<1x64xf32, #tpu.memory_space<vmem>>, %arg10: memref<64x128xbf16, #tpu.memory_space<vmem>>, %arg11: memref<1x128xf32, #tpu.memory_space<vmem>>, %arg12: memref<64x64xbf16, #tpu.memory_space<vmem>>, %arg13: memref<1x64xf32, #tpu.memory_space<vmem>>, %arg14: memref<1x64x64xf32, #tpu.memory_space<vmem>>) attributes {dimension_semantics = [#tpu.dimension_semantics<parallel>, #tpu.dimension_semantics<parallel>], iteration_bounds = array<i64: 2, 1>, scalar_prefetch = 0 : i64, scratch_operands = 0 : i64, tpu.core_type = #tpu.core_type<tc>, window_params = [{transform_indices = @transform_0, window_bounds = array<i64: 1, 64, 64>}, {transform_indices = @transform_1, window_bounds = array<i64: 1, 16, 256>}, {pipeline_mode = #tpu.pipeline_mode<synchronous>, transform_indices = @transform_2, window_bounds = array<i64: 64, 64>}, {pipeline_mode = #tpu.pipeline_mode<synchronous>, transform_indices = @transform_3, window_bounds = array<i64: 1, 64>}, {pipeline_mode = #tpu.pipeline_mode<synchronous>, transform_indices = @transform_4, window_bounds = array<i64: 256, 64>}, {pipeline_mode = #tpu.pipeline_mode<synchronous>, transform_indices = @transform_5, window_bounds = array<i64: 1, 64>}, {pipeline_mode = #tpu.pipeline_mode<synchronous>, transform_indices = @transform_6, window_bounds = array<i64: 1, 64>}, {pipeline_mode = #tpu.pipeline_mode<synchronous>, transform_indices = @transform_7, window_bounds = array<i64: 1, 64>}, {pipeline_mode = #tpu.pipeline_mode<synchronous>, transform_indices = @transform_8, window_bounds = array<i64: 64, 128>}, {pipeline_mode = #tpu.pipeline_mode<synchronous>, transform_indices = @transform_9, window_bounds = array<i64: 1, 128>}, {pipeline_mode = #tpu.pipeline_mode<synchronous>, transform_indices = @transform_10, window_bounds = array<i64: 64, 64>}, {pipeline_mode = #tpu.pipeline_mode<synchronous>, transform_indices = @transform_11, window_bounds = array<i64: 1, 64>}, {transform_indices = @transform_12, window_bounds = array<i64: 1, 64, 64>}]} {
    %c0 = arith.constant 0 : index
    %c0_0 = arith.constant 0 : index
    %c0_1 = arith.constant 0 : index
    %0 = vector.load %arg2[%c0, %c0_0, %c0_1] : memref<1x64x64xbf16, #tpu.memory_space<vmem>>, vector<1x64x64xbf16>
    %1 = vector.shape_cast %0 : vector<1x64x64xbf16> to vector<64x64xbf16>
    %c0_2 = arith.constant 0 : index
    %c0_3 = arith.constant 0 : index
    %2 = vector.load %arg4[%c0_2, %c0_3] : memref<64x64xbf16, #tpu.memory_space<vmem>>, vector<64x64xbf16>
    %cst = arith.constant dense<0.000000e+00> : vector<64x64xf32>
    %3 = tpu.matmul %1, %2, %cst {dimension_numbers = #tpu.dot_dimension_numbers<[1], [0], [0], [1], [0, 0, 1, 1], [], []>} : vector<64x64xbf16>, vector<64x64xbf16>, vector<64x64xf32> -> vector<64x64xf32>
    %c0_4 = arith.constant 0 : index
    %c0_5 = arith.constant 0 : index
    %4 = vector.load %arg5[%c0_4, %c0_5] : memref<1x64xf32, #tpu.memory_space<vmem>>, vector<1x64xf32>
    %5 = vector.broadcast %4 : vector<1x64xf32> to vector<64x64xf32>
    %6 = arith.addf %3, %5 : vector<64x64xf32>
    %cst_6 = arith.constant 0.353553385 : f32
    %7 = vector.broadcast %cst_6 : f32 to vector<64x64xf32>
    %8 = arith.mulf %6, %7 : vector<64x64xf32>
    %9 = arith.truncf %8 : vector<64x64xf32> to vector<64x64xbf16>
    %c0_7 = arith.constant 0 : index
    %c0_8 = arith.constant 0 : index
    %c0_9 = arith.constant 0 : index
    %10 = vector.load %arg3[%c0_7, %c0_8, %c0_9] : memref<1x16x256xbf16, #tpu.memory_space<vmem>>, vector<1x16x256xbf16>
    %11 = vector.shape_cast %10 : vector<1x16x256xbf16> to vector<16x256xbf16>
    %c0_10 = arith.constant 0 : index
    %c0_11 = arith.constant 0 : index
    %12 = vector.load %arg6[%c0_10, %c0_11] : memref<256x64xbf16, #tpu.memory_space<vmem>>, vector<256x64xbf16>
    %cst_12 = arith.constant dense<0.000000e+00> : vector<16x64xf32>
    %13 = tpu.matmul %11, %12, %cst_12 {dimension_numbers = #tpu.dot_dimension_numbers<[1], [0], [0], [1], [0, 0, 1, 1], [], []>} : vector<16x256xbf16>, vector<256x64xbf16>, vector<16x64xf32> -> vector<16x64xf32>
    %c0_13 = arith.constant 0 : index
    %c0_14 = arith.constant 0 : index
    %14 = vector.load %arg7[%c0_13, %c0_14] : memref<1x64xf32, #tpu.memory_space<vmem>>, vector<1x64xf32>
    %15 = vector.broadcast %14 : vector<1x64xf32> to vector<16x64xf32>
    %16 = arith.addf %13, %15 : vector<16x64xf32>
    %cst_15 = arith.constant dense<0.000000e+00> : vector<16xf32>
    %17 = vector.multi_reduction <add>, %16, %cst_15 [1] : vector<16x64xf32> to vector<16xf32>
    %18 = vector.shape_cast %17 : vector<16xf32> to vector<16x1xf32>
    %cst_16 = arith.constant 6.400000e+01 : f32
    %19 = vector.broadcast %cst_16 : f32 to vector<16x1xf32>
    %20 = arith.divf %18, %19 : vector<16x1xf32>
    %21 = vector.broadcast %20 : vector<16x1xf32> to vector<16x64xf32>
    %22 = arith.subf %16, %21 : vector<16x64xf32>
    %23 = arith.mulf %22, %22 : vector<16x64xf32>
    %cst_17 = arith.constant dense<0.000000e+00> : vector<16xf32>
    %24 = vector.multi_reduction <add>, %23, %cst_17 [1] : vector<16x64xf32> to vector<16xf32>
    %25 = vector.shape_cast %24 : vector<16xf32> to vector<16x1xf32>
    %cst_18 = arith.constant 6.400000e+01 : f32
    %26 = vector.broadcast %cst_18 : f32 to vector<16x1xf32>
    %27 = arith.divf %25, %26 : vector<16x1xf32>
    %28 = vector.broadcast %20 : vector<16x1xf32> to vector<16x64xf32>
    %29 = arith.subf %16, %28 : vector<16x64xf32>
    %cst_19 = arith.constant 9.99999974E-6 : f32
    %30 = vector.broadcast %cst_19 : f32 to vector<16x1xf32>
    %31 = arith.addf %27, %30 : vector<16x1xf32>
    %32 = math.rsqrt %31 : vector<16x1xf32>
    %33 = vector.broadcast %32 : vector<16x1xf32> to vector<16x64xf32>
    %34 = arith.mulf %29, %33 : vector<16x64xf32>
    %c0_20 = arith.constant 0 : index
    %c0_21 = arith.constant 0 : index
    %35 = vector.load %arg8[%c0_20, %c0_21] : memref<1x64xf32, #tpu.memory_space<vmem>>, vector<1x64xf32>
    %36 = vector.broadcast %35 : vector<1x64xf32> to vector<16x64xf32>
    %37 = arith.mulf %34, %36 : vector<16x64xf32>
    %c0_22 = arith.constant 0 : index
    %c0_23 = arith.constant 0 : index
    %38 = vector.load %arg9[%c0_22, %c0_23] : memref<1x64xf32, #tpu.memory_space<vmem>>, vector<1x64xf32>
    %39 = vector.broadcast %38 : vector<1x64xf32> to vector<16x64xf32>
    %40 = arith.addf %37, %39 : vector<16x64xf32>
    %41 = arith.truncf %40 : vector<16x64xf32> to vector<16x64xbf16>
    %c0_24 = arith.constant 0 : index
    %c0_25 = arith.constant 0 : index
    %42 = vector.load %arg10[%c0_24, %c0_25] : memref<64x128xbf16, #tpu.memory_space<vmem>>, vector<64x128xbf16>
    %cst_26 = arith.constant dense<0.000000e+00> : vector<16x128xf32>
    %43 = tpu.matmul %41, %42, %cst_26 {dimension_numbers = #tpu.dot_dimension_numbers<[1], [0], [0], [1], [0, 0, 1, 1], [], []>} : vector<16x64xbf16>, vector<64x128xbf16>, vector<16x128xf32> -> vector<16x128xf32>
    %c0_27 = arith.constant 0 : index
    %c0_28 = arith.constant 0 : index
    %44 = vector.load %arg11[%c0_27, %c0_28] : memref<1x128xf32, #tpu.memory_space<vmem>>, vector<1x128xf32>
    %45 = vector.broadcast %44 : vector<1x128xf32> to vector<16x128xf32>
    %46 = arith.addf %43, %45 : vector<16x128xf32>
    %47 = arith.truncf %46 : vector<16x128xf32> to vector<16x128xbf16>
    %48 = vector.extract_strided_slice %47 {offsets = [0, 0], sizes = [16, 64], strides = [1, 1]} : vector<16x128xbf16> to vector<16x64xbf16>
    %49 = vector.extract_strided_slice %47 {offsets = [0, 64], sizes = [16, 64], strides = [1, 1]} : vector<16x128xbf16> to vector<16x64xbf16>
    %cst_29 = arith.constant 0.000000e+00 : f32
    %50 = vector.broadcast %cst_29 : f32 to vector<64x64xf32>
    %51 = vector.extract_strided_slice %9 {offsets = [0, 0], sizes = [64, 8], strides = [1, 1]} : vector<64x64xbf16> to vector<64x8xbf16>
    %52 = vector.extract_strided_slice %48 {offsets = [0, 0], sizes = [16, 8], strides = [1, 1]} : vector<16x64xbf16> to vector<16x8xbf16>
    %53 = vector.extract_strided_slice %49 {offsets = [0, 0], sizes = [16, 8], strides = [1, 1]} : vector<16x64xbf16> to vector<16x8xbf16>
    %cst_30 = arith.constant dense<0.000000e+00> : vector<64x16xf32>
    %54 = tpu.matmul %51, %52, %cst_30 {dimension_numbers = #tpu.dot_dimension_numbers<[1], [1], [0], [0], [0, 0, 1, 0], [], []>} : vector<64x8xbf16>, vector<16x8xbf16>, vector<64x16xf32> -> vector<64x16xf32>
    %cst_31 = arith.constant dense<0xFF800000> : vector<64xf32>
    %55 = vector.multi_reduction <maximumf>, %54, %cst_31 [1] : vector<64x16xf32> to vector<64xf32>
    %56 = vector.shape_cast %55 : vector<64xf32> to vector<64x1xf32>
    %57 = vector.broadcast %56 : vector<64x1xf32> to vector<64x16xf32>
    %58 = arith.subf %54, %57 : vector<64x16xf32>
    %59 = math.exp %58 : vector<64x16xf32>
    %cst_32 = arith.constant dense<0.000000e+00> : vector<64xf32>
    %60 = vector.multi_reduction <add>, %59, %cst_32 [1] : vector<64x16xf32> to vector<64xf32>
    %61 = vector.shape_cast %60 : vector<64xf32> to vector<64x1xf32>
    %62 = tpu.reciprocal %61 : vector<64x1xf32> -> vector<64x1xf32>
    %63 = vector.broadcast %62 : vector<64x1xf32> to vector<64x16xf32>
    %64 = arith.mulf %59, %63 : vector<64x16xf32>
    %65 = arith.truncf %64 : vector<64x16xf32> to vector<64x16xbf16>
    %cst_33 = arith.constant dense<0.000000e+00> : vector<64x8xf32>
    %66 = tpu.matmul %65, %53, %cst_33 {dimension_numbers = #tpu.dot_dimension_numbers<[1], [0], [0], [1], [0, 0, 1, 1], [], []>} : vector<64x16xbf16>, vector<16x8xbf16>, vector<64x8xf32> -> vector<64x8xf32>
    %67 = arith.truncf %66 : vector<64x8xf32> to vector<64x8xbf16>
    %c0_34 = arith.constant 0 : index
    %c0_35 = arith.constant 0 : index
    %68 = vector.load %arg12[%c0_34, %c0_35] : memref<64x64xbf16, #tpu.memory_space<vmem>>, vector<8x64xbf16>
    %cst_36 = arith.constant dense<0.000000e+00> : vector<64x64xf32>
    %69 = tpu.matmul %67, %68, %cst_36 {dimension_numbers = #tpu.dot_dimension_numbers<[1], [0], [0], [1], [0, 0, 1, 1], [], []>} : vector<64x8xbf16>, vector<8x64xbf16>, vector<64x64xf32> -> vector<64x64xf32>
    %70 = arith.addf %50, %69 : vector<64x64xf32>
    %71 = vector.extract_strided_slice %9 {offsets = [0, 8], sizes = [64, 8], strides = [1, 1]} : vector<64x64xbf16> to vector<64x8xbf16>
    %72 = vector.extract_strided_slice %48 {offsets = [0, 8], sizes = [16, 8], strides = [1, 1]} : vector<16x64xbf16> to vector<16x8xbf16>
    %73 = vector.extract_strided_slice %49 {offsets = [0, 8], sizes = [16, 8], strides = [1, 1]} : vector<16x64xbf16> to vector<16x8xbf16>
    %cst_37 = arith.constant dense<0.000000e+00> : vector<64x16xf32>
    %74 = tpu.matmul %71, %72, %cst_37 {dimension_numbers = #tpu.dot_dimension_numbers<[1], [1], [0], [0], [0, 0, 1, 0], [], []>} : vector<64x8xbf16>, vector<16x8xbf16>, vector<64x16xf32> -> vector<64x16xf32>
    %cst_38 = arith.constant dense<0xFF800000> : vector<64xf32>
    %75 = vector.multi_reduction <maximumf>, %74, %cst_38 [1] : vector<64x16xf32> to vector<64xf32>
    %76 = vector.shape_cast %75 : vector<64xf32> to vector<64x1xf32>
    %77 = vector.broadcast %76 : vector<64x1xf32> to vector<64x16xf32>
    %78 = arith.subf %74, %77 : vector<64x16xf32>
    %79 = math.exp %78 : vector<64x16xf32>
    %cst_39 = arith.constant dense<0.000000e+00> : vector<64xf32>
    %80 = vector.multi_reduction <add>, %79, %cst_39 [1] : vector<64x16xf32> to vector<64xf32>
    %81 = vector.shape_cast %80 : vector<64xf32> to vector<64x1xf32>
    %82 = tpu.reciprocal %81 : vector<64x1xf32> -> vector<64x1xf32>
    %83 = vector.broadcast %82 : vector<64x1xf32> to vector<64x16xf32>
    %84 = arith.mulf %79, %83 : vector<64x16xf32>
    %85 = arith.truncf %84 : vector<64x16xf32> to vector<64x16xbf16>
    %cst_40 = arith.constant dense<0.000000e+00> : vector<64x8xf32>
    %86 = tpu.matmul %85, %73, %cst_40 {dimension_numbers = #tpu.dot_dimension_numbers<[1], [0], [0], [1], [0, 0, 1, 1], [], []>} : vector<64x16xbf16>, vector<16x8xbf16>, vector<64x8xf32> -> vector<64x8xf32>
    %87 = arith.truncf %86 : vector<64x8xf32> to vector<64x8xbf16>
    %c8 = arith.constant 8 : index
    %c0_41 = arith.constant 0 : index
    %88 = vector.load %arg12[%c8, %c0_41] : memref<64x64xbf16, #tpu.memory_space<vmem>>, vector<8x64xbf16>
    %cst_42 = arith.constant dense<0.000000e+00> : vector<64x64xf32>
    %89 = tpu.matmul %87, %88, %cst_42 {dimension_numbers = #tpu.dot_dimension_numbers<[1], [0], [0], [1], [0, 0, 1, 1], [], []>} : vector<64x8xbf16>, vector<8x64xbf16>, vector<64x64xf32> -> vector<64x64xf32>
    %90 = arith.addf %70, %89 : vector<64x64xf32>
    %91 = vector.extract_strided_slice %9 {offsets = [0, 16], sizes = [64, 8], strides = [1, 1]} : vector<64x64xbf16> to vector<64x8xbf16>
    %92 = vector.extract_strided_slice %48 {offsets = [0, 16], sizes = [16, 8], strides = [1, 1]} : vector<16x64xbf16> to vector<16x8xbf16>
    %93 = vector.extract_strided_slice %49 {offsets = [0, 16], sizes = [16, 8], strides = [1, 1]} : vector<16x64xbf16> to vector<16x8xbf16>
    %cst_43 = arith.constant dense<0.000000e+00> : vector<64x16xf32>
    %94 = tpu.matmul %91, %92, %cst_43 {dimension_numbers = #tpu.dot_dimension_numbers<[1], [1], [0], [0], [0, 0, 1, 0], [], []>} : vector<64x8xbf16>, vector<16x8xbf16>, vector<64x16xf32> -> vector<64x16xf32>
    %cst_44 = arith.constant dense<0xFF800000> : vector<64xf32>
    %95 = vector.multi_reduction <maximumf>, %94, %cst_44 [1] : vector<64x16xf32> to vector<64xf32>
    %96 = vector.shape_cast %95 : vector<64xf32> to vector<64x1xf32>
    %97 = vector.broadcast %96 : vector<64x1xf32> to vector<64x16xf32>
    %98 = arith.subf %94, %97 : vector<64x16xf32>
    %99 = math.exp %98 : vector<64x16xf32>
    %cst_45 = arith.constant dense<0.000000e+00> : vector<64xf32>
    %100 = vector.multi_reduction <add>, %99, %cst_45 [1] : vector<64x16xf32> to vector<64xf32>
    %101 = vector.shape_cast %100 : vector<64xf32> to vector<64x1xf32>
    %102 = tpu.reciprocal %101 : vector<64x1xf32> -> vector<64x1xf32>
    %103 = vector.broadcast %102 : vector<64x1xf32> to vector<64x16xf32>
    %104 = arith.mulf %99, %103 : vector<64x16xf32>
    %105 = arith.truncf %104 : vector<64x16xf32> to vector<64x16xbf16>
    %cst_46 = arith.constant dense<0.000000e+00> : vector<64x8xf32>
    %106 = tpu.matmul %105, %93, %cst_46 {dimension_numbers = #tpu.dot_dimension_numbers<[1], [0], [0], [1], [0, 0, 1, 1], [], []>} : vector<64x16xbf16>, vector<16x8xbf16>, vector<64x8xf32> -> vector<64x8xf32>
    %107 = arith.truncf %106 : vector<64x8xf32> to vector<64x8xbf16>
    %c16 = arith.constant 16 : index
    %c0_47 = arith.constant 0 : index
    %108 = vector.load %arg12[%c16, %c0_47] : memref<64x64xbf16, #tpu.memory_space<vmem>>, vector<8x64xbf16>
    %cst_48 = arith.constant dense<0.000000e+00> : vector<64x64xf32>
    %109 = tpu.matmul %107, %108, %cst_48 {dimension_numbers = #tpu.dot_dimension_numbers<[1], [0], [0], [1], [0, 0, 1, 1], [], []>} : vector<64x8xbf16>, vector<8x64xbf16>, vector<64x64xf32> -> vector<64x64xf32>
    %110 = arith.addf %90, %109 : vector<64x64xf32>
    %111 = vector.extract_strided_slice %9 {offsets = [0, 24], sizes = [64, 8], strides = [1, 1]} : vector<64x64xbf16> to vector<64x8xbf16>
    %112 = vector.extract_strided_slice %48 {offsets = [0, 24], sizes = [16, 8], strides = [1, 1]} : vector<16x64xbf16> to vector<16x8xbf16>
    %113 = vector.extract_strided_slice %49 {offsets = [0, 24], sizes = [16, 8], strides = [1, 1]} : vector<16x64xbf16> to vector<16x8xbf16>
    %cst_49 = arith.constant dense<0.000000e+00> : vector<64x16xf32>
    %114 = tpu.matmul %111, %112, %cst_49 {dimension_numbers = #tpu.dot_dimension_numbers<[1], [1], [0], [0], [0, 0, 1, 0], [], []>} : vector<64x8xbf16>, vector<16x8xbf16>, vector<64x16xf32> -> vector<64x16xf32>
    %cst_50 = arith.constant dense<0xFF800000> : vector<64xf32>
    %115 = vector.multi_reduction <maximumf>, %114, %cst_50 [1] : vector<64x16xf32> to vector<64xf32>
    %116 = vector.shape_cast %115 : vector<64xf32> to vector<64x1xf32>
    %117 = vector.broadcast %116 : vector<64x1xf32> to vector<64x16xf32>
    %118 = arith.subf %114, %117 : vector<64x16xf32>
    %119 = math.exp %118 : vector<64x16xf32>
    %cst_51 = arith.constant dense<0.000000e+00> : vector<64xf32>
    %120 = vector.multi_reduction <add>, %119, %cst_51 [1] : vector<64x16xf32> to vector<64xf32>
    %121 = vector.shape_cast %120 : vector<64xf32> to vector<64x1xf32>
    %122 = tpu.reciprocal %121 : vector<64x1xf32> -> vector<64x1xf32>
    %123 = vector.broadcast %122 : vector<64x1xf32> to vector<64x16xf32>
    %124 = arith.mulf %119, %123 : vector<64x16xf32>
    %125 = arith.truncf %124 : vector<64x16xf32> to vector<64x16xbf16>
    %cst_52 = arith.constant dense<0.000000e+00> : vector<64x8xf32>
    %126 = tpu.matmul %125, %113, %cst_52 {dimension_numbers = #tpu.dot_dimension_numbers<[1], [0], [0], [1], [0, 0, 1, 1], [], []>} : vector<64x16xbf16>, vector<16x8xbf16>, vector<64x8xf32> -> vector<64x8xf32>
    %127 = arith.truncf %126 : vector<64x8xf32> to vector<64x8xbf16>
    %c24 = arith.constant 24 : index
    %c0_53 = arith.constant 0 : index
    %128 = vector.load %arg12[%c24, %c0_53] : memref<64x64xbf16, #tpu.memory_space<vmem>>, vector<8x64xbf16>
    %cst_54 = arith.constant dense<0.000000e+00> : vector<64x64xf32>
    %129 = tpu.matmul %127, %128, %cst_54 {dimension_numbers = #tpu.dot_dimension_numbers<[1], [0], [0], [1], [0, 0, 1, 1], [], []>} : vector<64x8xbf16>, vector<8x64xbf16>, vector<64x64xf32> -> vector<64x64xf32>
    %130 = arith.addf %110, %129 : vector<64x64xf32>
    %131 = vector.extract_strided_slice %9 {offsets = [0, 32], sizes = [64, 8], strides = [1, 1]} : vector<64x64xbf16> to vector<64x8xbf16>
    %132 = vector.extract_strided_slice %48 {offsets = [0, 32], sizes = [16, 8], strides = [1, 1]} : vector<16x64xbf16> to vector<16x8xbf16>
    %133 = vector.extract_strided_slice %49 {offsets = [0, 32], sizes = [16, 8], strides = [1, 1]} : vector<16x64xbf16> to vector<16x8xbf16>
    %cst_55 = arith.constant dense<0.000000e+00> : vector<64x16xf32>
    %134 = tpu.matmul %131, %132, %cst_55 {dimension_numbers = #tpu.dot_dimension_numbers<[1], [1], [0], [0], [0, 0, 1, 0], [], []>} : vector<64x8xbf16>, vector<16x8xbf16>, vector<64x16xf32> -> vector<64x16xf32>
    %cst_56 = arith.constant dense<0xFF800000> : vector<64xf32>
    %135 = vector.multi_reduction <maximumf>, %134, %cst_56 [1] : vector<64x16xf32> to vector<64xf32>
    %136 = vector.shape_cast %135 : vector<64xf32> to vector<64x1xf32>
    %137 = vector.broadcast %136 : vector<64x1xf32> to vector<64x16xf32>
    %138 = arith.subf %134, %137 : vector<64x16xf32>
    %139 = math.exp %138 : vector<64x16xf32>
    %cst_57 = arith.constant dense<0.000000e+00> : vector<64xf32>
    %140 = vector.multi_reduction <add>, %139, %cst_57 [1] : vector<64x16xf32> to vector<64xf32>
    %141 = vector.shape_cast %140 : vector<64xf32> to vector<64x1xf32>
    %142 = tpu.reciprocal %141 : vector<64x1xf32> -> vector<64x1xf32>
    %143 = vector.broadcast %142 : vector<64x1xf32> to vector<64x16xf32>
    %144 = arith.mulf %139, %143 : vector<64x16xf32>
    %145 = arith.truncf %144 : vector<64x16xf32> to vector<64x16xbf16>
    %cst_58 = arith.constant dense<0.000000e+00> : vector<64x8xf32>
    %146 = tpu.matmul %145, %133, %cst_58 {dimension_numbers = #tpu.dot_dimension_numbers<[1], [0], [0], [1], [0, 0, 1, 1], [], []>} : vector<64x16xbf16>, vector<16x8xbf16>, vector<64x8xf32> -> vector<64x8xf32>
    %147 = arith.truncf %146 : vector<64x8xf32> to vector<64x8xbf16>
    %c32 = arith.constant 32 : index
    %c0_59 = arith.constant 0 : index
    %148 = vector.load %arg12[%c32, %c0_59] : memref<64x64xbf16, #tpu.memory_space<vmem>>, vector<8x64xbf16>
    %cst_60 = arith.constant dense<0.000000e+00> : vector<64x64xf32>
    %149 = tpu.matmul %147, %148, %cst_60 {dimension_numbers = #tpu.dot_dimension_numbers<[1], [0], [0], [1], [0, 0, 1, 1], [], []>} : vector<64x8xbf16>, vector<8x64xbf16>, vector<64x64xf32> -> vector<64x64xf32>
    %150 = arith.addf %130, %149 : vector<64x64xf32>
    %151 = vector.extract_strided_slice %9 {offsets = [0, 40], sizes = [64, 8], strides = [1, 1]} : vector<64x64xbf16> to vector<64x8xbf16>
    %152 = vector.extract_strided_slice %48 {offsets = [0, 40], sizes = [16, 8], strides = [1, 1]} : vector<16x64xbf16> to vector<16x8xbf16>
    %153 = vector.extract_strided_slice %49 {offsets = [0, 40], sizes = [16, 8], strides = [1, 1]} : vector<16x64xbf16> to vector<16x8xbf16>
    %cst_61 = arith.constant dense<0.000000e+00> : vector<64x16xf32>
    %154 = tpu.matmul %151, %152, %cst_61 {dimension_numbers = #tpu.dot_dimension_numbers<[1], [1], [0], [0], [0, 0, 1, 0], [], []>} : vector<64x8xbf16>, vector<16x8xbf16>, vector<64x16xf32> -> vector<64x16xf32>
    %cst_62 = arith.constant dense<0xFF800000> : vector<64xf32>
    %155 = vector.multi_reduction <maximumf>, %154, %cst_62 [1] : vector<64x16xf32> to vector<64xf32>
    %156 = vector.shape_cast %155 : vector<64xf32> to vector<64x1xf32>
    %157 = vector.broadcast %156 : vector<64x1xf32> to vector<64x16xf32>
    %158 = arith.subf %154, %157 : vector<64x16xf32>
    %159 = math.exp %158 : vector<64x16xf32>
    %cst_63 = arith.constant dense<0.000000e+00> : vector<64xf32>
    %160 = vector.multi_reduction <add>, %159, %cst_63 [1] : vector<64x16xf32> to vector<64xf32>
    %161 = vector.shape_cast %160 : vector<64xf32> to vector<64x1xf32>
    %162 = tpu.reciprocal %161 : vector<64x1xf32> -> vector<64x1xf32>
    %163 = vector.broadcast %162 : vector<64x1xf32> to vector<64x16xf32>
    %164 = arith.mulf %159, %163 : vector<64x16xf32>
    %165 = arith.truncf %164 : vector<64x16xf32> to vector<64x16xbf16>
    %cst_64 = arith.constant dense<0.000000e+00> : vector<64x8xf32>
    %166 = tpu.matmul %165, %153, %cst_64 {dimension_numbers = #tpu.dot_dimension_numbers<[1], [0], [0], [1], [0, 0, 1, 1], [], []>} : vector<64x16xbf16>, vector<16x8xbf16>, vector<64x8xf32> -> vector<64x8xf32>
    %167 = arith.truncf %166 : vector<64x8xf32> to vector<64x8xbf16>
    %c40 = arith.constant 40 : index
    %c0_65 = arith.constant 0 : index
    %168 = vector.load %arg12[%c40, %c0_65] : memref<64x64xbf16, #tpu.memory_space<vmem>>, vector<8x64xbf16>
    %cst_66 = arith.constant dense<0.000000e+00> : vector<64x64xf32>
    %169 = tpu.matmul %167, %168, %cst_66 {dimension_numbers = #tpu.dot_dimension_numbers<[1], [0], [0], [1], [0, 0, 1, 1], [], []>} : vector<64x8xbf16>, vector<8x64xbf16>, vector<64x64xf32> -> vector<64x64xf32>
    %170 = arith.addf %150, %169 : vector<64x64xf32>
    %171 = vector.extract_strided_slice %9 {offsets = [0, 48], sizes = [64, 8], strides = [1, 1]} : vector<64x64xbf16> to vector<64x8xbf16>
    %172 = vector.extract_strided_slice %48 {offsets = [0, 48], sizes = [16, 8], strides = [1, 1]} : vector<16x64xbf16> to vector<16x8xbf16>
    %173 = vector.extract_strided_slice %49 {offsets = [0, 48], sizes = [16, 8], strides = [1, 1]} : vector<16x64xbf16> to vector<16x8xbf16>
    %cst_67 = arith.constant dense<0.000000e+00> : vector<64x16xf32>
    %174 = tpu.matmul %171, %172, %cst_67 {dimension_numbers = #tpu.dot_dimension_numbers<[1], [1], [0], [0], [0, 0, 1, 0], [], []>} : vector<64x8xbf16>, vector<16x8xbf16>, vector<64x16xf32> -> vector<64x16xf32>
    %cst_68 = arith.constant dense<0xFF800000> : vector<64xf32>
    %175 = vector.multi_reduction <maximumf>, %174, %cst_68 [1] : vector<64x16xf32> to vector<64xf32>
    %176 = vector.shape_cast %175 : vector<64xf32> to vector<64x1xf32>
    %177 = vector.broadcast %176 : vector<64x1xf32> to vector<64x16xf32>
    %178 = arith.subf %174, %177 : vector<64x16xf32>
    %179 = math.exp %178 : vector<64x16xf32>
    %cst_69 = arith.constant dense<0.000000e+00> : vector<64xf32>
    %180 = vector.multi_reduction <add>, %179, %cst_69 [1] : vector<64x16xf32> to vector<64xf32>
    %181 = vector.shape_cast %180 : vector<64xf32> to vector<64x1xf32>
    %182 = tpu.reciprocal %181 : vector<64x1xf32> -> vector<64x1xf32>
    %183 = vector.broadcast %182 : vector<64x1xf32> to vector<64x16xf32>
    %184 = arith.mulf %179, %183 : vector<64x16xf32>
    %185 = arith.truncf %184 : vector<64x16xf32> to vector<64x16xbf16>
    %cst_70 = arith.constant dense<0.000000e+00> : vector<64x8xf32>
    %186 = tpu.matmul %185, %173, %cst_70 {dimension_numbers = #tpu.dot_dimension_numbers<[1], [0], [0], [1], [0, 0, 1, 1], [], []>} : vector<64x16xbf16>, vector<16x8xbf16>, vector<64x8xf32> -> vector<64x8xf32>
    %187 = arith.truncf %186 : vector<64x8xf32> to vector<64x8xbf16>
    %c48 = arith.constant 48 : index
    %c0_71 = arith.constant 0 : index
    %188 = vector.load %arg12[%c48, %c0_71] : memref<64x64xbf16, #tpu.memory_space<vmem>>, vector<8x64xbf16>
    %cst_72 = arith.constant dense<0.000000e+00> : vector<64x64xf32>
    %189 = tpu.matmul %187, %188, %cst_72 {dimension_numbers = #tpu.dot_dimension_numbers<[1], [0], [0], [1], [0, 0, 1, 1], [], []>} : vector<64x8xbf16>, vector<8x64xbf16>, vector<64x64xf32> -> vector<64x64xf32>
    %190 = arith.addf %170, %189 : vector<64x64xf32>
    %191 = vector.extract_strided_slice %9 {offsets = [0, 56], sizes = [64, 8], strides = [1, 1]} : vector<64x64xbf16> to vector<64x8xbf16>
    %192 = vector.extract_strided_slice %48 {offsets = [0, 56], sizes = [16, 8], strides = [1, 1]} : vector<16x64xbf16> to vector<16x8xbf16>
    %193 = vector.extract_strided_slice %49 {offsets = [0, 56], sizes = [16, 8], strides = [1, 1]} : vector<16x64xbf16> to vector<16x8xbf16>
    %cst_73 = arith.constant dense<0.000000e+00> : vector<64x16xf32>
    %194 = tpu.matmul %191, %192, %cst_73 {dimension_numbers = #tpu.dot_dimension_numbers<[1], [1], [0], [0], [0, 0, 1, 0], [], []>} : vector<64x8xbf16>, vector<16x8xbf16>, vector<64x16xf32> -> vector<64x16xf32>
    %cst_74 = arith.constant dense<0xFF800000> : vector<64xf32>
    %195 = vector.multi_reduction <maximumf>, %194, %cst_74 [1] : vector<64x16xf32> to vector<64xf32>
    %196 = vector.shape_cast %195 : vector<64xf32> to vector<64x1xf32>
    %197 = vector.broadcast %196 : vector<64x1xf32> to vector<64x16xf32>
    %198 = arith.subf %194, %197 : vector<64x16xf32>
    %199 = math.exp %198 : vector<64x16xf32>
    %cst_75 = arith.constant dense<0.000000e+00> : vector<64xf32>
    %200 = vector.multi_reduction <add>, %199, %cst_75 [1] : vector<64x16xf32> to vector<64xf32>
    %201 = vector.shape_cast %200 : vector<64xf32> to vector<64x1xf32>
    %202 = tpu.reciprocal %201 : vector<64x1xf32> -> vector<64x1xf32>
    %203 = vector.broadcast %202 : vector<64x1xf32> to vector<64x16xf32>
    %204 = arith.mulf %199, %203 : vector<64x16xf32>
    %205 = arith.truncf %204 : vector<64x16xf32> to vector<64x16xbf16>
    %cst_76 = arith.constant dense<0.000000e+00> : vector<64x8xf32>
    %206 = tpu.matmul %205, %193, %cst_76 {dimension_numbers = #tpu.dot_dimension_numbers<[1], [0], [0], [1], [0, 0, 1, 1], [], []>} : vector<64x16xbf16>, vector<16x8xbf16>, vector<64x8xf32> -> vector<64x8xf32>
    %207 = arith.truncf %206 : vector<64x8xf32> to vector<64x8xbf16>
    %c56 = arith.constant 56 : index
    %c0_77 = arith.constant 0 : index
    %208 = vector.load %arg12[%c56, %c0_77] : memref<64x64xbf16, #tpu.memory_space<vmem>>, vector<8x64xbf16>
    %cst_78 = arith.constant dense<0.000000e+00> : vector<64x64xf32>
    %209 = tpu.matmul %207, %208, %cst_78 {dimension_numbers = #tpu.dot_dimension_numbers<[1], [0], [0], [1], [0, 0, 1, 1], [], []>} : vector<64x8xbf16>, vector<8x64xbf16>, vector<64x64xf32> -> vector<64x64xf32>
    %210 = arith.addf %190, %209 : vector<64x64xf32>
    %c0_79 = arith.constant 0 : index
    %c0_80 = arith.constant 0 : index
    %211 = vector.load %arg13[%c0_79, %c0_80] : memref<1x64xf32, #tpu.memory_space<vmem>>, vector<1x64xf32>
    %212 = vector.broadcast %211 : vector<1x64xf32> to vector<64x64xf32>
    %213 = arith.addf %210, %212 : vector<64x64xf32>
    %c0_81 = arith.constant 0 : index
    %c0_82 = arith.constant 0 : index
    %c0_83 = arith.constant 0 : index
    %214 = vector.load %arg14[%c0_81, %c0_82, %c0_83] : memref<1x64x64xf32, #tpu.memory_space<vmem>>, vector<1x64x64xf32>
    %215 = vector.shape_cast %214 : vector<1x64x64xf32> to vector<64x64xf32>
    %216 = vector.shape_cast %213 : vector<64x64xf32> to vector<1x64x64xf32>
    tpu.vector_store %arg14[%c0_81, %c0_82, %c0_83], %216 {strides = array<i32>} : memref<1x64x64xf32, #tpu.memory_space<vmem>>, vector<1x64x64xf32>,
    return
  }
  func.func @transform_0(%arg0: i32, %arg1: i32) -> (i32, i32, i32) {
    %c0_i32 = arith.constant 0 : i32
    %c0_i32_0 = arith.constant 0 : i32
    return %arg0, %arg1, %c0_i32 : i32, i32, i32
  }
  func.func @transform_1(%arg0: i32, %arg1: i32) -> (i32, i32, i32) {
    %c0_i32 = arith.constant 0 : i32
    %c0_i32_0 = arith.constant 0 : i32
    %c0_i32_1 = arith.constant 0 : i32
    return %arg0, %c0_i32, %c0_i32_0 : i32, i32, i32
  }
  func.func @transform_2(%arg0: i32, %arg1: i32) -> (i32, i32) {
    %c0_i32 = arith.constant 0 : i32
    %c0_i32_0 = arith.constant 0 : i32
    %c0_i32_1 = arith.constant 0 : i32
    return %c0_i32, %c0_i32_0 : i32, i32
  }
  func.func @transform_3(%arg0: i32, %arg1: i32) -> (i32, i32) {
    %c0_i32 = arith.constant 0 : i32
    %c0_i32_0 = arith.constant 0 : i32
    %c0_i32_1 = arith.constant 0 : i32
    return %c0_i32, %c0_i32_0 : i32, i32
  }
  func.func @transform_4(%arg0: i32, %arg1: i32) -> (i32, i32) {
    %c0_i32 = arith.constant 0 : i32
    %c0_i32_0 = arith.constant 0 : i32
    %c0_i32_1 = arith.constant 0 : i32
    return %c0_i32, %c0_i32_0 : i32, i32
  }
  func.func @transform_5(%arg0: i32, %arg1: i32) -> (i32, i32) {
    %c0_i32 = arith.constant 0 : i32
    %c0_i32_0 = arith.constant 0 : i32
    %c0_i32_1 = arith.constant 0 : i32
    return %c0_i32, %c0_i32_0 : i32, i32
  }
  func.func @transform_6(%arg0: i32, %arg1: i32) -> (i32, i32) {
    %c0_i32 = arith.constant 0 : i32
    %c0_i32_0 = arith.constant 0 : i32
    %c0_i32_1 = arith.constant 0 : i32
    return %c0_i32, %c0_i32_0 : i32, i32
  }
  func.func @transform_7(%arg0: i32, %arg1: i32) -> (i32, i32) {
    %c0_i32 = arith.constant 0 : i32
    %c0_i32_0 = arith.constant 0 : i32
    %c0_i32_1 = arith.constant 0 : i32
    return %c0_i32, %c0_i32_0 : i32, i32
  }
  func.func @transform_8(%arg0: i32, %arg1: i32) -> (i32, i32) {
    %c0_i32 = arith.constant 0 : i32
    %c0_i32_0 = arith.constant 0 : i32
    %c0_i32_1 = arith.constant 0 : i32
    return %c0_i32, %c0_i32_0 : i32, i32
  }
  func.func @transform_9(%arg0: i32, %arg1: i32) -> (i32, i32) {
    %c0_i32 = arith.constant 0 : i32
    %c0_i32_0 = arith.constant 0 : i32
    %c0_i32_1 = arith.constant 0 : i32
    return %c0_i32, %c0_i32_0 : i32, i32
  }
  func.func @transform_10(%arg0: i32, %arg1: i32) -> (i32, i32) {
    %c0_i32 = arith.constant 0 : i32
    %c0_i32_0 = arith.constant 0 : i32
    %c0_i32_1 = arith.constant 0 : i32
    return %c0_i32, %c0_i32_0 : i32, i32
  }
  func.func @transform_11(%arg0: i32, %arg1: i32) -> (i32, i32) {
    %c0_i32 = arith.constant 0 : i32
    %c0_i32_0 = arith.constant 0 : i32
    %c0_i32_1 = arith.constant 0 : i32
    return %c0_i32, %c0_i32_0 : i32, i32
  }
  func.func @transform_12(%arg0: i32, %arg1: i32) -> (i32, i32, i32) {
    %c0_i32 = arith.constant 0 : i32
    %c0_i32_0 = arith.constant 0 : i32
    return %arg0, %arg1, %c0_i32 : i32, i32, i32
  }
}

</mosaic_0001>

<bundles_post_ra>
// kernel: tpu_custom_call.1
= control target key start
LH: loop header
LB: loop body
LE: loop exit
PB: predicated region body
PF: predicated region fallthrough
CT: control target
= control target key end

     0   :  { %s7132_s0 = inlined_call_operand.hbm [shape: bf16[2,64,64], index: 0, kind: input, shape index: {}]   ;;  %s7133_s1 = inlined_call_operand.hbm [shape: bf16[2,16,256], index: 1, kind: input, shape index: {}]   ;;  %s7134_s2 = inlined_call_operand.hbm [shape: bf16[64,64], index: 2, kind: input, shape index: {}]   ;;  %s7135_s3 = inlined_call_operand.hbm [shape: f32[1,64], index: 3, kind: input, shape index: {}]   ;;  %s7136_s4 = inlined_call_operand.hbm [shape: bf16[256,64], index: 4, kind: input, shape index: {}]   ;;  %s7137_s5 = inlined_call_operand.hbm [shape: f32[1,64], index: 5, kind: input, shape index: {}]   ;;  %s7138_s6 = inlined_call_operand.hbm [shape: f32[1,64], index: 6, kind: input, shape index: {}]   ;;  %s7139_s7 = inlined_call_operand.hbm [shape: f32[1,64], index: 7, kind: input, shape index: {}]   ;;  %s7140_s8 = inlined_call_operand.hbm [shape: bf16[64,128], index: 8, kind: input, shape index: {}]   ;;  %s7141_s9 = inlined_call_operand.hbm [shape: f32[1,128], index: 9, kind: input, shape index: {}]   ;;  %s7142_s10 = inlined_call_operand.hbm [shape: bf16[64,64], index: 10, kind: input, shape index: {}]   ;;  %s7143_s11 = inlined_call_operand.hbm [shape: f32[1,64], index: 11, kind: input, shape index: {}]   ;;  %s7144_s12 = inlined_call_operand.hbm [shape: f32[2,64,64], index: 12, kind: output, shape index: {}]  }
   0x1   :  { %7159 = sst [smem:[#allocation35_spill]] %s7132_s0 }
   0x2   :  { %7160 = sst [smem:[#allocation36_spill]] %s7133_s1 }
   0x3   :  { %7161 = sst [smem:[#allocation37_spill]] %s7134_s2 }
   0x4   :  { %7162 = sst [smem:[#allocation38_spill]] %s7135_s3 }
   0x5   :  { %7163 = sst [smem:[#allocation39_spill]] %s7136_s4 }
   0x6   :  { %7164 = sst [smem:[#allocation40_spill]] %s7137_s5 }
   0x7   :  { %7165 = sst [smem:[#allocation41_spill]] %s7138_s6 }
   0x8   :  { %7166 = sst [smem:[#allocation42_spill]] %s7139_s7 }
   0x9   :  { %7167 = sst [smem:[#allocation43_spill]] %s7140_s8 }
   0xa   :  { %7168 = sst [smem:[#allocation44_spill]] %s7141_s9 }
   0xb   :  { %7169 = sst [smem:[#allocation45_spill]] %s7144_s12 }
   0xc   :  { %17 = vsyncpa [#allocation3], 0 }
   0xd   :  { %19 = vsyncpa [#allocation3 + $0x1], 0 }
   0xe   :  { %20 = vsyncpa [#allocation6], 0 }
   0xf   :  { %22 = vsyncpa [#allocation6 + $0x1], 0 }
  0x10   :  { %23 = vsyncpa [#allocation9], 0 }
  0x11   :  { %24 = vsyncpa [#allocation12], 0 }
  0x12   :  { %25 = vsyncpa [#allocation15], 0 }
  0x13   :  { %26 = vsyncpa [#allocation18], 0 }
  0x14   :  { %27 = vsyncpa [#allocation21], 0 }
  0x15   :  { %28 = vsyncpa [#allocation4], 0 }
  0x16   :  { %30 = vsyncpa [#allocation4 + $0x1], 0  ;;  %s5874_s21 = smov 0   ;;  %s5876_s22 = smov 0  }
  0x17   :  { %s5878_s23 = smov 0   ;;  %s5880_s24 = smov 0  }
  0x18   :  { %s5882_s25 = smov 0   ;;  %s5884_s26 = smov 0  }
  0x19 LB: > { %7170 = sst [smem:[#allocation32_spill]] %s5764_s24  ;;  %s5905_s27 = sadd.s32 4294967295, %s5772_s26   ;;  %s5772_s26 = sphi %s5884_s26, %s36_s26   ;;  %s5768_s25 = sphi %s5882_s25, %s7220_s25   ;;  %s5764_s24 = sphi %s5880_s24, %s7219_s24   ;;  %s5760_s23 = sphi %s5878_s23, %s7218_s23   ;;  %s5756_s22 = sphi %s5876_s22, %s7217_s22   ;;  %s5752_s21 = sphi %s5874_s21, %s7216_s21  }
  0x1a   : > { %7171 = sst [smem:[#allocation33_spill]] %s5905_s27  ;;  %p4169_p0 = scmp.ge.s32.totalorder %s5772_s26, 1 }
  0x1b   : > { %p7152_p1 = scmp.eq.s32.totalorder %s5905_s27, 0  ;;  %p345_p2 = scmp.lt.s32.totalorder %s5772_s26, 3 }
  0x1c   : > { %s5774_s29 = smov [#allocation7]   ;;  %s5775_s14 = smov [#allocation8]  }
  0x1d   : > { %p5910_p3 = pnand %p4169_p0, %p345_p2  ;;  %s357_s30 = sshll.u32 %s5774_s29, 4  ;;  %s5914_s30 = int_to_ptr.vmem [resolvable:$true] %s357_s30 }
  0x1e   : > { %s371_s15 = sshll.u32 %s5775_s14, 4  ;;  %s5776_s16 = smov [#allocation11]   ;;  %s5925_s15 = int_to_ptr.vmem [resolvable:$true] %s371_s15 }
  0x1f   : > { %s7172_s28 = scalar_select %p5910_p3, 1, 0 }
  0x20   : > { %p4887_p4 = pneg %p5910_p3  ;;  %s5927_s17 = sshll.u32 %s5776_s16, 4  ;;  %s396_s17 = int_to_ptr.vmem [resolvable:$true] %s5927_s17 }
  0x21   : > { %7173 = sst [smem:[#allocation34_spill]] %s7172_s28  ;;  %s7175_s2 = sld [smem:[#allocation37_spill]] }
  0x22   : > { %p5921_p6 = pnand %p4887_p4, %p7152_p1 }
  0x24   : > { %p5937_p8 = pneg %p5921_p6 }
  0x27   : > { %s5322_s20 = scalar_lea.hbm %s7175_s2, 512 }
  0x28   : > { %p5323_p7 = scmp.ne.s32.totalorder %s7175_s2, %s5322_s20  ;;  %p5329_p11 = scmp.lt.u32.totalorder %s5322_s20, %s7175_s2 }
  0x2a   : > { %p5325_p9 = pnand %p5937_p8, %p5323_p7 }
  0x2c   : > { %p5326_p10 = pneg %p5325_p9 }
  0x2e   : > { %p5331_p12 = pnand %p5329_p11, %p5326_p10 }
  0x30   : > { %5334 = shalt.err (!%p5331_p12)
}
  0x31   : > { %s5335_s12 = scalar_lea.vmem %s5914_s30, 512  ;;  %p5343_p4 = scmp.lt.s32.totalorder %s5914_s30, %s5914_s30 }
  0x32   : > { %p5336_p13 = scmp.ne.s32.totalorder %s5914_s30, %s5335_s12  ;;  %p5344_p5 = scmp.lt.s32.totalorder %s5335_s12, %s5335_s12 }
  0x34   : > { %p5338_p0 = pnand %p5336_p13, %p5937_p8  ;;  %p5345_p7 = por %p5344_p5, %p5343_p4 }
  0x36   : > { %p5339_p2 = pneg %p5338_p0 }
  0x38   : > { %p5346_p9 = pnand %p5345_p7, %p5339_p2 }
  0x3a   : > { %5349 = shalt.err (!%p5346_p9)
}
  0x3b   : > { %s7154_s18 = smov 64   ;;  %s7156_s19 = smov 4  }
  0x3c   : > { %4890 = dma.hbm_to_vmem [thread:$0]  (!%p5921_p6), %s7175_s2, 512, %s5914_s30, [#allocation6], %s7154_s18, %s7154_s18, %s7156_s19  }
  0x3d   : > { %s7177_s3 = sld [smem:[#allocation38_spill]] }
  0x43   : > { %s5350_s12 = scalar_lea.hbm %s7177_s3, 16 }
  0x44   : > { %p5351_p5 = scmp.ne.s32.totalorder %s7177_s3, %s5350_s12  ;;  %p5357_p12 = scmp.lt.u32.totalorder %s5350_s12, %s7177_s3 }
  0x46   : > { %p5353_p10 = pnand %p5351_p5, %p5937_p8 }
  0x48   : > { %p5354_p11 = pneg %p5353_p10 }
  0x4a   : > { %p5359_p13 = pnand %p5357_p12, %p5354_p11 }
  0x4c   : > { %5362 = shalt.err (!%p5359_p13)
}
  0x4d   : > { %s5363_s30 = scalar_lea.vmem %s5925_s15, 16  ;;  %s5370_s1 = scalar_lea.vmem %s5925_s15, 32 }
  0x4e   : > { %p5364_p0 = scmp.ne.s32.totalorder %s5925_s15, %s5363_s30  ;;  %p5371_p7 = scmp.lt.s32.totalorder %s5925_s15, %s5925_s15 }
  0x4f   : > { %p5372_p9 = scmp.lt.s32.totalorder %s5370_s1, %s5363_s30 }
  0x50   : > { %p5366_p2 = pnand %p5364_p0, %p5937_p8 }
  0x51   : > { %p5373_p5 = por %p5372_p9, %p5371_p7 }
  0x52   : > { %p5367_p4 = pneg %p5366_p2 }
  0x54   : > { %p5374_p10 = pnand %p5373_p5, %p5367_p4 }
  0x56   : > { %5377 = shalt.err (!%p5374_p10)
}
  0x57   : > { %4893 = dma.hbm_to_vmem [thread:$0]  (!%p5921_p6), %s7177_s3, 16, %s5925_s15, [#allocation9]  }
  0x58   : > { %s7178_s5 = sld [smem:[#allocation40_spill]] }
  0x5e   : > { %s5378_s29 = scalar_lea.hbm %s7178_s5, 16 }
  0x5f   : > { %p5379_p11 = scmp.ne.s32.totalorder %s7178_s5, %s5378_s29  ;;  %p5385_p0 = scmp.lt.u32.totalorder %s5378_s29, %s7178_s5 }
  0x61   : > { %p5381_p12 = pnand %p5379_p11, %p5937_p8 }
  0x63   : > { %p5382_p13 = pneg %p5381_p12 }
  0x65   : > { %p5387_p2 = pnand %p5385_p0, %p5382_p13 }
  0x67   : > { %5390 = shalt.err (!%p5387_p2)
}
  0x68   : > { %s5391_s1 = scalar_lea.vmem %s396_s17, 16  ;;  %s5398_s15 = scalar_lea.vmem %s396_s17, 32 }
  0x69   : > { %p5392_p4 = scmp.ne.s32.totalorder %s396_s17, %s5391_s1  ;;  %p5399_p5 = scmp.lt.s32.totalorder %s396_s17, %s396_s17 }
  0x6a   : > { %p5400_p10 = scmp.lt.s32.totalorder %s5398_s15, %s5391_s1 }
  0x6b   : > { %p5394_p7 = pnand %p5392_p4, %p5937_p8 }
  0x6c   : > { %p5401_p1 = por %p5400_p10, %p5399_p5 }
  0x6d   : > { %p5395_p9 = pneg %p5394_p7 }
  0x6f   : > { %p5402_p3 = pnand %p5401_p1, %p5395_p9 }
  0x71   : > { %5405 = shalt.err (!%p5402_p3)
}
  0x72   : > { %4899 = dma.hbm_to_vmem [thread:$0]  (!%p5921_p6), %s7178_s5, 16, %s396_s17, [#allocation12]  }
  0x73   : > { %s5779_s28 = smov [#allocation14]   ;;  %s5780_s29 = smov [#allocation17]  }
  0x74   : > { %s417_s20 = sshll.u32 %s5779_s28, 4  ;;  %s441_s14 = sshll.u32 %s5780_s29, 4  ;;  %s418_s20 = int_to_ptr.vmem [resolvable:$true] %s417_s20  ;;  %s442_s14 = int_to_ptr.vmem [resolvable:$true] %s441_s14 }
  0x75   : > { %s7179_s7 = sld [smem:[#allocation42_spill]] }
  0x7b   : > { %s5406_s30 = scalar_lea.hbm %s7179_s7, 16 }
  0x7c   : > { %p5407_p1 = scmp.ne.s32.totalorder %s7179_s7, %s5406_s30  ;;  %p5413_p12 = scmp.lt.u32.totalorder %s5406_s30, %s7179_s7 }
  0x7e   : > { %p5409_p3 = pnand %p5407_p1, %p5937_p8 }
  0x80   : > { %p5410_p11 = pneg %p5409_p3 }
  0x82   : > { %p5415_p13 = pnand %p5413_p12, %p5410_p11 }
  0x84   : > { %5418 = shalt.err (!%p5415_p13)
}
  0x85   : > { %s5419_s17 = scalar_lea.vmem %s418_s20, 16  ;;  %s5426_s27 = scalar_lea.vmem %s418_s20, 32 }
  0x86   : > { %p5420_p0 = scmp.ne.s32.totalorder %s418_s20, %s5419_s17  ;;  %p5427_p7 = scmp.lt.s32.totalorder %s418_s20, %s418_s20 }
  0x87   : > { %p5428_p9 = scmp.lt.s32.totalorder %s5426_s27, %s5419_s17 }
  0x88   : > { %p5422_p2 = pnand %p5420_p0, %p5937_p8 }
  0x89   : > { %p5429_p5 = por %p5428_p9, %p5427_p7 }
  0x8a   : > { %p5423_p4 = pneg %p5422_p2 }
  0x8c   : > { %p5430_p10 = pnand %p5429_p5, %p5423_p4 }
  0x8e   : > { %5433 = shalt.err (!%p5430_p10)
}
  0x8f   : > { %4905 = dma.hbm_to_vmem [thread:$0]  (!%p5921_p6), %s7179_s7, 16, %s418_s20, [#allocation15]  }
  0x90   : > { %s7180_s9 = sld [smem:[#allocation44_spill]] }
  0x96   : > { %s5434_s12 = scalar_lea.hbm %s7180_s9, 16 }
  0x97   : > { %p5435_p1 = scmp.ne.s32.totalorder %s7180_s9, %s5434_s12  ;;  %p5441_p12 = scmp.lt.u32.totalorder %s5434_s12, %s7180_s9 }
  0x99   : > { %p5437_p3 = pnand %p5435_p1, %p5937_p8 }
  0x9b   : > { %p5438_p11 = pneg %p5437_p3 }
  0x9d   : > { %p5443_p13 = pnand %p5441_p12, %p5438_p11 }
  0x9f   : > { %5446 = shalt.err (!%p5443_p13)
}
  0xa0   : > { %s5447_s17 = scalar_lea.vmem %s442_s14, 16  ;;  %s5454_s20 = scalar_lea.vmem %s442_s14, 32 }
  0xa1   : > { %p5448_p0 = scmp.ne.s32.totalorder %s442_s14, %s5447_s17  ;;  %p5455_p7 = scmp.lt.s32.totalorder %s442_s14, %s442_s14 }
  0xa2   : > { %p5456_p9 = scmp.lt.s32.totalorder %s5454_s20, %s5447_s17 }
  0xa3   : > { %p5450_p2 = pnand %p5448_p0, %p5937_p8 }
  0xa4   : > { %p5457_p5 = por %p5456_p9, %p5455_p7 }
  0xa5   : > { %p5451_p4 = pneg %p5450_p2 }
  0xa7   : > { %p5458_p10 = pnand %p5457_p5, %p5451_p4 }
  0xa9   : > { %5461 = shalt.err (!%p5458_p10)
}
  0xaa   : > { %4911 = dma.hbm_to_vmem [thread:$0]  (!%p5921_p6), %s7180_s9, 16, %s442_s14, [#allocation18]  }
  0xab   : > { %s5781_s29 = smov [#allocation10]   ;;  %s5782_s16 = smov [#allocation13]  }
  0xac   : > { %s381_s18 = sshll.u32 %s5781_s29, 4  ;;  %s406_s12 = sshll.u32 %s5782_s16, 4  ;;  %s382_s18 = int_to_ptr.vmem [resolvable:$true] %s381_s18  ;;  %s407_s12 = int_to_ptr.vmem [resolvable:$true] %s406_s12 }
  0xad   : > { %s7181_s4 = sld [smem:[#allocation39_spill]] }
  0xb3   : > { %s5462_s15 = scalar_lea.hbm %s7181_s4, 2048 }
  0xb4   : > { %p5463_p1 = scmp.ne.s32.totalorder %s7181_s4, %s5462_s15  ;;  %p5469_p12 = scmp.lt.u32.totalorder %s5462_s15, %s7181_s4 }
  0xb6   : > { %p5465_p3 = pnand %p5463_p1, %p5937_p8 }
  0xb8   : > { %p5466_p11 = pneg %p5465_p3 }
  0xba   : > { %p5471_p13 = pnand %p5469_p12, %p5466_p11 }
  0xbc   : > { %5474 = shalt.err (!%p5471_p13)
}
  0xbd   : > { %s5475_s14 = scalar_lea.vmem %s382_s18, 2048  ;;  %p5483_p7 = scmp.lt.s32.totalorder %s382_s18, %s382_s18 }
  0xbe   : > { %p5476_p0 = scmp.ne.s32.totalorder %s382_s18, %s5475_s14  ;;  %p5484_p9 = scmp.lt.s32.totalorder %s5475_s14, %s5475_s14 }
  0xc0   : > { %p5478_p2 = pnand %p5476_p0, %p5937_p8  ;;  %p5485_p5 = por %p5484_p9, %p5483_p7 }
  0xc2   : > { %p5479_p4 = pneg %p5478_p2 }
  0xc4   : > { %p5486_p10 = pnand %p5485_p5, %p5479_p4 }
  0xc6   : > { %5489 = shalt.err (!%p5486_p10)
}
  0xc7   : > { %s7182_s28 = smov 64   ;;  %s7183_s6 = sld [smem:[#allocation41_spill]] }
  0xc8   : > { %4896 = dma.hbm_to_vmem [thread:$0]  (!%p5921_p6), %s7181_s4, 2048, %s382_s18, [#allocation9], %s7182_s28, %s7182_s28, %s7156_s19  }
  0xcd   : > { %s5490_s15 = scalar_lea.hbm %s7183_s6, 16 }
  0xce   : > { %p5491_p1 = scmp.ne.s32.totalorder %s7183_s6, %s5490_s15  ;;  %p5497_p12 = scmp.lt.u32.totalorder %s5490_s15, %s7183_s6 }
  0xd0   : > { %p5493_p3 = pnand %p5491_p1, %p5937_p8 }
  0xd2   : > { %p5494_p11 = pneg %p5493_p3 }
  0xd4   : > { %p5499_p13 = pnand %p5497_p12, %p5494_p11 }
  0xd6   : > { %5502 = shalt.err (!%p5499_p13)
}
  0xd7   : > { %s5503_s14 = scalar_lea.vmem %s407_s12, 16  ;;  %s5510_s18 = scalar_lea.vmem %s407_s12, 32 }
  0xd8   : > { %p5504_p0 = scmp.ne.s32.totalorder %s407_s12, %s5503_s14  ;;  %p5511_p7 = scmp.lt.s32.totalorder %s407_s12, %s407_s12 }
  0xd9   : > { %p5512_p9 = scmp.lt.s32.totalorder %s5510_s18, %s5503_s14 }
  0xda   : > { %p5506_p2 = pnand %p5504_p0, %p5937_p8 }
  0xdb   : > { %p5513_p5 = por %p5512_p9, %p5511_p7 }
  0xdc   : > { %p5507_p4 = pneg %p5506_p2 }
  0xde   : > { %p5514_p10 = pnand %p5513_p5, %p5507_p4 }
  0xe0   : > { %5517 = shalt.err (!%p5514_p10)
}
  0xe1   : > { %4902 = dma.hbm_to_vmem [thread:$0]  (!%p5921_p6), %s7183_s6, 16, %s407_s12, [#allocation12]  }
  0xe2   : > { %s5783_s30 = smov [#allocation16]   ;;  %s5784_s15 = smov [#allocation19]  }
  0xe3   : > { %s427_s1 = sshll.u32 %s5783_s30, 4  ;;  %s451_s0 = sshll.u32 %s5784_s15, 4  ;;  %s428_s1 = int_to_ptr.vmem [resolvable:$true] %s427_s1  ;;  %s452_s0 = int_to_ptr.vmem [resolvable:$true] %s451_s0 }
  0xe4   : > { %s7184_s8 = sld [smem:[#allocation43_spill]] }
  0xea   : > { %s5518_s27 = scalar_lea.hbm %s7184_s8, 512 }
  0xeb   : > { %p5519_p1 = scmp.ne.s32.totalorder %s7184_s8, %s5518_s27  ;;  %p5525_p12 = scmp.lt.u32.totalorder %s5518_s27, %s7184_s8 }
  0xed   : > { %p5521_p3 = pnand %p5519_p1, %p5937_p8 }
  0xef   : > { %p5522_p11 = pneg %p5521_p3 }
  0xf1   : > { %p5527_p13 = pnand %p5525_p12, %p5522_p11 }
  0xf3   : > { %5530 = shalt.err (!%p5527_p13)
}
  0xf4   : > { %s5531_s12 = scalar_lea.vmem %s428_s1, 512  ;;  %p5539_p7 = scmp.lt.s32.totalorder %s428_s1, %s428_s1 }
  0xf5   : > { %p5532_p0 = scmp.ne.s32.totalorder %s428_s1, %s5531_s12  ;;  %p5540_p9 = scmp.lt.s32.totalorder %s5531_s12, %s5531_s12 }
  0xf7   : > { %p5534_p2 = pnand %p5532_p0, %p5937_p8  ;;  %p5541_p5 = por %p5540_p9, %p5539_p7 }
  0xf9   : > { %p5535_p4 = pneg %p5534_p2 }
  0xfb   : > { %p5542_p10 = pnand %p5541_p5, %p5535_p4 }
  0xfd   : > { %5545 = shalt.err (!%p5542_p10)
}
  0xfe   : > { %s7185_s16 = smov 4   ;;  %s5546_s20 = scalar_lea.hbm %s7142_s10, 512 }
  0xff   : > { %4908 = dma.hbm_to_vmem [thread:$0]  (!%p5921_p6), %s7184_s8, 512, %s428_s1, [#allocation15], %s7182_s28, %s7182_s28, %s7185_s16  }
 0x100   : > { %p5547_p1 = scmp.ne.s32.totalorder %s7142_s10, %s5546_s20  ;;  %p5553_p12 = scmp.lt.u32.totalorder %s5546_s20, %s7142_s10 }
 0x102   : > { %p5549_p3 = pnand %p5547_p1, %p5937_p8 }
 0x104   : > { %p5550_p11 = pneg %p5549_p3 }
 0x106   : > { %p5555_p13 = pnand %p5553_p12, %p5550_p11 }
 0x108   : > { %5558 = shalt.err (!%p5555_p13)
}
 0x109   : > { %s5559_s12 = scalar_lea.vmem %s452_s0, 512  ;;  %p5567_p7 = scmp.lt.s32.totalorder %s452_s0, %s452_s0 }
 0x10a   : > { %p5560_p0 = scmp.ne.s32.totalorder %s452_s0, %s5559_s12  ;;  %p5568_p9 = scmp.lt.s32.totalorder %s5559_s12, %s5559_s12 }
 0x10c   : > { %p5562_p2 = pnand %p5560_p0, %p5937_p8  ;;  %p5569_p5 = por %p5568_p9, %p5567_p7 }
 0x10e   : > { %p5563_p4 = pneg %p5562_p2 }
 0x110   : > { %p5570_p10 = pnand %p5569_p5, %p5563_p4 }
 0x112   : > { %5573 = shalt.err (!%p5570_p10)
}
 0x113   : > { %4914 = dma.hbm_to_vmem [thread:$0]  (!%p5921_p6), %s7142_s10, 512, %s452_s0, [#allocation18], %s7182_s28, %s7182_s28, %s7185_s16  }
 0x114   : > { %s5785_s30 = smov [#allocation20]   ;;  %s5574_s27 = scalar_lea.hbm %s7143_s11, 16 }
 0x115   : > { %s465_s15 = sshll.u32 %s5785_s30, 4  ;;  %p5575_p1 = scmp.ne.s32.totalorder %s7143_s11, %s5574_s27  ;;  %s466_s15 = int_to_ptr.vmem [resolvable:$true] %s465_s15 }
 0x116   : > { %p5581_p12 = scmp.lt.u32.totalorder %s5574_s27, %s7143_s11 }
 0x117   : > { %p5577_p3 = pnand %p5575_p1, %p5937_p8 }
 0x119   : > { %p5578_p11 = pneg %p5577_p3 }
 0x11b   : > { %p5583_p13 = pnand %p5581_p12, %p5578_p11 }
 0x11d   : > { %5586 = shalt.err (!%p5583_p13)
}
 0x11e   : > { %s5587_s0 = scalar_lea.vmem %s466_s15, 16  ;;  %s5594_s1 = scalar_lea.vmem %s466_s15, 32 }
 0x11f   : > { %p5588_p0 = scmp.ne.s32.totalorder %s466_s15, %s5587_s0  ;;  %p5595_p7 = scmp.lt.s32.totalorder %s466_s15, %s466_s15 }
 0x120   : > { %p5596_p9 = scmp.lt.s32.totalorder %s5594_s1, %s5587_s0 }
 0x121   : > { %p5590_p2 = pnand %p5588_p0, %p5937_p8 }
 0x122   : > { %p5597_p5 = por %p5596_p9, %p5595_p7 }
 0x123   : > { %p5591_p4 = pneg %p5590_p2 }
 0x125   : > { %p5598_p10 = pnand %p5597_p5, %p5591_p4 }
 0x127   : > { %5601 = shalt.err (!%p5598_p10)
}
 0x128   : > { %s7186_s24 = sld [smem:[#allocation33_spill]]  ;;  %s4168_s17 = sadd.s32 4294967294, %s5772_s26  }
 0x129   : > { %4917 = dma.hbm_to_vmem [thread:$0]  (!%p5921_p6), %s7143_s11, 16, %s466_s15, [#allocation21]  }
 0x12a   : > { %s48_s20 = sadd.s32 1, %s5768_s25  ;;  %s57_s13 = sadd.s32 1, %s5760_s23 }
 0x12b   : > { %p50_p8 = scmp.ge.s32.totalorder %s48_s20, 2  ;;  %p64_p1 = scmp.ne.s32.totalorder %s5760_s23, %s5756_s22 }
 0x12c   : > { %p65_p3 = scmp.eq.s32.totalorder %s5772_s26, 0  ;;  %p70_p12 = scmp.ne.s32.totalorder %s5756_s22, %s5752_s21 }
 0x12d   : > { %s7222_s20 = smov (%p50_p8, %s48_s20), 0  ;;  %p338_p7 = scmp.eq.s32.totalorder %s4168_s17, 1 }
 0x12e   : > { %p6147_p11 = por %p65_p3, %p64_p1  ;;  %s52_s15 = ssub.s32 %s5768_s25, %s7222_s20 }
 0x12f   : > { %p332_p6 = scmp.eq.s32.totalorder %s7186_s24, 1  ;;  %p55_p13 = scmp.eq.s32.totalorder %s52_s15, 0 }
 0x130   : > { %p7188_p0 = scmp.eq.s32.totalorder %s7186_s24, 0  ;;  %p6169_p9 = por %p338_p7, %p70_p12 }
 0x131   : > { %p6162_p4 = por %p332_p6, %p64_p1  ;;  %p4939_p5 = scmp.lt.s32.totalorder %s5772_s26, 2 }
 0x132   : > { %p6158_p2 = por %p7188_p0, %p70_p12  ;;  %s6175_s0 = sand.u32 1, %s5760_s23  }
 0x133   : > { %s7190_s18 = scalar_select %p6162_p4, 1, 0 }
 0x134   : > { %s6167_s29 = scalar_select %p55_p13, %s5760_s23, %s57_s13  }
 0x135   : > { %s7191_s12 = scalar_select %p6169_p9, 1, 0 }
 0x136   : > { %s4343_s1 = sshll.u32 %s5768_s25, 9  ;;  %s4181_s19 = sshll.u32 %s6175_s0, 5 }
 0x137   : > { %s7192_s15 = sld [smem:[#allocation35_spill]]  ;;  %s480_s17 = scalar_lea.vmem [#allocation2], %s4181_s19 }
 0x138   : > { %s489_s13 = sshll.u32 %s480_s17, 4  ;;  %p6186_p10 = pnand %p4939_p5, %p6147_p11  ;;  %s6190_s13 = int_to_ptr.vmem [resolvable:$true] %s489_s13 }
 0x139   : > { %s477_s5 = scalar_lea.sflag [#allocation3], %s6175_s0 }
 0x13a   : > { %p5604_p1 = pneg %p6186_p10 }
 0x13d   : > { %s6182_s2 = scalar_lea.hbm %s7192_s15, %s4343_s1  ;;  %s5607_s19 = scalar_lea.hbm %s7192_s15, 1024 }
 0x13e   : > { %s5602_s30 = scalar_lea.hbm %s6182_s2, 512  ;;  %p5608_p11 = scmp.lt.u32.totalorder %s6182_s2, %s7192_s15 }
 0x13f   : > { %p5603_p8 = scmp.ne.s32.totalorder %s6182_s2, %s5602_s30  ;;  %p5609_p6 = scmp.lt.u32.totalorder %s5607_s19, %s5602_s30 }
 0x140   : > { %p5611_p0 = scmp.lt.u32.totalorder %s5602_s30, %s6182_s2 }
 0x141   : > { %p5605_p3 = pnand %p5604_p1, %p5603_p8  ;;  %p5610_p13 = por %p5609_p6, %p5608_p11 }
 0x143   : > { %p5606_p12 = pneg %p5605_p3  ;;  %p5612_p7 = por %p5611_p0, %p5610_p13 }
 0x145   : > { %p5613_p5 = pnand %p5612_p7, %p5606_p12 }
 0x147   : > { %5616 = shalt.err (!%p5613_p5)
}
 0x148   : > { %s5617_s4 = scalar_lea.vmem %s6190_s13, 512  ;;  %s5786_s1 = smov [#allocation2]  }
 0x149   : > { %p5618_p8 = scmp.ne.s32.totalorder %s6190_s13, %s5617_s4  ;;  %s5622_s27 = sshll.u32 %s5786_s1, 4  ;;  %s5623_s27 = int_to_ptr.vmem [resolvable:$false] %s5622_s27 }
 0x14a   : > { %s5624_s24 = scalar_lea.vmem %s5623_s27, 1024  ;;  %p5625_p4 = scmp.lt.s32.totalorder %s6190_s13, %s5623_s27 }
 0x14b   : > { %p5620_p3 = pnand %p5618_p8, %p5604_p1  ;;  %p5626_p11 = scmp.lt.s32.totalorder %s5624_s24, %s5617_s4 }
 0x14d   : > { %p5621_p9 = pneg %p5620_p3  ;;  %p5627_p6 = por %p5626_p11, %p5625_p4 }
 0x14f   : > { %p5628_p13 = pnand %p5627_p6, %p5621_p9 }
 0x151   : > { %5631 = shalt.err (!%p5628_p13)
}
 0x152   : > { %4921 = dma.hbm_to_vmem [thread:$0]  (!%p6186_p10), %s6182_s2, 512, %s6190_s13, %s477_s5, %s7182_s28, %s7182_s28, %s7185_s16  }
 0x153   : > { %s4184_s30 = sshll.u32 %s6175_s0, 4  ;;  %s4344_s19 = sshll.u32 %s5768_s25, 8 }
 0x154   : > { %s7194_s1 = sld [smem:[#allocation36_spill]]  ;;  %s503_s24 = scalar_lea.vmem [#allocation5], %s4184_s30 }
 0x155   : > { %s510_s6 = sshll.u32 %s503_s24, 4  ;;  %s7195_s7 = sand.u32 1, %s5772_s26   ;;  %s6231_s6 = int_to_ptr.vmem [resolvable:$true] %s510_s6 }
 0x156   : > { %s6235_s8 = scalar_lea.sflag [#allocation6], %s7195_s7 }
 0x15a   : > { %s6229_s27 = scalar_lea.hbm %s7194_s1, %s4344_s19  ;;  %s5637_s28 = scalar_lea.hbm %s7194_s1, 512 }
 0x15b   : > { %s5632_s9 = scalar_lea.hbm %s6229_s27, 256  ;;  %p5638_p0 = scmp.lt.u32.totalorder %s6229_s27, %s7194_s1 }
 0x15c   : > { %p5633_p4 = scmp.ne.s32.totalorder %s6229_s27, %s5632_s9  ;;  %p5639_p7 = scmp.lt.u32.totalorder %s5637_s28, %s5632_s9 }
 0x15d   : > { %p5641_p8 = scmp.lt.u32.totalorder %s5632_s9, %s6229_s27 }
 0x15e   : > { %p5635_p9 = pnand %p5633_p4, %p5604_p1  ;;  %p5640_p5 = por %p5639_p7, %p5638_p0 }
 0x160   : > { %p5636_p12 = pneg %p5635_p9  ;;  %p5642_p3 = por %p5641_p8, %p5640_p5 }
 0x162   : > { %p5643_p11 = pnand %p5642_p3, %p5636_p12 }
 0x164   : > { %5646 = shalt.err (!%p5643_p11)
}
 0x165   : > { %s5647_s7 = scalar_lea.vmem %s6231_s6, 256  ;;  %s5787_s13 = smov [#allocation5]  }
 0x166   : > { %p5648_p6 = scmp.ne.s32.totalorder %s6231_s6, %s5647_s7  ;;  %s5652_s30 = sshll.u32 %s5787_s13, 4  ;;  %s5653_s30 = int_to_ptr.vmem [resolvable:$false] %s5652_s30 }
 0x167   : > { %s5654_s19 = scalar_lea.vmem %s5653_s30, 512  ;;  %p5655_p9 = scmp.lt.s32.totalorder %s6231_s6, %s5653_s30 }
 0x168   : > { %p5650_p13 = pnand %p5648_p6, %p5604_p1  ;;  %p5656_p0 = scmp.lt.s32.totalorder %s5654_s19, %s5647_s7 }
 0x16a   : > { %p5651_p4 = pneg %p5650_p13  ;;  %p5657_p7 = por %p5656_p0, %p5655_p9 }
 0x16c   : > { %p5658_p5 = pnand %p5657_p7, %p5651_p4 }
 0x16e   : > { %5661 = shalt.err (!%p5658_p5)
}
 0x16f   : > { %s5788_s9 = smov 128   ;;  %s5789_s4 = smov 8  }
 0x170   : > { %4924 = dma.hbm_to_vmem [thread:$0]  (!%p6186_p10), %s6229_s27, 256, %s6231_s6, %s6235_s8, %s5788_s9, %s5788_s9, %s5789_s4  }
 0x171   : > { %s7196_s17 = sld [smem:[#allocation34_spill]] }
 0x177   : > { %p7197_p1 = scmp.ne.s32.totalorder %s7196_s17, 0 }
 0x178   : > { %s6264_s24 = sand.u32 (!%p7197_p1), 1, %s5756_s22  }
 0x179   : > { %522 = sbr.rel (%p7197_p1) target bundleno = 4716 (0x126c), region = 68  ;;  %s4188_s2 = sshll.u32 (!%p7197_p1), %s6264_s24, 5 }
 0x17a   : > { %s525_s5 = scalar_lea.sflag (!%p7197_p1), [#allocation3], %s6264_s24  ;;  %s6268_s28 = scalar_lea.vmem (!%p7197_p1), [#allocation2], %s4188_s2 }
 0x180   : > { %5715 = dma.done.wait (%p6158_p2), %s525_s5, 512  }
 0x181   : > { %5717 = vsyncadd (%p6158_p2), %s525_s5, 4294966784  ;;  %s7198_s3 = sld [smem:[#allocation33_spill]]  ;;  %s4189_s8 = sshll.u32 %s6264_s24, 4 }
 0x182   : > { %s6276_s16 = scalar_lea.vmem [#allocation5], %s4189_s8 }
 0x187   : > { %s533_s6 = sand.u32 1, %s7198_s3  }
 0x188   : > { %s534_s27 = scalar_lea.sflag [#allocation6], %s533_s6 }
 0x189   : > { %5719 = dma.done.wait (%p6158_p2), %s534_s27, 256  }
 0x18a   : > { %5721 = vsyncadd (%p6158_p2), %s534_s27, 4294967040  ;;  %p7199_p10 = scmp.eq.s32.totalorder %s7198_s3, 0 }
 0x18c   : > { %5723 = dma.done.wait (%p7199_p10), [#allocation6], 512   ;;  %p7200_p12 = pmov %p7199_p10 }
 0x18d   : > { %p7201_p8 = pmov %p7199_p10 }
 0x18e   : > { %5725 = vsyncadd (%p7200_p12), [#allocation6], 4294966784 }
 0x18f   : > { %5727 = dma.done.wait (%p7201_p8), [#allocation9], 2064   ;;  %p7202_p3 = pmov %p7201_p8 }
 0x191   : > { %5729 = vsyncadd (%p7202_p3), [#allocation9], 4294965232  ;;  %p7203_p11 = pmov %p7202_p3 }
 0x192   : > { %p7204_p6 = pmov %p7202_p3 }
 0x193   : > { %5731 = dma.done.wait (%p7203_p11), [#allocation12], 32  }
 0x194   : > { %5733 = vsyncadd (%p7204_p6), [#allocation12], 4294967264  ;;  %p7205_p2 = pmov %p7202_p3 }
 0x196   : > { %5735 = dma.done.wait (%p7205_p2), [#allocation15], 528   ;;  %p7206_p13 = pmov %p7205_p2 }
 0x197   : > { %p7207_p4 = pmov %p7205_p2 }
 0x198   : > { %5737 = vsyncadd (%p7206_p13), [#allocation15], 4294966768 }
 0x199   : > { %5739 = dma.done.wait (%p7207_p4), [#allocation18], 528   ;;  %p7208_p9 = pmov %p7205_p2 }
 0x19a   : > { %p7209_p0 = pmov %p7205_p2 }
 0x19b   : > { %5741 = vsyncadd (%p7208_p9), [#allocation18], 4294966768 }
 0x19c   : > { %5743 = dma.done.wait (%p7209_p0), [#allocation21], 16   ;;  %p7210_p7 = pmov %p7209_p0 }
 0x19d   : > { %v5031_v0 = vld [vmem:[#allocation7] sm:$0xff]   ;;  %v5032_v1 = vld [vmem:[#allocation7 + $0x8] sm:$0xff]   ;;  %v5033_v2 = vld [vmem:[#allocation7 + $0x10] sm:$0xff]   ;;  %vm693_vm0 = vcmask 523264   ;;  %s5790_s14 = smov 120   ;;  %vm5792_vm1 = vmmov 0  }
 0x19e   : > { %5745 = vsyncadd (%p7210_p7), [#allocation21], 4294967280  ;;  %4501 = vmatprep.subr.bf16.mxu1 %v5031_v0  ;;  %v5035_v3 = vld [vmem:[%s6268_s28] sm:$0xff]   ;;  %v5034_v4 = vld [vmem:[#allocation7 + $0x18] sm:$0xff]   ;;  %vm1101_vm2 = vcmask 64512   ;;  %vm1182_vm3 = vcmask 130048  }
 0x19f   : > { %4502 = vmatpush3.bf16.msra.mxu1 %v5031_v0  ;;  %4509 = vmatprep.mubr.msk.bf16.mxu1 %vm693_vm0, %v5035_v3  ;;  %v5037_v5 = vld [vmem:[#allocation10 + $0x40] sm:$0xff]   ;;  %v5039_v8 = vld [vmem:[#allocation10 + $0x48] sm:$0xff]   ;;  %v5041_v11 = vld [vmem:[#allocation10 + $0x50] sm:$0xff]   ;;  %s5793_s0 = smov 64   ;;  %s5794_s7 = smov 112   ;;  %vm1644_vm4 = vcmask 1043456  }
 0x1a0   : > { %4503 = vmatprep.subr.bf16.mxu1 %v5032_v1  ;;  %v5036_v6 = vld [vmem:[%s6268_s28 + $0x8] sm:$0xff]   ;;  %v5047_v9 = vld [vmem:[%s6268_s28 + $0x10] sm:$0xff]   ;;  %v5049_v12 = vld [vmem:[%s6268_s28 + $0x18] sm:$0xff]   ;;  %s5795_s13 = smov 56   ;;  %s5796_s30 = smov 104  }
 0x1a1   : > { %v5038_v7 = vld [vmem:[#allocation10] sm:$0xff]   ;;  %v5040_v10 = vld [vmem:[#allocation10 + $0x8] sm:$0xff]   ;;  %v5042_v13 = vld [vmem:[#allocation10 + $0x10] sm:$0xff]   ;;  %s5797_s19 = smov 48   ;;  %s5798_s9 = smov 96  }
 0x1a2   : > { %v5043_v14 = vld [vmem:[#allocation10 + $0x58] sm:$0xff]   ;;  %v5045_v17 = vld [vmem:[#allocation10 + $0x60] sm:$0xff]   ;;  %v5048_v19 = vld [vmem:[#allocation10 + $0x68] sm:$0xff]   ;;  %s5799_s4 = smov 32   ;;  %s5800_s17 = smov 88  }
 0x1a3   : > { %4504 = vmatpush3.bf16.msra.mxu1 %v5032_v1  ;;  %v5044_v15 = vld [vmem:[#allocation10 + $0x18] sm:$0xff]   ;;  %v5046_v18 = vld [vmem:[#allocation10 + $0x20] sm:$0xff]   ;;  %v5050_v20 = vld [vmem:[#allocation10 + $0x28] sm:$0xff]   ;;  %s5801_s2 = smov 80   ;;  %s5802_s5 = smov 40  }
 0x1a4   : > { %4505 = vmatprep.subr.bf16.mxu1 %v5033_v2  ;;  %v5057_v16 = vld [vmem:[%s6276_s16 + $0x4] ss:$8 sps:$4 sm:$0xff]   ;;  %v5055_v25 = vld [vmem:[%s6276_s16] ss:$8 sps:$4 sm:$0xff]   ;;  %s5803_s28 = smov 16   ;;  %s5804_s3 = smov 72  }
 0x1a5   : > { %v5051_v21 = vld [vmem:[#allocation10 + $0x70] sm:$0xff]   ;;  %v5053_v23 = vld [vmem:[#allocation10 + $0x78] sm:$0xff]   ;;  %v4214_v57 = vld [vmem:[#allocation11] ss:$0 sm:$0xff]  ;;  %s5805_s6 = smov 24   ;;  %s5806_s8 = smov 8  }
 0x1a6   : > { %v5052_v22 = vld [vmem:[#allocation10 + $0x30] sm:$0xff]   ;;  %v5054_v24 = vld [vmem:[#allocation10 + $0x38] sm:$0xff]   ;;  %s4200_s27 = sshll.u32 %s6264_s24, 6  ;;  %s7211_s16 = sld [smem:[#allocation32_spill]] }
 0x1a7   : > { %4506 = vmatpush3.bf16.msra.mxu1 %v5033_v2  ;;  %v4201_v26 = vld [vmem:[#allocation8] ss:$0 sm:$0xff]  ;;  %p7213_p1 = scmp.ne.s32.totalorder %s7190_s18, 0 }
 0x1a8   : > { %4507 = vmatprep.subr.bf16.mxu1 %v5034_v4 }
 0x1ab   : > { %4508 = vmatpush3.bf16.msra.mxu1 %v5034_v4 }
 0x1ac   : > { %4354 = vmatprep.subr.bf16.mxu1 %v5037_v5 }
 0x1ae   : > { %4510 = vmatmul.mubr.msk.bf16.vlgmr.msra.gmra.mrb[0].mxu1 %vm693_vm0, %v5036_v6 }
 0x1af   : > { %4355 = vmatpush3.bf16.msra.mxu1 %v5038_v7  ;;  %4513 = vmatprep.mubr.msk.bf16.mxu1 %vm693_vm0, %v5047_v9 }
 0x1b0   : > { %4356 = vmatprep.subr.bf16.mxu1 %v5039_v8 }
 0x1b3   : > { %4357 = vmatpush3.bf16.msra.mxu1 %v5040_v10 }
 0x1b4   : > { %4358 = vmatprep.subr.bf16.mxu1 %v5041_v11 }
 0x1b6   : > { %4514 = vmatmul.mubr.msk.bf16.gmra.mrb[4].mxu1 %vm693_vm0, %v5049_v12  ;;  %v5791_v12 = vmov 0.0  }
 0x1b7   : > { %4359 = vmatpush3.bf16.msra.mxu1 %v5042_v13  ;;  %962 = vmatprep.mubr.bf16.mxu1 %v5057_v16  ;;  %v5058_v13 = vld [vmem:[#allocation16] sm:$0xff]   ;;  %v5061_v16 = vld [vmem:[#allocation16 + $0x18] sm:$0xff]  }
 0x1b8   : > { %4360 = vmatprep.subr.bf16.mxu1 %v5043_v14  ;;  %4517 = vmatprep.subr.bf16.mxu0 %v5791_v12  ;;  %v5059_v14 = vld [vmem:[#allocation16 + $0x8] sm:$0xff]  }
 0x1b9   : > { %4518 = vmatpush3.bf16.msra.mxu0 %v5058_v13  ;;  %4525 = vmatprep.mubr.msk.bf16.mxu0 %vm5792_vm1, %v5791_v12 }
 0x1ba   : > { %4519 = vmatprep.subr.bf16.mxu0 %v5791_v12 }
 0x1bb   : > { %4361 = vmatpush3.bf16.msra.mxu1 %v5044_v15  ;;  %v5060_v15 = vld [vmem:[#allocation16 + $0x10] sm:$0xff]  }
 0x1bc   : > { %4362 = vmatprep.subr.bf16.mxu1 %v5045_v17 }
 0x1bd   : > { %4520 = vmatpush3.bf16.msra.mxu0 %v5059_v14 }
 0x1be   : > { %4521 = vmatprep.subr.bf16.mxu0 %v5791_v12 }
 0x1bf   : > { %4363 = vmatpush3.bf16.msra.mxu1 %v5046_v18 }
 0x1c0   : > { %4364 = vmatprep.subr.bf16.mxu1 %v5048_v19 }
 0x1c1   : > { %4522 = vmatpush3.bf16.msra.mxu0 %v5060_v15 }
 0x1c2   : > { %4523 = vmatprep.subr.bf16.mxu0 %v5791_v12 }
 0x1c3   : > { %4365 = vmatpush3.bf16.msra.mxu1 %v5050_v20 }
 0x1c4   : > { %4366 = vmatprep.subr.bf16.mxu1 %v5051_v21 }
 0x1c5   : > { %4524 = vmatpush3.bf16.msra.mxu0 %v5061_v16 }
 0x1c7   : > { %4367 = vmatpush3.bf16.msra.mxu1 %v5052_v22 }
 0x1c8   : > { %4368 = vmatprep.subr.bf16.mxu1 %v5053_v23 }
 0x1cb   : > { %4369 = vmatpush3.bf16.msra.mxu1 %v5054_v24 }
 0x1ce   : > { %963 = vmatmul.mubr.bf16.vlgmr.msra.gmra.mrb[8].mxu1 %v5055_v25  ;;  %v4233_v25 = vld [vmem:[#allocation13] ss:$0 sm:$0xff] }
 0x281   : > { %v4511_v27 = vpop.f32.mrb[0].mxu1 }
 0x282   : > { %v749_v28 = vadd.f32 %v4511_v27, %v4201_v26  ;;  %v740_v29 = vpop.f32.mrb[1].mxu1 }
 0x283   : > { %v741_v30 = vadd.f32 %v4201_v26, %v740_v29  ;;  %v4512_v31 = vpop.f32.mrb[2].mxu1  ;;  %v4234_v29 = vld [vmem:[#allocation14] ss:$0 sm:$0xff] }
 0x284   : > { %v773_v32 = vmul.f32 0.35355338, %v749_v28  ;;  %v752_v33 = vadd.f32 %v4512_v31, %v4201_v26  ;;  %v743_v34 = vpop.f32.mrb[3].mxu1 }
 0x285   : > { %v744_v35 = vadd.f32 %v4201_v26, %v743_v34  ;;  %v771_v37 = vmul.f32 0.35355338, %v741_v30  ;;  %v4235_v34 = vld [vmem:[#allocation17] ss:$0 sm:$0xff] }
 0x286   : > { %v774_v36 = vmul.f32 0.35355338, %v752_v33 }
 0x287   : > { %v772_v38 = vmul.f32 0.35355338, %v744_v35 }
 0x288   : > { %v6316_v39 = vpack.c.bf16 %v774_v36, %v773_v32 }
 0x289   : > { %v6318_v40 = vpack.c.bf16 %v772_v38, %v771_v37  ;;  %v4515_v41 = vpop.f32.mrb[4].mxu1 }
 0x28a   : > { %v765_v42 = vadd.f32 %v4515_v41, %v4201_v26  ;;  %v756_v43 = vpop.f32.mrb[5].mxu1 }
 0x28b   : > { %v757_v44 = vadd.f32 %v4201_v26, %v756_v43  ;;  %v4516_v45 = vpop.f32.mrb[6].mxu1 }
 0x28c   : > { %v777_v46 = vmul.f32 0.35355338, %v765_v42  ;;  %v768_v47 = vadd.f32 %v4516_v45, %v4201_v26  ;;  %v759_v48 = vpop.f32.mrb[7].mxu1 }
 0x28d   : > { %v775_v49 = vmul.f32 0.35355338, %v757_v44  ;;  %v760_v50 = vadd.f32 %v4201_v26, %v759_v48 }
 0x28e   : > { %v778_v51 = vmul.f32 0.35355338, %v768_v47 }
 0x28f   : > { %v776_v52 = vmul.f32 0.35355338, %v760_v50 }
 0x290   : > { %v6320_v53 = vpack.c.bf16 %v778_v51, %v777_v46 }
 0x291   : > { %v6322_v54 = vpack.c.bf16 %v776_v52, %v775_v49 }
 0x2a1   : > { %v4370_v55 = vpop.f32.mrb[8].mxu1 }
 0x2a2   : > { %v4371_v56 = vpop.f32.mrb[9].mxu1 }
 0x2a3   : > { %v4372_v58 = vadd.f32 %v4371_v56, %v4370_v55  ;;  %v4373_v59 = vpop.f32.mrb[10].mxu1 }
 0x2a4   : > { %v4374_v60 = vpop.f32.mrb[11].mxu1 }
 0x2a5   : > { %v4375_v61 = vadd.f32 %v4374_v60, %v4373_v59  ;;  %v965_v62 = vadd.f32 %v4372_v58, %v4214_v57 }
 0x2a7   : > { %v971_v63 = vsel %vm693_vm0, %v965_v62, 0.0  ;;  %v968_v0 = vadd.f32 %v4375_v61, %v4214_v57 }
 0x2a8   : > { %972 = vadd.xlane.f32.xlu0 %v971_v63 }
 0x2a9   : > { %v974_v1 = vsel %vm693_vm0, %v968_v0, 0.0 }
 0x2ac   : > { %975 = vadd.xlane.f32.xlu0 %v974_v1 }
 0x335   : > { %v973_v2 = vpop.xlane.xlu0 %972 }
 0x336   : > { %v978_v3 = vmul.f32 0.015625, %v973_v2 }
 0x338   : > { %v980_v4 = vsub.f32 %v965_v62, %v978_v3 }
 0x339   : > { %v976_v5 = vpop.xlane.xlu0 %975 }
 0x33a   : > { %v979_v6 = vmul.f32 0.015625, %v976_v5  ;;  %v982_v7 = vmul.f32 %v980_v4, %v980_v4 }
 0x33c   : > { %v981_v8 = vsub.f32 %v968_v0, %v979_v6  ;;  %v984_v9 = vsel %vm693_vm0, %v982_v7, 0.0 }
 0x33d   : > { %985 = vadd.xlane.f32.xlu1 %v984_v9 }
 0x33e   : > { %v983_v10 = vmul.f32 %v981_v8, %v981_v8 }
 0x340   : > { %v987_v11 = vsel %vm693_vm0, %v983_v10, 0.0 }
 0x341   : > { %988 = vadd.xlane.f32.xlu1 %v987_v11 }
 0x352   : > { %1365 = vrot.lane.b32.xlu1 %v6318_v40, %s5790_s14 }
 0x356   : > { %1367 = vrot.lane.b32.xlu1 %v6316_v39, %s5790_s14 }
 0x35a   : > { %1369 = vrot.lane.b32.xlu1 %v6322_v54, %s5790_s14 }
 0x3ca   : > { %v986_v17 = vpop.xlane.xlu1 %985 }
 0x3cb   : > { %v990_v18 = vmul.f32 0.015625, %v986_v17 }
 0x3cd   : > { %v992_v19 = vadd.f32 1e-05, %v990_v18 }
 0x3ce   : > { %v989_v20 = vpop.xlane.xlu1 %988 }
 0x3cf   : > { %5062 = vrsqrt.f32 %v992_v19  ;;  %v991_v21 = vmul.f32 0.015625, %v989_v20 }
 0x3d1   : > { %v993_v22 = vadd.f32 1e-05, %v991_v21 }
 0x3d2   : > { %v1366_v45 = vpop.permute.xlu1 %1365 }
 0x3d3   : > { %5064 = vrsqrt.f32 %v993_v22 }
 0x3d6   : > { %v1368_v48 = vpop.permute.xlu1 %1367 }
 0x3d9   : > { %v5063_v23 = vpop.eup %5062 }
 0x3da   : > { %v996_v24 = vmul.f32 %v5063_v23, %v980_v4  ;;  %v1370_v49 = vpop.permute.xlu1 %1369 }
 0x3dc   : > { %v1005_v28 = vmul.f32 %v4233_v25, %v996_v24 }
 0x3dd   : > { %v5065_v26 = vpop.eup %5064 }
 0x3de   : > { %v997_v27 = vmul.f32 %v5065_v26, %v981_v8  ;;  %v1014_v31 = vadd.f32 %v4234_v29, %v1005_v28 }
 0x3e0   : > { %v1006_v30 = vmul.f32 %v4233_v25, %v997_v27 }
 0x3e2   : > { %v1015_v32 = vadd.f32 %v4234_v29, %v1006_v30 }
 0x3e4   : > { %v1016_v33 = vpack.c.bf16 %v1015_v32, %v1014_v31 }
 0x3e6   : > { %4526 = vmatmul.mubr.msk.bf16.vlgmr.msra.gmra.mrb[0].mxu0 %vm693_vm0, %v1016_v33 }
 0x3e7   : > { %4531 = vmatprep.mubr.msk.bf16.mxu0 %vm1101_vm2, %v6318_v40 }
 0x4b9   : > { %v1093_v35 = vpop.f32.mrb[0].mxu0 }
 0x4ba   : > { %v4527_v36 = vpop.f32.mrb[1].mxu0  ;;  %v1094_v38 = vadd.f32 %v4235_v34, %v1093_v35 }
 0x4bb   : > { %v1096_v37 = vpop.f32.mrb[2].mxu0 }
 0x4bc   : > { %v1097_v41 = vadd.f32 %v4235_v34, %v1096_v37  ;;  %v4528_v42 = vpop.f32.mrb[3].mxu0 }
 0x4be   : > { %v6337_v43 = vpack.c.bf16 %v1097_v41, %v1094_v38 }
 0x4c0   : > { %1373 = vrot.lane.b32.xlu0 %v6337_v43, %s5790_s14  ;;  %4825 = vmatprep.subr.msk.bf16.mxu0 %vm1101_vm2, %v6337_v43  ;;  %v1115_v44 = vsel %vm1101_vm2, %v6337_v43, 0 }
 0x4c1   : > { %4530 = vmatpush3.bf16.xpose.msra.mxu0 %v1115_v44 }
 0x4c4   : > { %1371 = vrot.lane.b32.xlu0 %v6320_v53, %s5790_s14  ;;  %s622_s14 = scalar_lea.vmem [#allocation22], %s4200_s27 }
 0x4c8   : > { %4532 = vmatmul.mubr.msk.bf16.vlgmr.msra.gmra.mrb[4].mxu0 %vm1101_vm2, %v6316_v39 }
 0x4c9   : > { %4535 = vmatprep.mubr.msk.bf16.mxu0 %vm1101_vm2, %v6322_v54 }
 0x4d0   : > { %4536 = vmatmul.mubr.msk.bf16.gmra.mrb[8].mxu0 %vm1101_vm2, %v6320_v53 }
 0x4d1   : > { %4551 = vmatprep.mubr.msk.bf16.mxu0 %vm1101_vm2, %v1366_v45 }
 0x532   : > { %v1374_v46 = vpop.permute.xlu0 %1373 }
 0x533   : > { %4826 = vmatprep.subr.msk.bf16.mxu0 %vm1101_vm2, %v1374_v46  ;;  %v1388_v47 = vsel %vm1101_vm2, %v1374_v46, 0 }
 0x534   : > { %4550 = vmatpush3.bf16.xpose.msra.mxu0 %v1388_v47 }
 0x536   : > { %v1372_v50 = vpop.permute.xlu0 %1371 }
 0x53b   : > { %4552 = vmatmul.mubr.msk.bf16.vlgmr.msra.gmra.mrb[12].mxu0 %vm1101_vm2, %v1368_v48 }
 0x53c   : > { %4555 = vmatprep.mubr.msk.bf16.mxu0 %vm1101_vm2, %v1370_v49 }
 0x543   : > { %4556 = vmatmul.mubr.msk.bf16.gmra.mrb[16].mxu0 %vm1101_vm2, %v1372_v50 }
 0x59b   : > { %v6359_v51 = vpop.f32.mrb[4].mxu0 }
 0x59c   : > { %v6361_v52 = vpop.f32.mrb[5].mxu0  ;;  %v1189_v55 = vsel %vm1182_vm3, %v6359_v51, -inf }
 0x59d   : > { %1190 = vmax.xlane.f32.xlu0 %v1189_v55  ;;  %v4534_v56 = vpop.f32.mrb[6].mxu0  ;;  %v1183_v57 = vsel %vm1182_vm3, %v6361_v52, -inf }
 0x59e   : > { %1184 = vmax.xlane.f32.xlu1 %v1183_v57  ;;  %v1154_v58 = vpop.f32.mrb[7].mxu0  ;;  %v1192_v62 = vsel %vm1182_vm3, %v4534_v56, -inf }
 0x59f   : > { %v1186_v59 = vsel %vm1182_vm3, %v1154_v58, -inf }
 0x5a1   : > { %1187 = vmax.xlane.f32.xlu0 %v1186_v59 }
 0x5a3   : > { %v6368_v60 = vpop.f32.mrb[8].mxu0 }
 0x5a4   : > { %v6370_v61 = vpop.f32.mrb[9].mxu0  ;;  %v1201_v3 = vsel %vm1182_vm3, %v6368_v60, -inf }
 0x5a5   : > { %1193 = vmax.xlane.f32.xlu0 %v1192_v62  ;;  %v4538_v63 = vpop.f32.mrb[10].mxu0  ;;  %v1195_v0 = vsel %vm1182_vm3, %v6370_v61, -inf }
 0x5a6   : > { %1196 = vmax.xlane.f32.xlu1 %v1195_v0  ;;  %v1170_v1 = vpop.f32.mrb[11].mxu0  ;;  %v1204_v4 = vsel %vm1182_vm3, %v4538_v63, -inf }
 0x5a7   : > { %v1198_v2 = vsel %vm1182_vm3, %v1170_v1, -inf }
 0x5a9   : > { %1199 = vmax.xlane.f32.xlu0 %v1198_v2 }
 0x5aa   : > { %1202 = vmax.xlane.f32.xlu1 %v1201_v3 }
 0x5ad   : > { %1205 = vmax.xlane.f32.xlu0 %v1204_v4 }
 0x60e   : > { %v6379_v5 = vpop.f32.mrb[12].mxu0 }
 0x60f   : > { %v6381_v6 = vpop.f32.mrb[13].mxu0  ;;  %v1461_v11 = vsel %vm1182_vm3, %v6379_v5, -inf }
 0x610   : > { %v6383_v7 = vpop.f32.mrb[14].mxu0  ;;  %v1455_v8 = vsel %vm1182_vm3, %v6381_v6, -inf }
 0x611   : > { %1456 = vmax.xlane.f32.xlu1 %v1455_v8  ;;  %v6387_v9 = vpop.f32.mrb[15].mxu0  ;;  %v1464_v13 = vsel %vm1182_vm3, %v6383_v7, -inf }
 0x612   : > { %v1458_v10 = vsel %vm1182_vm3, %v6387_v9, -inf }
 0x613   : > { %1459 = vmax.xlane.f32.xlu0 %v1458_v10 }
 0x615   : > { %1462 = vmax.xlane.f32.xlu1 %v1461_v11 }
 0x616   : > { %v6393_v12 = vpop.f32.mrb[16].mxu0 }
 0x617   : > { %v6397_v14 = vpop.f32.mrb[17].mxu0  ;;  %1465 = vmax.xlane.f32.xlu0 %v1464_v13  ;;  %v1473_v19 = vsel %vm1182_vm3, %v6393_v12, -inf }
 0x618   : > { %v6399_v15 = vpop.f32.mrb[18].mxu0  ;;  %v1467_v16 = vsel %vm1182_vm3, %v6397_v14, -inf }
 0x619   : > { %1468 = vmax.xlane.f32.xlu1 %v1467_v16  ;;  %v6403_v17 = vpop.f32.mrb[19].mxu0  ;;  %v1476_v20 = vsel %vm1182_vm3, %v6399_v15, -inf }
 0x61a   : > { %v1470_v18 = vsel %vm1182_vm3, %v6403_v17, -inf }
 0x61b   : > { %1471 = vmax.xlane.f32.xlu0 %v1470_v18 }
 0x61d   : > { %1474 = vmax.xlane.f32.xlu1 %v1473_v19 }
 0x61f   : > { %1477 = vmax.xlane.f32.xlu0 %v1476_v20 }
 0x62a   : > { %v1191_v21 = vpop.xlane.xlu0 %1190 }
 0x62b   : > { %v1185_v29 = vpop.xlane.xlu1 %1184  ;;  %v1209_v34 = vsub.f32 %v6359_v51, %v1191_v21 }
 0x62c   : > { %v1207_v38 = vsub.f32 %v6361_v52, %v1185_v29 }
 0x62d   : > { %v1219_v37 = vmul.f32 1.442695, %v1209_v34 }
 0x62e   : > { %v1188_v22 = vpop.xlane.xlu0 %1187  ;;  %1276 = vrot.lane.b32.xlu1 %v6337_v43, %s5793_s0  ;;  %v1215_v46 = vmul.f32 1.442695, %v1207_v38  ;;  %s4345_s0 = sshll.u32 %s7211_s16, 10 }
 0x62f   : > { %v1208_v23 = vsub.f32 %v1154_v58, %v1188_v22 }
 0x631   : > { %v1217_v26 = vmul.f32 1.442695, %v1208_v23 }
 0x632   : > { %v1194_v24 = vpop.xlane.xlu0 %1193 }
 0x633   : > { %v1210_v25 = vsub.f32 %v4534_v56, %v1194_v24  ;;  %v1197_v32 = vpop.xlane.xlu1 %1196 }
 0x634   : > { %v1211_v49 = vsub.f32 %v6370_v61, %v1197_v32 }
 0x635   : > { %v1221_v27 = vmul.f32 1.442695, %v1210_v25 }
 0x636   : > { %v1200_v28 = vpop.xlane.xlu0 %1199  ;;  %v1223_v56 = vmul.f32 1.442695, %v1211_v49 }
 0x637   : > { %5066 = vpow2.f32 %v1221_v27  ;;  %v1212_v30 = vsub.f32 %v1170_v1, %v1200_v28  ;;  %v1203_v42 = vpop.xlane.xlu1 %1202 }
 0x638   : > { %5068 = vpow2.f32 %v1217_v26  ;;  %v1213_v47 = vsub.f32 %v6368_v60, %v1203_v42 }
 0x639   : > { %v1225_v35 = vmul.f32 1.442695, %v1212_v30 }
 0x63a   : > { %v1206_v31 = vpop.xlane.xlu0 %1205  ;;  %v1227_v50 = vmul.f32 1.442695, %v1213_v47 }
 0x63b   : > { %v1214_v33 = vsub.f32 %v4538_v63, %v1206_v31 }
 0x63d   : > { %v1229_v36 = vmul.f32 1.442695, %v1214_v33 }
 0x63f   : > { %5070 = vpow2.f32 %v1229_v36 }
 0x640   : > { %5072 = vpow2.f32 %v1225_v35 }
 0x641   : > { %v6414_v41 = vpop.eup %5066  ;;  %5074 = vpow2.f32 %v1219_v37 }
 0x642   : > { %v1240_v44 = vsel %vm1182_vm3, %v6414_v41, 0.0  ;;  %v6418_v45 = vpop.eup %5068  ;;  %5076 = vpow2.f32 %v1215_v46 }
 0x643   : > { %1241 = vadd.xlane.f32.xlu0 %v1240_v44  ;;  %v1234_v48 = vsel %vm1182_vm3, %v6418_v45, 0.0  ;;  %5078 = vpow2.f32 %v1227_v50 }
 0x644   : > { %5080 = vpow2.f32 %v1223_v56 }
 0x647   : > { %1235 = vadd.xlane.f32.xlu0 %v1234_v48 }
 0x649   : > { %v6424_v51 = vpop.eup %5070 }
 0x64a   : > { %v1252_v52 = vsel %vm1182_vm3, %v6424_v51, 0.0  ;;  %v6428_v55 = vpop.eup %5072 }
 0x64b   : > { %1253 = vadd.xlane.f32.xlu0 %v1252_v52  ;;  %v6430_v57 = vpop.eup %5074  ;;  %v1246_v58 = vsel %vm1182_vm3, %v6428_v55, 0.0 }
 0x64c   : > { %v1237_v59 = vsel %vm1182_vm3, %v6430_v57, 0.0  ;;  %v6436_v60 = vpop.eup %5076 }
 0x64d   : > { %v1231_v61 = vsel %vm1182_vm3, %v6436_v60, 0.0  ;;  %v6440_v62 = vpop.eup %5078 }
 0x64e   : > { %v1249_v63 = vsel %vm1182_vm3, %v6440_v62, 0.0  ;;  %v6444_v0 = vpop.eup %5080 }
 0x64f   : > { %1247 = vadd.xlane.f32.xlu0 %v1246_v58  ;;  %v1243_v1 = vsel %vm1182_vm3, %v6444_v0, 0.0 }
 0x652   : > { %1238 = vadd.xlane.f32.xlu1 %v1237_v59 }
 0x656   : > { %1232 = vadd.xlane.f32.xlu1 %v1231_v61 }
 0x65a   : > { %1250 = vadd.xlane.f32.xlu1 %v1249_v63 }
 0x65e   : > { %1244 = vadd.xlane.f32.xlu1 %v1243_v1 }
 0x69e   : > { %v1457_v2 = vpop.xlane.xlu1 %1456 }
 0x69f   : > { %v1479_v3 = vsub.f32 %v6381_v6, %v1457_v2 }
 0x6a0   : > { %v1460_v4 = vpop.xlane.xlu0 %1459 }
 0x6a1   : > { %v1480_v10 = vsub.f32 %v6387_v9, %v1460_v4  ;;  %v1487_v13 = vmul.f32 1.442695, %v1479_v3 }
 0x6a2   : > { %v1463_v8 = vpop.xlane.xlu1 %1462 }
 0x6a3   : > { %v1481_v11 = vsub.f32 %v6379_v5, %v1463_v8  ;;  %v1489_v21 = vmul.f32 1.442695, %v1480_v10 }
 0x6a4   : > { %v1466_v16 = vpop.xlane.xlu0 %1465 }
 0x6a5   : > { %v1491_v18 = vmul.f32 1.442695, %v1481_v11  ;;  %v1482_v19 = vsub.f32 %v6383_v7, %v1466_v16 }
 0x6a6   : > { %v1469_v20 = vpop.xlane.xlu1 %1468 }
 0x6a7   : > { %5082 = vpow2.f32 %v1491_v18  ;;  %v1493_v22 = vmul.f32 1.442695, %v1482_v19  ;;  %v1483_v23 = vsub.f32 %v6397_v14, %v1469_v20 }
 0x6a8   : > { %5084 = vpow2.f32 %v1487_v13  ;;  %v1472_v24 = vpop.xlane.xlu0 %1471 }
 0x6a9   : > { %5086 = vpow2.f32 %v1493_v22  ;;  %v1484_v9 = vsub.f32 %v6403_v17, %v1472_v24  ;;  %v1495_v25 = vmul.f32 1.442695, %v1483_v23 }
 0x6aa   : > { %v1475_v6 = vpop.xlane.xlu1 %1474  ;;  %5088 = vpow2.f32 %v1489_v21 }
 0x6ab   : > { %v1485_v5 = vsub.f32 %v6393_v12, %v1475_v6  ;;  %v1497_v29 = vmul.f32 1.442695, %v1484_v9 }
 0x6ac   : > { %v1478_v26 = vpop.xlane.xlu0 %1477 }
 0x6ad   : > { %v1499_v27 = vmul.f32 1.442695, %v1485_v5  ;;  %v1486_v7 = vsub.f32 %v6399_v15, %v1478_v26 }
 0x6ae   : > { %v1277_v28 = vpop.permute.xlu1 %1276 }
 0x6af   : > { %5090 = vpow2.f32 %v1499_v27  ;;  %v1501_v30 = vmul.f32 1.442695, %v1486_v7  ;;  %4539 = vmatprep.subr.bf16.mxu1 %v1277_v28 }
 0x6b0   : > { %5092 = vpow2.f32 %v1495_v25  ;;  %4540 = vmatpush3.bf16.msra.mxu1 %v1277_v28 }
 0x6b1   : > { %v6456_v14 = vpop.eup %5082  ;;  %5094 = vpow2.f32 %v1501_v30 }
 0x6b2   : > { %v6458_v31 = vpop.eup %5084  ;;  %v1509_v12 = vsel %vm1182_vm3, %v6456_v14, 0.0  ;;  %5096 = vpow2.f32 %v1497_v29 }
 0x6b3   : > { %v6462_v17 = vpop.eup %5086  ;;  %1510 = vadd.xlane.f32.xlu1 %v1509_v12  ;;  %v1503_v33 = vsel %vm1182_vm3, %v6458_v31, 0.0 }
 0x6b4   : > { %v1512_v15 = vsel %vm1182_vm3, %v6462_v17, 0.0  ;;  %v6466_v32 = vpop.eup %5088 }
 0x6b5   : > { %1513 = vadd.xlane.f32.xlu0 %v1512_v15  ;;  %v1506_v34 = vsel %vm1182_vm3, %v6466_v32, 0.0 }
 0x6b7   : > { %1504 = vadd.xlane.f32.xlu1 %v1503_v33 }
 0x6b9   : > { %v6472_v35 = vpop.eup %5090  ;;  %1507 = vadd.xlane.f32.xlu0 %v1506_v34 }
 0x6ba   : > { %v6474_v36 = vpop.eup %5092  ;;  %v1521_v37 = vsel %vm1182_vm3, %v6472_v35, 0.0 }
 0x6bb   : > { %v6478_v38 = vpop.eup %5094  ;;  %1522 = vadd.xlane.f32.xlu1 %v1521_v37  ;;  %v1515_v46 = vsel %vm1182_vm3, %v6474_v36, 0.0 }
 0x6bc   : > { %v1524_v42 = vsel %vm1182_vm3, %v6478_v38, 0.0  ;;  %v6482_v44 = vpop.eup %5096 }
 0x6bd   : > { %1525 = vadd.xlane.f32.xlu0 %v1524_v42  ;;  %v1518_v47 = vsel %vm1182_vm3, %v6482_v44, 0.0 }
 0x6bf   : > { %1516 = vadd.xlane.f32.xlu1 %v1515_v46 }
 0x6c1   : > { %1519 = vadd.xlane.f32.xlu0 %v1518_v47 }
 0x6d0   : > { %1801 = vrot.lane.b32.xlu1 %v6337_v43, %s5794_s7  ;;  %v1242_v48 = vpop.xlane.xlu0 %1241 }
 0x6d4   : > { %1793 = vrot.lane.b32.xlu1 %v6318_v40, %s5794_s7  ;;  %v1236_v49 = vpop.xlane.xlu0 %1235 }
 0x6d7   : > { %1547 = vrot.lane.b32.xlu0 %v6337_v43, %s5795_s13 }
 0x6d8   : > { %1795 = vrot.lane.b32.xlu1 %v6316_v39, %s5794_s7  ;;  %v1254_v52 = vpop.xlane.xlu0 %1253 }
 0x6db   : > { %1797 = vrot.lane.b32.xlu0 %v6322_v54, %s5794_s7 }
 0x6dc   : > { %1799 = vrot.lane.b32.xlu1 %v6320_v53, %s5794_s7  ;;  %v1248_v58 = vpop.xlane.xlu0 %1247  ;;  %s3962_s7 = sshll.u32 %s622_s14, 4  ;;  %s7080_s7 = int_to_ptr.vmem [resolvable:$true] %s3962_s7 }
 0x6df   : > { %v1239_v50 = vpop.xlane.xlu1 %1238 }
 0x6e0   : > { %5098 = vrcp.f32 %v1239_v50 }
 0x6e1   : > { %5100 = vrcp.f32 %v1236_v49 }
 0x6e2   : > { %5102 = vrcp.f32 %v1242_v48 }
 0x6e3   : > { %v1233_v56 = vpop.xlane.xlu1 %1232 }
 0x6e4   : > { %5104 = vrcp.f32 %v1233_v56 }
 0x6e7   : > { %v1251_v59 = vpop.xlane.xlu1 %1250 }
 0x6e8   : > { %5106 = vrcp.f32 %v1251_v59  ;;  %v1360_v59 = vld [vmem:[#allocation19] sm:$0xf] }
 0x6e9   : > { %5108 = vrcp.f32 %v1248_v58 }
 0x6ea   : > { %v5099_v61 = vpop.eup %5098  ;;  %5110 = vrcp.f32 %v1254_v52 }
 0x6eb   : > { %v1245_v63 = vpop.xlane.xlu1 %1244  ;;  %v5101_v1 = vpop.eup %5100  ;;  %v1265_v4 = vmul.f32 %v5099_v61, %v6430_v57 }
 0x6ec   : > { %5112 = vrcp.f32 %v1245_v63  ;;  %v5103_v2 = vpop.eup %5102  ;;  %v1264_v10 = vmul.f32 %v5101_v1, %v6418_v45 }
 0x6ed   : > { %v1266_v11 = vmul.f32 %v5103_v2, %v6414_v41 }
 0x6ee   : > { %v5105_v3 = vpop.eup %5104 }
 0x6ef   : > { %v1263_v8 = vmul.f32 %v5105_v3, %v6436_v60  ;;  %v1272_v16 = vpack.c.bf16 %v1266_v11, %v1265_v4 }
 0x6f1   : > { %v1271_v13 = vpack.c.bf16 %v1264_v10, %v1263_v8 }
 0x6f2   : > { %v5107_v18 = vpop.eup %5106 }
 0x6f3   : > { %4541 = vmatprep.mubr.msk.bf16.mxu1 %vm1182_vm3, %v1271_v13  ;;  %v5109_v19 = vpop.eup %5108  ;;  %v1269_v22 = vmul.f32 %v5107_v18, %v6440_v62 }
 0x6f4   : > { %4542 = vmatmul.mubr.msk.bf16.vlgmr.msra.gmra.mrb[12].mxu1 %vm1182_vm3, %v1272_v16  ;;  %v5111_v20 = vpop.eup %5110  ;;  %v1268_v60 = vmul.f32 %v5109_v19, %v6428_v55 }
 0x6f5   : > { %v1270_v45 = vmul.f32 %v5111_v20, %v6424_v51 }
 0x6f6   : > { %v5113_v21 = vpop.eup %5112 }
 0x6f7   : > { %v1267_v57 = vmul.f32 %v5113_v21, %v6444_v0  ;;  %v1274_v41 = vpack.c.bf16 %v1270_v45, %v1269_v22  ;;  %v1726_v45 = vsel %vm1644_vm4, %v1360_v59, 0 }
 0x6f9   : > { %v1273_v23 = vpack.c.bf16 %v1268_v60, %v1267_v57 }
 0x6fb   : > { %4545 = vmatprep.mubr.msk.bf16.mxu1 %vm1182_vm3, %v1273_v23 }
 0x6fc   : > { %4546 = vmatmul.mubr.msk.bf16.gmra.mrb[16].mxu1 %vm1182_vm3, %v1274_v41 }
 0x740   : > { %v1511_v24 = vpop.xlane.xlu1 %1510 }
 0x742   : > { %v1514_v6 = vpop.xlane.xlu0 %1513 }
 0x743   : > { %5114 = vrcp.f32 %v1514_v6 }
 0x744   : > { %v1505_v9 = vpop.xlane.xlu1 %1504 }
 0x745   : > { %5116 = vrcp.f32 %v1505_v9 }
 0x746   : > { %5118 = vrcp.f32 %v1511_v24  ;;  %v1508_v5 = vpop.xlane.xlu0 %1507 }
 0x747   : > { %5120 = vrcp.f32 %v1508_v5 }
 0x748   : > { %v1523_v62 = vpop.xlane.xlu1 %1522 }
 0x74a   : > { %v1526_v0 = vpop.xlane.xlu0 %1525 }
 0x74b   : > { %5122 = vrcp.f32 %v1526_v0 }
 0x74c   : > { %v1517_v55 = vpop.xlane.xlu1 %1516 }
 0x74d   : > { %5124 = vrcp.f32 %v1517_v55  ;;  %v5115_v51 = vpop.eup %5114 }
 0x74e   : > { %5126 = vrcp.f32 %v1523_v62  ;;  %v1520_v25 = vpop.xlane.xlu0 %1519  ;;  %v1538_v28 = vmul.f32 %v5115_v51, %v6462_v17 }
 0x74f   : > { %v5117_v26 = vpop.eup %5116  ;;  %5128 = vrcp.f32 %v1520_v25 }
 0x750   : > { %v5119_v27 = vpop.eup %5118  ;;  %v1535_v30 = vmul.f32 %v5117_v26, %v6458_v31  ;;  %v1802_v33 = vpop.permute.xlu1 %1801 }
 0x751   : > { %v5121_v7 = vpop.eup %5120  ;;  %v1537_v15 = vmul.f32 %v5119_v27, %v6456_v14  ;;  %v1816_v49 = vsel %vm1101_vm2, %v1802_v33, 0 }
 0x752   : > { %v1548_v29 = vpop.permute.xlu0 %1547  ;;  %v1536_v12 = vmul.f32 %v5121_v7, %v6466_v32 }
 0x753   : > { %4559 = vmatprep.subr.bf16.mxu1 %v1548_v29  ;;  %v1544_v37 = vpack.c.bf16 %v1538_v28, %v1537_v15 }
 0x754   : > { %4560 = vmatpush3.bf16.msra.mxu1 %v1548_v29  ;;  %v1543_v34 = vpack.c.bf16 %v1536_v12, %v1535_v30  ;;  %v1794_v56 = vpop.permute.xlu1 %1793 }
 0x755   : > { %4829 = vmatprep.subr.msk.bf16.mxu1 %vm1101_vm2, %v1802_v33  ;;  %v5123_v42 = vpop.eup %5122 }
 0x756   : > { %4561 = vmatprep.mubr.msk.bf16.mxu1 %vm1182_vm3, %v1543_v34  ;;  %v1542_v31 = vmul.f32 %v5123_v42, %v6478_v38  ;;  %v1798_v38 = vpop.permute.xlu0 %1797 }
 0x757   : > { %v5125_v46 = vpop.eup %5124  ;;  %4562 = vmatmul.mubr.msk.bf16.vlgmr.msra.gmra.mrb[20].mxu1 %vm1182_vm3, %v1544_v37 }
 0x758   : > { %v5127_v17 = vpop.eup %5126  ;;  %v1539_v32 = vmul.f32 %v5125_v46, %v6474_v36  ;;  %v1796_v58 = vpop.permute.xlu1 %1795 }
 0x759   : > { %v5129_v47 = vpop.eup %5128  ;;  %v1541_v48 = vmul.f32 %v5127_v17, %v6472_v35  ;;  %v1631_v35 = vld [vmem:[#allocation19 + $0x4] sm:$0xf] }
 0x75a   : > { %v1540_v14 = vmul.f32 %v5129_v47, %v6482_v44  ;;  %4827 = vmatprep.subr.msk.bf16.mxu0 %vm1644_vm4, %v1631_v35  ;;  %v1646_v44 = vsel %vm1644_vm4, %v1631_v35, 0 }
 0x75b   : > { %v1546_v52 = vpack.c.bf16 %v1542_v31, %v1541_v48  ;;  %4570 = vmatpush3.bf16.msra.mxu0 %v1646_v44 }
 0x75c   : > { %v1545_v50 = vpack.c.bf16 %v1540_v14, %v1539_v32  ;;  %v1800_v36 = vpop.permute.xlu1 %1799  ;;  %4828 = vmatprep.subr.msk.bf16.mxu0 %vm1644_vm4, %v1360_v59 }
 0x75d   : > { %4590 = vmatpush3.bf16.xpose.msra.mxu1 %v1816_v49 }
 0x75e   : > { %4565 = vmatprep.mubr.msk.bf16.mxu1 %vm1182_vm3, %v1545_v50 }
 0x75f   : > { %4566 = vmatmul.mubr.msk.bf16.gmra.mrb[24].mxu1 %vm1182_vm3, %v1546_v52 }
 0x760   : > { %4591 = vmatprep.mubr.msk.bf16.mxu1 %vm1101_vm2, %v1794_v56 }
 0x767   : > { %4592 = vmatmul.mubr.msk.bf16.vlgmr.msra.gmra.mrb[28].mxu1 %vm1101_vm2, %v1796_v58 }
 0x768   : > { %4595 = vmatprep.mubr.msk.bf16.mxu1 %vm1101_vm2, %v1798_v38 }
 0x76f   : > { %4596 = vmatmul.mubr.msk.bf16.gmra.mrb[32].mxu1 %vm1101_vm2, %v1800_v36 }
 0x7c7   : > { %v4543_v61 = vpop.f32.mrb[12].mxu1 }
 0x7c8   : > { %v1325_v63 = vpop.f32.mrb[13].mxu1 }
 0x7c9   : > { %v4544_v1 = vpop.f32.mrb[14].mxu1 }
 0x7ca   : > { %v1357_v2 = vpack.c.bf16 %v4544_v1, %v4543_v61  ;;  %v1328_v3 = vpop.f32.mrb[15].mxu1 }
 0x7cb   : > { %v1356_v4 = vpack.c.bf16 %v1328_v3, %v1325_v63 }
 0x7cf   : > { %v4547_v8 = vpop.f32.mrb[16].mxu1 }
 0x7d0   : > { %v1341_v10 = vpop.f32.mrb[17].mxu1 }
 0x7d1   : > { %v4548_v11 = vpop.f32.mrb[18].mxu1 }
 0x7d2   : > { %v1359_v13 = vpack.c.bf16 %v4548_v11, %v4547_v8  ;;  %v1344_v16 = vpop.f32.mrb[19].mxu1 }
 0x7d3   : > { %v1358_v18 = vpack.c.bf16 %v1344_v16, %v1341_v10 }
 0x82a   : > { %v4563_v19 = vpop.f32.mrb[20].mxu1 }
 0x82b   : > { %v1596_v20 = vpop.f32.mrb[21].mxu1 }
 0x82c   : > { %v4564_v21 = vpop.f32.mrb[22].mxu1 }
 0x82d   : > { %v1628_v22 = vpack.c.bf16 %v4564_v21, %v4563_v19  ;;  %v1599_v57 = vpop.f32.mrb[23].mxu1 }
 0x82e   : > { %v1627_v60 = vpack.c.bf16 %v1599_v57, %v1596_v20 }
 0x830   : > { %4571 = vmatprep.mubr.msk.bf16.mxu0 %vm1101_vm2, %v1627_v60 }
 0x831   : > { %4572 = vmatmul.mubr.msk.bf16.vlgmr.msra.gmra.mrb[20].mxu0 %vm1101_vm2, %v1628_v22 }
 0x832   : > { %v4567_v23 = vpop.f32.mrb[24].mxu1  ;;  %4580 = vmatpush3.bf16.msra.mxu0 %v1726_v45 }
 0x833   : > { %v1612_v41 = vpop.f32.mrb[25].mxu1 }
 0x834   : > { %v4568_v24 = vpop.f32.mrb[26].mxu1 }
 0x835   : > { %v1630_v6 = vpack.c.bf16 %v4568_v24, %v4567_v23  ;;  %v1615_v9 = vpop.f32.mrb[27].mxu1 }
 0x836   : > { %v1629_v5 = vpack.c.bf16 %v1615_v9, %v1612_v41 }
 0x838   : > { %4575 = vmatprep.mubr.msk.bf16.mxu0 %vm1101_vm2, %v1629_v5 }
 0x839   : > { %4576 = vmatmul.mubr.msk.bf16.gmra.mrb[24].mxu0 %vm1101_vm2, %v1630_v6 }
 0x83a   : > { %4581 = vmatprep.mubr.msk.bf16.mxu0 %vm1101_vm2, %v1356_v4  ;;  %v4593_v62 = vpop.f32.mrb[28].mxu1 }
 0x83b   : > { %v1852_v0 = vpop.f32.mrb[29].mxu1  ;;  %v1889_v27 = vsel %vm1182_vm3, %v4593_v62, -inf }
 0x83c   : > { %v4594_v55 = vpop.f32.mrb[30].mxu1  ;;  %v1883_v51 = vsel %vm1182_vm3, %v1852_v0, -inf }
 0x83d   : > { %1884 = vmax.xlane.f32.xlu0 %v1883_v51  ;;  %v1855_v25 = vpop.f32.mrb[31].mxu1  ;;  %v1892_v30 = vsel %vm1182_vm3, %v4594_v55, -inf }
 0x83e   : > { %v1886_v26 = vsel %vm1182_vm3, %v1855_v25, -inf }
 0x83f   : > { %1887 = vmax.xlane.f32.xlu1 %v1886_v26 }
 0x841   : > { %1890 = vmax.xlane.f32.xlu0 %v1889_v27  ;;  %4582 = vmatmul.mubr.msk.bf16.vlgmr.msra.gmra.mrb[20].mxu0 %vm1101_vm2, %v1357_v2 }
 0x842   : > { %4585 = vmatprep.mubr.msk.bf16.mxu0 %vm1101_vm2, %v1358_v18  ;;  %v4597_v7 = vpop.f32.mrb[32].mxu1 }
 0x843   : > { %v1868_v28 = vpop.f32.mrb[33].mxu1  ;;  %v1901_v37 = vsel %vm1182_vm3, %v4597_v7, -inf }
 0x844   : > { %v6538_v29 = vpop.f32.mrb[34].mxu1  ;;  %v1895_v33 = vsel %vm1182_vm3, %v1868_v28, -inf }
 0x845   : > { %1893 = vmax.xlane.f32.xlu0 %v1892_v30  ;;  %v6541_v12 = vpop.f32.mrb[35].mxu1  ;;  %v1904_v34 = vsel %vm1182_vm3, %v6538_v29, -inf }
 0x846   : > { %v1898_v15 = vsel %vm1182_vm3, %v6541_v12, -inf }
 0x847   : > { %1899 = vmax.xlane.f32.xlu1 %v1898_v15 }
 0x849   : > { %4586 = vmatmul.mubr.msk.bf16.gmra.mrb[24].mxu0 %vm1101_vm2, %v1359_v13  ;;  %1896 = vmax.xlane.f32.xlu0 %v1895_v33 }
 0x84b   : > { %1905 = vmax.xlane.f32.xlu1 %v1904_v34 }
 0x84d   : > { %1902 = vmax.xlane.f32.xlu0 %v1901_v37 }
 0x8ca   : > { %v1885_v42 = vpop.xlane.xlu0 %1884 }
 0x8cb   : > { %v1907_v46 = vsub.f32 %v1852_v0, %v1885_v42 }
 0x8cc   : > { %v1888_v17 = vpop.xlane.xlu1 %1887 }
 0x8cd   : > { %v1915_v32 = vmul.f32 1.442695, %v1907_v46  ;;  %v1908_v14 = vsub.f32 %v1855_v25, %v1888_v17 }
 0x8ce   : > { %v1891_v47 = vpop.xlane.xlu0 %1890 }
 0x8cf   : > { %v1909_v31 = vsub.f32 %v4593_v62, %v1891_v47  ;;  %v1917_v52 = vmul.f32 1.442695, %v1908_v14 }
 0x8d1   : > { %v1919_v48 = vmul.f32 1.442695, %v1909_v31 }
 0x8d2   : > { %v1894_v49 = vpop.xlane.xlu0 %1893 }
 0x8d3   : > { %5130 = vpow2.f32 %v1919_v48  ;;  %v1910_v50 = vsub.f32 %v4594_v55, %v1894_v49 }
 0x8d4   : > { %5132 = vpow2.f32 %v1915_v32  ;;  %v1900_v19 = vpop.xlane.xlu1 %1899 }
 0x8d5   : > { %v1921_v56 = vmul.f32 1.442695, %v1910_v50  ;;  %v1912_v22 = vsub.f32 %v6541_v12, %v1900_v19 }
 0x8d6   : > { %v1897_v58 = vpop.xlane.xlu0 %1896 }
 0x8d7   : > { %5134 = vpow2.f32 %v1921_v56  ;;  %v1911_v38 = vsub.f32 %v1868_v28, %v1897_v58  ;;  %v1925_v60 = vmul.f32 1.442695, %v1912_v22 }
 0x8d8   : > { %5136 = vpow2.f32 %v1917_v52  ;;  %v1906_v20 = vpop.xlane.xlu1 %1905 }
 0x8d9   : > { %v1923_v59 = vmul.f32 1.442695, %v1911_v38  ;;  %v1914_v21 = vsub.f32 %v6538_v29, %v1906_v20 }
 0x8da   : > { %v1903_v36 = vpop.xlane.xlu0 %1902 }
 0x8db   : > { %v1913_v35 = vsub.f32 %v4597_v7, %v1903_v36  ;;  %v1929_v57 = vmul.f32 1.442695, %v1914_v21 }
 0x8dd   : > { %v6550_v44 = vpop.eup %5130  ;;  %v1927_v61 = vmul.f32 1.442695, %v1913_v35 }
 0x8de   : > { %v1937_v63 = vsel %vm1182_vm3, %v6550_v44, 0.0  ;;  %v5133_v1 = vpop.eup %5132 }
 0x8df   : > { %5138 = vpow2.f32 %v1927_v61  ;;  %1938 = vadd.xlane.f32.xlu0 %v1937_v63  ;;  %v1931_v3 = vsel %vm1182_vm3, %v5133_v1, 0.0 }
 0x8e0   : > { %5140 = vpow2.f32 %v1923_v59 }
 0x8e1   : > { %v5135_v2 = vpop.eup %5134  ;;  %5142 = vpow2.f32 %v1929_v57 }
 0x8e2   : > { %v1940_v4 = vsel %vm1182_vm3, %v5135_v2, 0.0  ;;  %v5137_v8 = vpop.eup %5136  ;;  %5144 = vpow2.f32 %v1925_v60 }
 0x8e3   : > { %1932 = vadd.xlane.f32.xlu0 %v1931_v3  ;;  %1941 = vadd.xlane.f32.xlu1 %v1940_v4  ;;  %v1934_v10 = vsel %vm1182_vm3, %v5137_v8, 0.0 }
 0x8e7   : > { %1935 = vadd.xlane.f32.xlu1 %v1934_v10 }
 0x8e9   : > { %v6557_v11 = vpop.eup %5138 }
 0x8ea   : > { %v1949_v13 = vsel %vm1182_vm3, %v6557_v11, 0.0  ;;  %v6561_v16 = vpop.eup %5140 }
 0x8eb   : > { %1950 = vadd.xlane.f32.xlu0 %v1949_v13  ;;  %v1943_v18 = vsel %vm1182_vm3, %v6561_v16, 0.0  ;;  %v5143_v45 = vpop.eup %5142 }
 0x8ec   : > { %v1952_v23 = vsel %vm1182_vm3, %v5143_v45, 0.0  ;;  %v5145_v41 = vpop.eup %5144 }
 0x8ed   : > { %v1946_v24 = vsel %vm1182_vm3, %v5145_v41, 0.0 }
 0x8ef   : > { %1944 = vadd.xlane.f32.xlu0 %v1943_v18 }
 0x8f8   : > { %2156 = vrot.lane.b32.xlu1 %v6337_v43, %s5796_s30 }
 0x905   : > { %1975 = vrot.lane.b32.xlu0 %v6337_v43, %s5797_s19  ;;  %s7212_s19 = sld [smem:[#allocation45_spill]] }
 0x909   : > { %2152 = vrot.lane.b32.xlu0 %v6322_v54, %s5796_s30 }
 0x90d   : > { %2511 = vrot.lane.b32.xlu0 %v6337_v43, %s5798_s9 }
 0x911   : > { %2505 = vrot.lane.b32.xlu0 %v6316_v39, %s5798_s9 }
 0x915   : > { %2509 = vrot.lane.b32.xlu0 %v6320_v53, %s5798_s9 }
 0x91c   : > { %1953 = vadd.xlane.f32.xlu1 %v1952_v23 }
 0x920   : > { %1947 = vadd.xlane.f32.xlu1 %v1946_v24 }
 0x931   : > { %2148 = vrot.lane.b32.xlu1 %v6318_v40, %s5796_s30 }
 0x935   : > { %2150 = vrot.lane.b32.xlu1 %v6316_v39, %s5796_s30 }
 0x939   : > { %2154 = vrot.lane.b32.xlu1 %v6320_v53, %s5796_s30 }
 0x93d   : > { %2503 = vrot.lane.b32.xlu1 %v6318_v40, %s5798_s9 }
 0x941   : > { %2507 = vrot.lane.b32.xlu1 %v6322_v54, %s5798_s9  ;;  %s7077_s9 = scalar_lea.hbm %s7212_s19, %s4345_s0 }
 0x96c   : > { %v1939_v6 = vpop.xlane.xlu0 %1938 }
 0x970   : > { %v1942_v9 = vpop.xlane.xlu1 %1941  ;;  %v1933_v5 = vpop.xlane.xlu0 %1932 }
 0x971   : > { %5146 = vrcp.f32 %v1942_v9 }
 0x972   : > { %5148 = vrcp.f32 %v1933_v5 }
 0x973   : > { %5150 = vrcp.f32 %v1939_v6 }
 0x974   : > { %v1936_v62 = vpop.xlane.xlu1 %1935 }
 0x975   : > { %5152 = vrcp.f32 %v1936_v62 }
 0x978   : > { %v1951_v0 = vpop.xlane.xlu0 %1950  ;;  %v2157_v15 = vpop.permute.xlu1 %2156 }
 0x979   : > { %v2171_v42 = vsel %vm1101_vm2, %v2157_v15, 0 }
 0x97b   : > { %v5147_v55 = vpop.eup %5146 }
 0x97c   : > { %v1945_v51 = vpop.xlane.xlu0 %1944  ;;  %v5149_v25 = vpop.eup %5148  ;;  %v1966_v7 = vmul.f32 %v5147_v55, %v5135_v2  ;;  %v2059_v2 = vld [vmem:[#allocation19 + $0x8] sm:$0xf] }
 0x97d   : > { %v5151_v26 = vpop.eup %5150  ;;  %v1963_v29 = vmul.f32 %v5149_v25, %v5133_v1  ;;  %4830 = vmatprep.subr.msk.bf16.mxu0 %vm1644_vm4, %v2059_v2  ;;  %v2073_v3 = vsel %vm1644_vm4, %v2059_v2, 0 }
 0x97e   : > { %v1965_v12 = vmul.f32 %v5151_v26, %v6550_v44  ;;  %4610 = vmatpush3.bf16.msra.mxu0 %v2073_v3 }
 0x97f   : > { %v5153_v27 = vpop.eup %5152 }
 0x980   : > { %v1976_v28 = vpop.permute.xlu0 %1975  ;;  %v1964_v30 = vmul.f32 %v5153_v27, %v5137_v8  ;;  %v1972_v34 = vpack.c.bf16 %v1966_v7, %v1965_v12 }
 0x981   : > { %4599 = vmatprep.subr.bf16.mxu1 %v1976_v28 }
 0x982   : > { %4600 = vmatpush3.bf16.msra.mxu1 %v1976_v28  ;;  %v1971_v33 = vpack.c.bf16 %v1964_v30, %v1963_v29 }
 0x983   : > { %4831 = vmatprep.subr.msk.bf16.mxu1 %vm1101_vm2, %v2157_v15 }
 0x984   : > { %4601 = vmatprep.mubr.msk.bf16.mxu1 %vm1182_vm3, %v1971_v33  ;;  %v2153_v37 = vpop.permute.xlu0 %2152 }
 0x985   : > { %4602 = vmatmul.mubr.msk.bf16.vlgmr.msra.gmra.mrb[36].mxu1 %vm1182_vm3, %v1972_v34 }
 0x988   : > { %v2512_v46 = vpop.permute.xlu0 %2511 }
 0x989   : > { %v2526_v44 = vsel %vm1101_vm2, %v2512_v46, 0 }
 0x98b   : > { %4620 = vmatpush3.bf16.xpose.msra.mxu1 %v2171_v42 }
 0x98c   : > { %4833 = vmatprep.subr.msk.bf16.mxu1 %vm1101_vm2, %v2512_v46  ;;  %v2506_v63 = vpop.permute.xlu0 %2505 }
 0x990   : > { %v2510_v4 = vpop.permute.xlu0 %2509 }
 0x9a9   : > { %v1954_v17 = vpop.xlane.xlu1 %1953 }
 0x9aa   : > { %5154 = vrcp.f32 %v1954_v17 }
 0x9ab   : > { %5156 = vrcp.f32 %v1945_v51 }
 0x9ac   : > { %5158 = vrcp.f32 %v1951_v0 }
 0x9ad   : > { %v1948_v47 = vpop.xlane.xlu1 %1947 }
 0x9ae   : > { %5160 = vrcp.f32 %v1948_v47 }
 0x9b1   : > { %v2149_v38 = vpop.permute.xlu1 %2148 }
 0x9b4   : > { %v5155_v31 = vpop.eup %5154 }
 0x9b5   : > { %v5157_v32 = vpop.eup %5156  ;;  %v1970_v49 = vmul.f32 %v5155_v31, %v5143_v45  ;;  %v2151_v35 = vpop.permute.xlu1 %2150 }
 0x9b6   : > { %v5159_v14 = vpop.eup %5158  ;;  %v1967_v50 = vmul.f32 %v5157_v32, %v6561_v16 }
 0x9b7   : > { %v1969_v56 = vmul.f32 %v5159_v14, %v6557_v11 }
 0x9b8   : > { %v5161_v48 = vpop.eup %5160 }
 0x9b9   : > { %v1968_v52 = vmul.f32 %v5161_v48, %v5145_v41  ;;  %v1974_v36 = vpack.c.bf16 %v1970_v49, %v1969_v56  ;;  %v2155_v59 = vpop.permute.xlu1 %2154 }
 0x9bb   : > { %v1973_v58 = vpack.c.bf16 %v1968_v52, %v1967_v50 }
 0x9bd   : > { %4605 = vmatprep.mubr.msk.bf16.mxu1 %vm1182_vm3, %v1973_v58  ;;  %v2504_v61 = vpop.permute.xlu1 %2503 }
 0x9be   : > { %4606 = vmatmul.mubr.msk.bf16.gmra.mrb[40].mxu1 %vm1182_vm3, %v1974_v36 }
 0x9bf   : > { %4621 = vmatprep.mubr.msk.bf16.mxu1 %vm1101_vm2, %v2149_v38 }
 0x9c1   : > { %v2508_v1 = vpop.permute.xlu1 %2507 }
 0x9c6   : > { %4622 = vmatmul.mubr.msk.bf16.vlgmr.msra.gmra.mrb[44].mxu1 %vm1101_vm2, %v2151_v35 }
 0x9c7   : > { %4650 = vmatpush3.bf16.xpose.msra.mxu1 %v2526_v44  ;;  %4625 = vmatprep.mubr.msk.bf16.mxu1 %vm1101_vm2, %v2153_v37 }
 0x9ce   : > { %4626 = vmatmul.mubr.msk.bf16.gmra.mrb[48].mxu1 %vm1101_vm2, %v2155_v59 }
 0x9cf   : > { %4651 = vmatprep.mubr.msk.bf16.mxu1 %vm1101_vm2, %v2504_v61 }
 0x9d6   : > { %4652 = vmatmul.mubr.msk.bf16.vlgmr.msra.gmra.mrb[52].mxu1 %vm1101_vm2, %v2506_v63 }
 0x9d7   : > { %4655 = vmatprep.mubr.msk.bf16.mxu1 %vm1101_vm2, %v2508_v1 }
 0x9de   : > { %4656 = vmatmul.mubr.msk.bf16.gmra.mrb[56].mxu1 %vm1101_vm2, %v2510_v4 }
 0xa58   : > { %v4603_v8 = vpop.f32.mrb[36].mxu1 }
 0xa59   : > { %v2024_v10 = vpop.f32.mrb[37].mxu1 }
 0xa5a   : > { %v4604_v11 = vpop.f32.mrb[38].mxu1 }
 0xa5b   : > { %v2056_v13 = vpack.c.bf16 %v4604_v11, %v4603_v8  ;;  %v2027_v16 = vpop.f32.mrb[39].mxu1 }
 0xa5c   : > { %v2055_v18 = vpack.c.bf16 %v2027_v16, %v2024_v10 }
 0xa5e   : > { %4611 = vmatprep.mubr.msk.bf16.mxu0 %vm1101_vm2, %v2055_v18 }
 0xa5f   : > { %4612 = vmatmul.mubr.msk.bf16.vlgmr.msra.gmra.mrb[20].mxu0 %vm1101_vm2, %v2056_v13 }
 0xa91   : > { %v4607_v19 = vpop.f32.mrb[40].mxu1 }
 0xa92   : > { %v2040_v20 = vpop.f32.mrb[41].mxu1 }
 0xa93   : > { %v4608_v21 = vpop.f32.mrb[42].mxu1 }
 0xa94   : > { %v2058_v22 = vpack.c.bf16 %v4608_v21, %v4607_v19  ;;  %v2043_v57 = vpop.f32.mrb[43].mxu1 }
 0xa95   : > { %v2057_v60 = vpack.c.bf16 %v2043_v57, %v2040_v20 }
 0xa97   : > { %4615 = vmatprep.mubr.msk.bf16.mxu0 %vm1101_vm2, %v2057_v60 }
 0xa98   : > { %4616 = vmatmul.mubr.msk.bf16.gmra.mrb[24].mxu0 %vm1101_vm2, %v2058_v22 }
 0xa99   : > { %v6605_v45 = vpop.f32.mrb[44].mxu1 }
 0xa9a   : > { %v6607_v23 = vpop.f32.mrb[45].mxu1 }
 0xa9b   : > { %v6609_v41 = vpop.f32.mrb[46].mxu1 }
 0xa9c   : > { %v6611_v24 = vpop.f32.mrb[47].mxu1 }
 0xaa1   : > { %v6613_v6 = vpop.f32.mrb[48].mxu1 }
 0xaa2   : > { %v6615_v9 = vpop.f32.mrb[49].mxu1 }
 0xaa3   : > { %v6617_v5 = vpop.f32.mrb[50].mxu1 }
 0xaa4   : > { %v6619_v62 = vpop.f32.mrb[51].mxu1 }
 0xaa9   : > { %v4653_v0 = vpop.f32.mrb[52].mxu1 }
 0xaaa   : > { %v2562_v55 = vpop.f32.mrb[53].mxu1  ;;  %v2599_v51 = vsel %vm1182_vm3, %v4653_v0, -inf }
 0xaab   : > { %2600 = vmax.xlane.f32.xlu0 %v2599_v51  ;;  %v4654_v25 = vpop.f32.mrb[54].mxu1  ;;  %v2593_v26 = vsel %vm1182_vm3, %v2562_v55, -inf }
 0xaac   : > { %2594 = vmax.xlane.f32.xlu1 %v2593_v26  ;;  %v2565_v27 = vpop.f32.mrb[55].mxu1  ;;  %v2602_v30 = vsel %vm1182_vm3, %v4654_v25, -inf }
 0xaad   : > { %v2596_v7 = vsel %vm1182_vm3, %v2565_v27, -inf }
 0xaaf   : > { %2597 = vmax.xlane.f32.xlu0 %v2596_v7  ;;  %v2238_v7 = vsel %vm1182_vm3, %v6607_v23, -inf }
 0xab1   : > { %v4657_v28 = vpop.f32.mrb[56].mxu1 }
 0xab2   : > { %v2578_v29 = vpop.f32.mrb[57].mxu1  ;;  %v2611_v37 = vsel %vm1182_vm3, %v4657_v28, -inf }
 0xab3   : > { %2603 = vmax.xlane.f32.xlu0 %v2602_v30  ;;  %v4658_v12 = vpop.f32.mrb[58].mxu1  ;;  %v2605_v15 = vsel %vm1182_vm3, %v2578_v29, -inf  ;;  %v2247_v30 = vsel %vm1182_vm3, %v6609_v41, -inf }
 0xab4   : > { %2606 = vmax.xlane.f32.xlu1 %v2605_v15  ;;  %v2581_v33 = vpop.f32.mrb[59].mxu1  ;;  %v2614_v42 = vsel %vm1182_vm3, %v4658_v12, -inf  ;;  %v2250_v15 = vsel %vm1182_vm3, %v6615_v9, -inf }
 0xab5   : > { %v2608_v34 = vsel %vm1182_vm3, %v2581_v33, -inf }
 0xab7   : > { %2609 = vmax.xlane.f32.xlu0 %v2608_v34  ;;  %v2256_v34 = vsel %vm1182_vm3, %v6613_v6, -inf }
 0xab8   : > { %2612 = vmax.xlane.f32.xlu1 %v2611_v37 }
 0xabb   : > { %2615 = vmax.xlane.f32.xlu0 %v2614_v42 }
 0xac9   : > { %2685 = vrot.lane.b32.xlu1 %v6337_v43, %s5799_s4  ;;  %s3947_s4 = scalar_lea.sflag [#allocation4], %s6264_s24 }
 0xb38   : > { %v2601_v46 = vpop.xlane.xlu0 %2600 }
 0xb39   : > { %v2619_v17 = vsub.f32 %v4653_v0, %v2601_v46  ;;  %v2595_v47 = vpop.xlane.xlu1 %2594 }
 0xb3a   : > { %v2617_v31 = vsub.f32 %v2562_v55, %v2595_v47 }
 0xb3b   : > { %v2629_v32 = vmul.f32 1.442695, %v2619_v17 }
 0xb3c   : > { %v2625_v14 = vmul.f32 1.442695, %v2617_v31  ;;  %v2598_v48 = vpop.xlane.xlu0 %2597 }
 0xb3d   : > { %5162 = vpow2.f32 %v2629_v32  ;;  %v2618_v49 = vsub.f32 %v2565_v27, %v2598_v48 }
 0xb3e   : > { %5164 = vpow2.f32 %v2625_v14 }
 0xb3f   : > { %v2627_v58 = vmul.f32 1.442695, %v2618_v49 }
 0xb40   : > { %v2604_v50 = vpop.xlane.xlu0 %2603 }
 0xb41   : > { %v2620_v52 = vsub.f32 %v4654_v25, %v2604_v50  ;;  %v2607_v56 = vpop.xlane.xlu1 %2606 }
 0xb42   : > { %v2621_v36 = vsub.f32 %v2578_v29, %v2607_v56  ;;  %v2241_v29 = vsel %vm1182_vm3, %v6611_v24, -inf }
 0xb43   : > { %v2631_v38 = vmul.f32 1.442695, %v2620_v52 }
 0xb44   : > { %v2610_v35 = vpop.xlane.xlu0 %2609  ;;  %v2633_v1 = vmul.f32 1.442695, %v2621_v36 }
 0xb45   : > { %5166 = vpow2.f32 %v2631_v38  ;;  %v2613_v44 = vpop.xlane.xlu1 %2612  ;;  %v2622_v63 = vsub.f32 %v2581_v33, %v2610_v35  ;;  %v2259_v33 = vsel %vm1182_vm3, %v6617_v5, -inf }
 0xb46   : > { %v2623_v59 = vsub.f32 %v4657_v28, %v2613_v44  ;;  %5168 = vpow2.f32 %v2627_v58  ;;  %v2244_v28 = vsel %vm1182_vm3, %v6605_v45, -inf }
 0xb47   : > { %v6630_v61 = vpop.eup %5162  ;;  %v2635_v13 = vmul.f32 1.442695, %v2622_v63 }
 0xb48   : > { %v2637_v2 = vmul.f32 1.442695, %v2623_v59  ;;  %v2616_v3 = vpop.xlane.xlu0 %2615  ;;  %v2647_v4 = vsel %vm1182_vm3, %v6630_v61, 0.0  ;;  %v6634_v8 = vpop.eup %5164 }
 0xb49   : > { %v2624_v10 = vsub.f32 %v4658_v12, %v2616_v3  ;;  %v2686_v11 = vpop.permute.xlu1 %2685  ;;  %2648 = vadd.xlane.f32.xlu1 %v2647_v4  ;;  %v2641_v18 = vsel %vm1182_vm3, %v6634_v8, 0.0  ;;  %v2253_v12 = vsel %vm1182_vm3, %v6619_v62, -inf }
 0xb4a   : > { %5170 = vpow2.f32 %v2637_v2  ;;  %4659 = vmatprep.subr.bf16.mxu1 %v2686_v11 }
 0xb4b   : > { %v2639_v16 = vmul.f32 1.442695, %v2624_v10  ;;  %4660 = vmatpush3.bf16.msra.mxu1 %v2686_v11  ;;  %5172 = vpow2.f32 %v2633_v1 }
 0xb4d   : > { %5174 = vpow2.f32 %v2639_v16  ;;  %2642 = vadd.xlane.f32.xlu1 %v2641_v18 }
 0xb4e   : > { %5176 = vpow2.f32 %v2635_v13 }
 0xb4f   : > { %v6638_v19 = vpop.eup %5166 }
 0xb50   : > { %v2650_v20 = vsel %vm1182_vm3, %v6638_v19, 0.0  ;;  %v6642_v21 = vpop.eup %5168 }
 0xb51   : > { %2651 = vadd.xlane.f32.xlu0 %v2650_v20  ;;  %v2644_v57 = vsel %vm1182_vm3, %v6642_v21, 0.0 }
 0xb54   : > { %v6644_v22 = vpop.eup %5170 }
 0xb55   : > { %2645 = vadd.xlane.f32.xlu0 %v2644_v57  ;;  %v2659_v60 = vsel %vm1182_vm3, %v6644_v22, 0.0  ;;  %v6650_v0 = vpop.eup %5172 }
 0xb56   : > { %2660 = vadd.xlane.f32.xlu1 %v2659_v60  ;;  %v2653_v26 = vsel %vm1182_vm3, %v6650_v0, 0.0 }
 0xb57   : > { %v6652_v55 = vpop.eup %5174 }
 0xb58   : > { %v2662_v51 = vsel %vm1182_vm3, %v6652_v55, 0.0  ;;  %v6656_v25 = vpop.eup %5176 }
 0xb59   : > { %2663 = vadd.xlane.f32.xlu0 %v2662_v51  ;;  %v2656_v27 = vsel %vm1182_vm3, %v6656_v25, 0.0 }
 0xb5a   : > { %2654 = vadd.xlane.f32.xlu1 %v2653_v26 }
 0xb5d   : > { %2657 = vadd.xlane.f32.xlu0 %v2656_v27 }
 0xb6b   : > { %2858 = vrot.lane.b32.xlu1 %v6318_v40, %s5800_s17 }
 0xb6f   : > { %2860 = vrot.lane.b32.xlu1 %v6316_v39, %s5800_s17 }
 0xb73   : > { %2862 = vrot.lane.b32.xlu1 %v6322_v54, %s5800_s17  ;;  %2866 = vrot.lane.b32.xlu0 %v6337_v43, %s5800_s17 }
 0xb77   : > { %3221 = vrot.lane.b32.xlu1 %v6337_v43, %s5801_s2  ;;  %2864 = vrot.lane.b32.xlu0 %v6320_v53, %s5800_s17  ;;  %s5662_s17 = scalar_lea.vmem %s7080_s7, 1024 }
 0xb78   : > { %p5663_p5 = scmp.ne.s32.totalorder %s7080_s7, %s5662_s17 }
 0xb7a   : > { %p5664_p10 = pnand %p5663_p5, %p7213_p1 }
 0xb7b   : > { %3215 = vrot.lane.b32.xlu1 %v6316_v39, %s5801_s2  ;;  %3213 = vrot.lane.b32.xlu0 %v6318_v40, %s5801_s2 }
 0xb7c   : > { %p5665_p12 = pneg %p5664_p10 }
 0xb7f   : > { %3219 = vrot.lane.b32.xlu1 %v6320_v53, %s5801_s2  ;;  %3217 = vrot.lane.b32.xlu0 %v6322_v54, %s5801_s2  ;;  %s5807_s2 = smov [#allocation22]  }
 0xb9e   : > { %2239 = vmax.xlane.f32.xlu0 %v2238_v7 }
 0xba2   : > { %2245 = vmax.xlane.f32.xlu0 %v2244_v28 }
 0xba3   : > { %2242 = vmax.xlane.f32.xlu1 %v2241_v29 }
 0xba6   : > { %2248 = vmax.xlane.f32.xlu0 %v2247_v30 }
 0xba7   : > { %2254 = vmax.xlane.f32.xlu1 %v2253_v12 }
 0xbaa   : > { %2251 = vmax.xlane.f32.xlu0 %v2250_v15 }
 0xbab   : > { %2260 = vmax.xlane.f32.xlu1 %v2259_v33 }
 0xbae   : > { %2257 = vmax.xlane.f32.xlu0 %v2256_v34 }
 0xbd6   : > { %v2649_v37 = vpop.xlane.xlu1 %2648 }
 0xbda   : > { %v2643_v42 = vpop.xlane.xlu1 %2642 }
 0xbde   : > { %v2652_v46 = vpop.xlane.xlu0 %2651 }
 0xbdf   : > { %5178 = vrcp.f32 %v2652_v46 }
 0xbe0   : > { %5180 = vrcp.f32 %v2643_v42 }
 0xbe1   : > { %5182 = vrcp.f32 %v2649_v37 }
 0xbe2   : > { %v2646_v17 = vpop.xlane.xlu0 %2645 }
 0xbe3   : > { %5184 = vrcp.f32 %v2646_v17  ;;  %v2661_v47 = vpop.xlane.xlu1 %2660 }
 0xbe6   : > { %v2664_v31 = vpop.xlane.xlu0 %2663 }
 0xbe7   : > { %v2655_v32 = vpop.xlane.xlu1 %2654  ;;  %5186 = vrcp.f32 %v2664_v31 }
 0xbe8   : > { %5188 = vrcp.f32 %v2655_v32 }
 0xbe9   : > { %v5179_v14 = vpop.eup %5178  ;;  %5190 = vrcp.f32 %v2661_v47 }
 0xbea   : > { %v2658_v48 = vpop.xlane.xlu0 %2657  ;;  %v5181_v49 = vpop.eup %5180  ;;  %v2676_v58 = vmul.f32 %v5179_v14, %v6638_v19 }
 0xbeb   : > { %5192 = vrcp.f32 %v2658_v48  ;;  %v2859_v50 = vpop.permute.xlu1 %2858  ;;  %v5183_v52 = vpop.eup %5182  ;;  %v2673_v36 = vmul.f32 %v5181_v49, %v6634_v8 }
 0xbec   : > { %v2675_v44 = vmul.f32 %v5183_v52, %v6630_v61 }
 0xbed   : > { %v5185_v56 = vpop.eup %5184 }
 0xbee   : > { %v2867_v38 = vpop.permute.xlu0 %2866  ;;  %v2674_v35 = vmul.f32 %v5185_v56, %v6642_v21  ;;  %v2682_v1 = vpack.c.bf16 %v2676_v58, %v2675_v44 }
 0xbef   : > { %v2861_v59 = vpop.permute.xlu1 %2860  ;;  %4835 = vmatprep.subr.msk.bf16.mxu1 %vm1101_vm2, %v2867_v38  ;;  %v2881_v4 = vsel %vm1101_vm2, %v2867_v38, 0 }
 0xbf0   : > { %v2681_v63 = vpack.c.bf16 %v2674_v35, %v2673_v36 }
 0xbf1   : > { %v5187_v2 = vpop.eup %5186 }
 0xbf2   : > { %4661 = vmatprep.mubr.msk.bf16.mxu1 %vm1182_vm3, %v2681_v63  ;;  %v5189_v3 = vpop.eup %5188  ;;  %v2680_v13 = vmul.f32 %v5187_v2, %v6652_v55  ;;  %v2865_v60 = vpop.permute.xlu0 %2864 }
 0xbf3   : > { %v2863_v10 = vpop.permute.xlu1 %2862  ;;  %4662 = vmatmul.mubr.msk.bf16.vlgmr.msra.gmra.mrb[60].mxu1 %vm1182_vm3, %v2682_v1  ;;  %v5191_v11 = vpop.eup %5190  ;;  %v2677_v61 = vmul.f32 %v5189_v3, %v6650_v0 }
 0xbf4   : > { %4680 = vmatpush3.bf16.xpose.msra.mxu1 %v2881_v4  ;;  %v2679_v19 = vmul.f32 %v5191_v11, %v6644_v22 }
 0xbf5   : > { %v5193_v8 = vpop.eup %5192 }
 0xbf6   : > { %v2678_v16 = vmul.f32 %v5193_v8, %v6656_v25  ;;  %v2684_v21 = vpack.c.bf16 %v2680_v13, %v2679_v19  ;;  %v3214_v0 = vpop.permute.xlu0 %3213 }
 0xbf7   : > { %v3222_v18 = vpop.permute.xlu1 %3221 }
 0xbf8   : > { %4837 = vmatprep.subr.msk.bf16.mxu1 %vm1101_vm2, %v3222_v18  ;;  %v2683_v20 = vpack.c.bf16 %v2678_v16, %v2677_v61  ;;  %v3236_v57 = vsel %vm1101_vm2, %v3222_v18, 0 }
 0xbfa   : > { %4665 = vmatprep.mubr.msk.bf16.mxu1 %vm1182_vm3, %v2683_v20  ;;  %v3218_v55 = vpop.permute.xlu0 %3217 }
 0xbfb   : > { %4666 = vmatmul.mubr.msk.bf16.gmra.mrb[64].mxu1 %vm1182_vm3, %v2684_v21  ;;  %v3216_v22 = vpop.permute.xlu1 %3215 }
 0xbfc   : > { %4681 = vmatprep.mubr.msk.bf16.mxu1 %vm1101_vm2, %v2859_v50 }
 0xbff   : > { %v3220_v51 = vpop.permute.xlu1 %3219 }
 0xc03   : > { %4682 = vmatmul.mubr.msk.bf16.vlgmr.msra.gmra.mrb[68].mxu1 %vm1101_vm2, %v2861_v59 }
 0xc04   : > { %4710 = vmatpush3.bf16.xpose.msra.mxu1 %v3236_v57  ;;  %4685 = vmatprep.mubr.msk.bf16.mxu1 %vm1101_vm2, %v2863_v10 }
 0xc0b   : > { %4686 = vmatmul.mubr.msk.bf16.gmra.mrb[72].mxu1 %vm1101_vm2, %v2865_v60 }
 0xc0c   : > { %4711 = vmatprep.mubr.msk.bf16.mxu1 %vm1101_vm2, %v3214_v0 }
 0xc13   : > { %4712 = vmatmul.mubr.msk.bf16.vlgmr.msra.gmra.mrb[76].mxu1 %vm1101_vm2, %v3216_v22 }
 0xc14   : > { %4715 = vmatprep.mubr.msk.bf16.mxu1 %vm1101_vm2, %v3218_v55 }
 0xc1b   : > { %4716 = vmatmul.mubr.msk.bf16.gmra.mrb[80].mxu1 %vm1101_vm2, %v3220_v51 }
 0xc2b   : > { %v2240_v25 = vpop.xlane.xlu0 %2239 }
 0xc2c   : > { %v2262_v26 = vsub.f32 %v6607_v23, %v2240_v25 }
 0xc2e   : > { %v2270_v27 = vmul.f32 1.442695, %v2262_v26 }
 0xc2f   : > { %v2246_v7 = vpop.xlane.xlu0 %2245 }
 0xc30   : > { %5194 = vpow2.f32 %v2270_v27  ;;  %v2264_v28 = vsub.f32 %v6605_v45, %v2246_v7  ;;  %v2243_v29 = vpop.xlane.xlu1 %2242 }
 0xc31   : > { %v2263_v30 = vsub.f32 %v6611_v24, %v2243_v29 }
 0xc32   : > { %v2274_v12 = vmul.f32 1.442695, %v2264_v28 }
 0xc33   : > { %v2272_v15 = vmul.f32 1.442695, %v2263_v30  ;;  %v2249_v33 = vpop.xlane.xlu0 %2248 }
 0xc34   : > { %5196 = vpow2.f32 %v2274_v12  ;;  %v2265_v34 = vsub.f32 %v6609_v41, %v2249_v33  ;;  %v2255_v37 = vpop.xlane.xlu1 %2254 }
 0xc35   : > { %5198 = vpow2.f32 %v2272_v15  ;;  %v2267_v42 = vsub.f32 %v6619_v62, %v2255_v37 }
 0xc36   : > { %v2276_v46 = vmul.f32 1.442695, %v2265_v34 }
 0xc37   : > { %v2280_v23 = vmul.f32 1.442695, %v2267_v42  ;;  %v2252_v17 = vpop.xlane.xlu0 %2251 }
 0xc38   : > { %5200 = vpow2.f32 %v2276_v46  ;;  %v2266_v47 = vsub.f32 %v6615_v9, %v2252_v17  ;;  %v2261_v3 = vpop.xlane.xlu1 %2260 }
 0xc39   : > { %5202 = vpow2.f32 %v2280_v23  ;;  %v2269_v25 = vsub.f32 %v6617_v5, %v2261_v3 }
 0xc3a   : > { %v5195_v45 = vpop.eup %5194  ;;  %v2278_v31 = vmul.f32 1.442695, %v2266_v47 }
 0xc3b   : > { %v2258_v24 = vpop.xlane.xlu0 %2257  ;;  %v2286_v32 = vsel %vm1182_vm3, %v5195_v45, 0.0  ;;  %v2284_v28 = vmul.f32 1.442695, %v2269_v25 }
 0xc3c   : > { %5204 = vpow2.f32 %v2278_v31  ;;  %v2268_v14 = vsub.f32 %v6613_v6, %v2258_v24  ;;  %2287 = vadd.xlane.f32.xlu0 %v2286_v32 }
 0xc3e   : > { %v6720_v41 = vpop.eup %5196  ;;  %v2282_v48 = vmul.f32 1.442695, %v2268_v14 }
 0xc3f   : > { %v5199_v62 = vpop.eup %5198  ;;  %v2292_v49 = vsel %vm1182_vm3, %v6720_v41, 0.0 }
 0xc40   : > { %5206 = vpow2.f32 %v2282_v48  ;;  %2293 = vadd.xlane.f32.xlu0 %v2292_v49  ;;  %v2289_v9 = vsel %vm1182_vm3, %v5199_v62, 0.0 }
 0xc41   : > { %2290 = vadd.xlane.f32.xlu1 %v2289_v9 }
 0xc42   : > { %v6725_v50 = vpop.eup %5200 }
 0xc43   : > { %v2295_v52 = vsel %vm1182_vm3, %v6725_v50, 0.0  ;;  %v6729_v56 = vpop.eup %5202 }
 0xc44   : > { %v2301_v38 = vsel %vm1182_vm3, %v6729_v56, 0.0 }
 0xc45   : > { %2296 = vadd.xlane.f32.xlu1 %v2295_v52 }
 0xc46   : > { %v6731_v6 = vpop.eup %5204 }
 0xc47   : > { %v2298_v58 = vsel %vm1182_vm3, %v6731_v6, 0.0 }
 0xc48   : > { %2299 = vadd.xlane.f32.xlu0 %v2298_v58 }
 0xc49   : > { %2302 = vadd.xlane.f32.xlu1 %v2301_v38 }
 0xc4a   : > { %v6737_v36 = vpop.eup %5206 }
 0xc4b   : > { %v2304_v35 = vsel %vm1182_vm3, %v6737_v36, 0.0 }
 0xc4c   : > { %2305 = vadd.xlane.f32.xlu0 %v2304_v35 }
 0xcc6   : > { %v6741_v44 = vpop.f32.mrb[60].mxu1 }
 0xcc7   : > { %v6743_v59 = vpop.f32.mrb[61].mxu1 }
 0xcc8   : > { %v6745_v63 = vpop.f32.mrb[62].mxu1 }
 0xcc9   : > { %v2766_v1 = vpack.c.bf16 %v6745_v63, %v6741_v44  ;;  %v6749_v2 = vpop.f32.mrb[63].mxu1  ;;  %v2288_v10 = vpop.xlane.xlu0 %2287 }
 0xcca   : > { %v2765_v4 = vpack.c.bf16 %v6749_v2, %v6743_v59  ;;  %5208 = vrcp.f32 %v2288_v10 }
 0xccd   : > { %v2294_v49 = vpop.xlane.xlu0 %2293 }
 0xcce   : > { %v2291_v11 = vpop.xlane.xlu1 %2290  ;;  %v6753_v8 = vpop.f32.mrb[64].mxu1 }
 0xccf   : > { %5210 = vrcp.f32 %v2291_v11  ;;  %v6755_v13 = vpop.f32.mrb[65].mxu1 }
 0xcd0   : > { %v6757_v61 = vpop.f32.mrb[66].mxu1  ;;  %5212 = vpow2.f32 %v2284_v28 }
 0xcd1   : > { %v2768_v16 = vpack.c.bf16 %v6757_v61, %v6753_v8  ;;  %v6761_v18 = vpop.f32.mrb[67].mxu1 }
 0xcd2   : > { %v2767_v19 = vpack.c.bf16 %v6761_v18, %v6755_v13  ;;  %v2297_v52 = vpop.xlane.xlu1 %2296 }
 0xcd3   : > { %5214 = vrcp.f32 %v2297_v52 }
 0xcd4   : > { %v5209_v21 = vpop.eup %5208 }
 0xcd5   : > { %v2318_v55 = vmul.f32 %v5209_v21, %v5195_v45  ;;  %v2300_v9 = vpop.xlane.xlu0 %2299 }
 0xcd6   : > { %v6765_v20 = vpop.f32.mrb[68].mxu1  ;;  %v2303_v38 = vpop.xlane.xlu1 %2302  ;;  %5216 = vrcp.f32 %v2300_v9 }
 0xcd7   : > { %v6767_v57 = vpop.f32.mrb[69].mxu1  ;;  %5218 = vrcp.f32 %v2303_v38 }
 0xcd8   : > { %v6769_v60 = vpop.f32.mrb[70].mxu1  ;;  %5220 = vrcp.f32 %v2294_v49 }
 0xcd9   : > { %v5211_v0 = vpop.eup %5210  ;;  %v6771_v22 = vpop.f32.mrb[71].mxu1 }
 0xcda   : > { %v2319_v51 = vmul.f32 %v5211_v0, %v5199_v62  ;;  %v6787_v23 = vpop.eup %5212  ;;  %v2306_v58 = vpop.xlane.xlu0 %2305 }
 0xcdb   : > { %v2307_v32 = vsel %vm1182_vm3, %v6787_v23, 0.0 }
 0xcdc   : > { %v2326_v26 = vpack.c.bf16 %v2319_v51, %v2318_v55 }
 0xcde   : > { %4631 = vmatprep.mubr.msk.bf16.mxu0 %vm1182_vm3, %v2326_v26  ;;  %v6775_v27 = vpop.f32.mrb[72].mxu1 }
 0xcdf   : > { %v6777_v7 = vpop.f32.mrb[73].mxu1 }
 0xce0   : > { %v6779_v29 = vpop.f32.mrb[74].mxu1 }
 0xce1   : > { %v6781_v30 = vpop.f32.mrb[75].mxu1 }
 0xce6   : > { %v4713_v12 = vpop.f32.mrb[76].mxu1 }
 0xce7   : > { %v3272_v15 = vpop.f32.mrb[77].mxu1  ;;  %v3309_v33 = vsel %vm1182_vm3, %v4713_v12, -inf }
 0xce8   : > { %v4714_v34 = vpop.f32.mrb[78].mxu1  ;;  %3310 = vmax.xlane.f32.xlu0 %v3309_v33  ;;  %v3303_v42 = vsel %vm1182_vm3, %v3272_v15, -inf }
 0xce9   : > { %v3275_v5 = vpop.f32.mrb[79].mxu1  ;;  %v3312_v37 = vsel %vm1182_vm3, %v4714_v34, -inf }
 0xcea   : > { %3313 = vmax.xlane.f32.xlu1 %v3312_v37  ;;  %v3306_v46 = vsel %vm1182_vm3, %v3275_v5, -inf }
 0xcec   : > { %3304 = vmax.xlane.f32.xlu0 %v3303_v42 }
 0xcee   : > { %v4717_v17 = vpop.f32.mrb[80].mxu1  ;;  %3307 = vmax.xlane.f32.xlu1 %v3306_v46  ;;  %v5215_v46 = vpop.eup %5214 }
 0xcef   : > { %v6789_v47 = vpop.f32.mrb[81].mxu1  ;;  %v3321_v45 = vsel %vm1182_vm3, %v4717_v17, -inf }
 0xcf0   : > { %v6792_v31 = vpop.f32.mrb[82].mxu1  ;;  %3322 = vmax.xlane.f32.xlu0 %v3321_v45  ;;  %v3315_v14 = vsel %vm1182_vm3, %v6789_v47, -inf }
 0xcf1   : > { %v6794_v24 = vpop.f32.mrb[83].mxu1  ;;  %v3324_v62 = vsel %vm1182_vm3, %v6792_v31, -inf }
 0xcf2   : > { %2308 = vadd.xlane.f32.xlu1 %v2307_v32  ;;  %v3318_v48 = vsel %vm1182_vm3, %v6794_v24, -inf  ;;  %v5217_v32 = vpop.eup %5216 }
 0xcf3   : > { %v2322_v49 = vmul.f32 %v5217_v32, %v6731_v6 }
 0xcf4   : > { %3316 = vmax.xlane.f32.xlu0 %v3315_v14  ;;  %v5219_v14 = vpop.eup %5218 }
 0xcf5   : > { %v2323_v9 = vmul.f32 %v5219_v14, %v6729_v56  ;;  %v2414_v14 = vld [vmem:[#allocation19 + $0xc] sm:$0xf] }
 0xcf6   : > { %3319 = vmax.xlane.f32.xlu1 %v3318_v48  ;;  %v5221_v48 = vpop.eup %5220 }
 0xcf7   : > { %v2320_v52 = vmul.f32 %v5221_v48, %v6720_v41  ;;  %v2428_v48 = vsel %vm1644_vm4, %v2414_v14, 0 }
 0xcfa   : > { %3325 = vmax.xlane.f32.xlu1 %v3324_v62  ;;  %v2321_v62 = vmul.f32 %v5215_v46, %v6725_v50 }
 0xcfc   : > { %v2327_v38 = vpack.c.bf16 %v2321_v62, %v2320_v52  ;;  %v2769_v62 = vld [vmem:[#allocation19 + $0x10] sm:$0xf]  ;;  %v2957_v52 = vsel %vm1182_vm3, %v6769_v60, -inf }
 0xd0a   : > { %2330 = vrot.lane.b32.xlu0 %v6337_v43, %s5802_s5  ;;  %s5666_s5 = sshll.u32 %s5807_s2, 4  ;;  %s5667_s5 = int_to_ptr.vmem [resolvable:$false] %s5666_s5 }
 0xd0b   : > { %p5669_p8 = scmp.lt.s32.totalorder %s7080_s7, %s5667_s5 }
 0xd75   : > { %v3311_v35 = vpop.xlane.xlu0 %3310 }
 0xd76   : > { %v3329_v3 = vsub.f32 %v4713_v12, %v3311_v35 }
 0xd77   : > { %v3314_v10 = vpop.xlane.xlu1 %3313 }
 0xd78   : > { %v3339_v11 = vmul.f32 1.442695, %v3329_v3  ;;  %v3330_v21 = vsub.f32 %v4714_v34, %v3314_v10  ;;  %v2328_v3 = vpack.c.bf16 %v2323_v9, %v2322_v49  ;;  %v2954_v49 = vsel %vm1182_vm3, %v6765_v20, -inf }
 0xd79   : > { %v3305_v0 = vpop.xlane.xlu0 %3304 }
 0xd7a   : > { %5222 = vpow2.f32 %v3339_v11  ;;  %v3327_v55 = vsub.f32 %v3272_v15, %v3305_v0  ;;  %v3341_v25 = vmul.f32 1.442695, %v3330_v21 }
 0xd7b   : > { %v3308_v51 = vpop.xlane.xlu1 %3307 }
 0xd7c   : > { %v3335_v26 = vmul.f32 1.442695, %v3327_v55  ;;  %v3328_v28 = vsub.f32 %v3275_v5, %v3308_v51 }
 0xd7d   : > { %v3323_v33 = vpop.xlane.xlu0 %3322 }
 0xd7e   : > { %5224 = vpow2.f32 %v3335_v26  ;;  %v3333_v37 = vsub.f32 %v4717_v17, %v3323_v33  ;;  %v3337_v12 = vmul.f32 1.442695, %v3328_v28 }
 0xd7f   : > { %5226 = vrcp.f32 %v2306_v58  ;;  %v2309_v42 = vpop.xlane.xlu1 %2308 }
 0xd80   : > { %5228 = vpow2.f32 %v3341_v25  ;;  %v3347_v45 = vmul.f32 1.442695, %v3333_v37 }
 0xd81   : > { %5230 = vrcp.f32 %v2309_v42  ;;  %v3317_v34 = vpop.xlane.xlu0 %3316 }
 0xd82   : > { %5232 = vpow2.f32 %v3347_v45 }
 0xd83   : > { %5234 = vpow2.f32 %v3337_v12 }
 0xd84   : > { %v6805_v15 = vpop.eup %5222 }
 0xd85   : > { %v2331_v5 = vpop.permute.xlu0 %2330  ;;  %v3357_v17 = vsel %vm1182_vm3, %v6805_v15, 0.0 }
 0xd86   : > { %3358 = vadd.xlane.f32.xlu1 %v3357_v17  ;;  %4629 = vmatprep.subr.bf16.mxu0 %v2331_v5 }
 0xd87   : > { %4630 = vmatpush3.bf16.msra.mxu0 %v2331_v5  ;;  %v2948_v5 = vsel %vm1182_vm3, %v6767_v57, -inf }
 0xd88   : > { %v6813_v58 = vpop.eup %5224  ;;  %4832 = vmatprep.subr.msk.bf16.mxu0 %vm1644_vm4, %v2414_v14 }
 0xd89   : > { %v5227_v35 = vpop.eup %5226  ;;  %v3351_v50 = vsel %vm1182_vm3, %v6813_v58, 0.0 }
 0xd8a   : > { %v6817_v10 = vpop.eup %5228  ;;  %3352 = vadd.xlane.f32.xlu1 %v3351_v50  ;;  %4632 = vmatmul.mubr.msk.bf16.vlgmr.msra.gmra.mrb[28].mxu0 %vm1182_vm3, %v2327_v38  ;;  %v2324_v55 = vmul.f32 %v5227_v35, %v6737_v36  ;;  %v3320_v36 = vpop.xlane.xlu1 %3319  ;;  %v2966_v35 = vsel %vm1182_vm3, %v6775_v27, -inf }
 0xd8b   : > { %v5231_v6 = vpop.eup %5230  ;;  %4635 = vmatprep.mubr.msk.bf16.mxu0 %vm1182_vm3, %v2328_v3  ;;  %v3360_v11 = vsel %vm1182_vm3, %v6817_v10, 0.0  ;;  %v3332_v37 = vsub.f32 %v6794_v24, %v3320_v36  ;;  %4640 = vmatpush3.bf16.msra.mxu0 %v2428_v48 }
 0xd8c   : > { %v6821_v41 = vpop.eup %5232  ;;  %v2325_v56 = vmul.f32 %v5231_v6, %v6787_v23  ;;  %v3331_v23 = vsub.f32 %v6789_v47, %v3317_v34  ;;  %v2969_v47 = vsel %vm1182_vm3, %v6779_v29, -inf  ;;  %4834 = vmatprep.subr.msk.bf16.mxu0 %vm1644_vm4, %v2769_v62 }
 0xd8d   : > { %v3369_v21 = vsel %vm1182_vm3, %v6821_v41, 0.0  ;;  %v6828_v0 = vpop.eup %5234  ;;  %v3345_v46 = vmul.f32 1.442695, %v3332_v37 }
 0xd8e   : > { %3361 = vadd.xlane.f32.xlu1 %v3360_v11  ;;  %3370 = vadd.xlane.f32.xlu0 %v3369_v21  ;;  %v2329_v51 = vpack.c.bf16 %v2325_v56, %v2324_v55  ;;  %v3354_v25 = vsel %vm1182_vm3, %v6828_v0, 0.0  ;;  %v3326_v26 = vpop.xlane.xlu1 %3325  ;;  %v3343_v28 = vmul.f32 1.442695, %v3331_v23 }
 0xd8f   : > { %v3334_v33 = vsub.f32 %v6792_v31, %v3326_v26 }
 0xd90   : > { %5236 = vpow2.f32 %v3343_v28 }
 0xd91   : > { %v3349_v42 = vmul.f32 1.442695, %v3334_v33 }
 0xd92   : > { %3355 = vadd.xlane.f32.xlu1 %v3354_v25  ;;  %4636 = vmatmul.mubr.msk.bf16.gmra.mrb[32].mxu0 %vm1182_vm3, %v2329_v51 }
 0xd93   : > { %5238 = vpow2.f32 %v3349_v42 }
 0xd94   : > { %5240 = vpow2.f32 %v3345_v46 }
 0xd9a   : > { %v6850_v12 = vpop.eup %5236 }
 0xd9b   : > { %v3363_v31 = vsel %vm1182_vm3, %v6850_v12, 0.0 }
 0xd9d   : > { %v6854_v24 = vpop.eup %5238 }
 0xd9e   : > { %v3372_v45 = vsel %vm1182_vm3, %v6854_v24, 0.0  ;;  %v6858_v32 = vpop.eup %5240 }
 0xd9f   : > { %v3366_v34 = vsel %vm1182_vm3, %v6858_v32, 0.0 }
 0xda3   : > { %3395 = vrot.lane.b32.xlu1 %v6337_v43, %s5803_s28  ;;  %s5668_s28 = scalar_lea.vmem %s5667_s5, 2048 }
 0xda4   : > { %3570 = vrot.lane.b32.xlu0 %v6316_v39, %s5804_s3  ;;  %v2951_v39 = vsel %vm1182_vm3, %v6771_v22, -inf  ;;  %p5670_p3 = scmp.lt.s32.totalorder %s5668_s28, %s5662_s17 }
 0xda6   : > { %p5671_p11 = por %p5670_p3, %p5669_p8 }
 0xda7   : > { %3576 = vrot.lane.b32.xlu1 %v6337_v43, %s5804_s3 }
 0xda8   : > { %p5672_p6 = pnand %p5671_p11, %p5665_p12 }
 0xdab   : > { %3568 = vrot.lane.b32.xlu1 %v6318_v40, %s5804_s3  ;;  %v2963_v40 = vsel %vm1182_vm3, %v6781_v30, -inf }
 0xdc3   : > { %2952 = vmax.xlane.f32.xlu0 %v2951_v39 }
 0xdc7   : > { %2964 = vmax.xlane.f32.xlu0 %v2963_v40 }
 0xdcb   : > { %2970 = vmax.xlane.f32.xlu0 %v2969_v47 }
 0xdcf   : > { %3364 = vadd.xlane.f32.xlu1 %v3363_v31 }
 0xdd3   : > { %3373 = vadd.xlane.f32.xlu1 %v3372_v45 }
 0xdd7   : > { %3367 = vadd.xlane.f32.xlu1 %v3366_v34 }
 0xde8   : > { %3572 = vrot.lane.b32.xlu1 %v6322_v54, %s5804_s3 }
 0xdec   : > { %3574 = vrot.lane.b32.xlu1 %v6320_v53, %s5804_s3  ;;  %v2960_v53 = vsel %vm1182_vm3, %v6777_v7, -inf }
 0xe10   : > { %2949 = vmax.xlane.f32.xlu1 %v2948_v5 }
 0xe13   : > { %v3359_v17 = vpop.xlane.xlu1 %3358 }
 0xe14   : > { %2955 = vmax.xlane.f32.xlu1 %v2954_v49 }
 0xe17   : > { %v3353_v9 = vpop.xlane.xlu1 %3352 }
 0xe18   : > { %2958 = vmax.xlane.f32.xlu1 %v2957_v52 }
 0xe1b   : > { %v3362_v54 = vpop.xlane.xlu1 %3361  ;;  %v3371_v33 = vpop.xlane.xlu0 %3370 }
 0xe1c   : > { %2961 = vmax.xlane.f32.xlu1 %v2960_v53  ;;  %5242 = vrcp.f32 %v3362_v54 }
 0xe1d   : > { %5244 = vrcp.f32 %v3353_v9 }
 0xe1e   : > { %5246 = vrcp.f32 %v3359_v17 }
 0xe1f   : > { %v3356_v38 = vpop.xlane.xlu1 %3355  ;;  %v3571_v37 = vpop.permute.xlu0 %3570 }
 0xe20   : > { %5248 = vrcp.f32 %v3356_v38  ;;  %2967 = vmax.xlane.f32.xlu1 %v2966_v35 }
 0xe23   : > { %v3396_v50 = vpop.permute.xlu1 %3395 }
 0xe24   : > { %4719 = vmatprep.subr.bf16.mxu1 %v3396_v50 }
 0xe25   : > { %4720 = vmatpush3.bf16.msra.mxu1 %v3396_v50 }
 0xe26   : > { %v5243_v3 = vpop.eup %5242 }
 0xe27   : > { %v3577_v6 = vpop.permute.xlu1 %3576  ;;  %v5245_v56 = vpop.eup %5244  ;;  %v3386_v55 = vmul.f32 %v5243_v3, %v6817_v10 }
 0xe28   : > { %4839 = vmatprep.subr.msk.bf16.mxu1 %vm1101_vm2, %v3577_v6  ;;  %v5247_v11 = vpop.eup %5246  ;;  %v3383_v51 = vmul.f32 %v5245_v56, %v6813_v58  ;;  %v3591_v28 = vsel %vm1101_vm2, %v3577_v6, 0 }
 0xe29   : > { %v3385_v36 = vmul.f32 %v5247_v11, %v6805_v15 }
 0xe2a   : > { %v5249_v21 = vpop.eup %5248 }
 0xe2b   : > { %v3384_v25 = vmul.f32 %v5249_v21, %v6828_v0  ;;  %v3392_v26 = vpack.c.bf16 %v3386_v55, %v3385_v36  ;;  %v3569_v58 = vpop.permute.xlu1 %3568 }
 0xe2d   : > { %v3391_v23 = vpack.c.bf16 %v3384_v25, %v3383_v51 }
 0xe2f   : > { %4721 = vmatprep.mubr.msk.bf16.mxu1 %vm1182_vm3, %v3391_v23 }
 0xe30   : > { %4722 = vmatmul.mubr.msk.bf16.vlgmr.msra.gmra.mrb[84].mxu1 %vm1182_vm3, %v3392_v26 }
 0xe31   : > { %4740 = vmatpush3.bf16.xpose.msra.mxu1 %v3591_v28 }
 0xe50   : > { %v2953_v42 = vpop.xlane.xlu0 %2952 }
 0xe51   : > { %v2973_v10 = vsub.f32 %v6771_v22, %v2953_v42  ;;  %v2783_v22 = vsel %vm1644_vm4, %v2769_v62, 0 }
 0xe53   : > { %v2982_v39 = vmul.f32 1.442695, %v2973_v10 }
 0xe54   : > { %v2965_v2 = vpop.xlane.xlu0 %2964 }
 0xe55   : > { %5250 = vpow2.f32 %v2982_v39  ;;  %v2977_v8 = vsub.f32 %v6781_v30, %v2965_v2 }
 0xe5c   : > { %v3365_v0 = vpop.xlane.xlu1 %3364 }
 0xe5d   : > { %v4633_v46 = vpop.f32.mrb[28].mxu0 }
 0xe5e   : > { %v2379_v15 = vpop.f32.mrb[29].mxu0 }
 0xe5f   : > { %v6888_v40 = vpop.eup %5250  ;;  %v4634_v47 = vpop.f32.mrb[30].mxu0 }
 0xe60   : > { %v2411_v31 = vpack.c.bf16 %v4634_v47, %v4633_v46  ;;  %v3374_v45 = vpop.xlane.xlu1 %3373  ;;  %v2382_v34 = vpop.f32.mrb[31].mxu0  ;;  %v2999_v14 = vsel %vm1182_vm3, %v6888_v40, 0.0 }
 0xe61   : > { %v2410_v48 = vpack.c.bf16 %v2382_v34, %v2379_v15  ;;  %3000 = vadd.xlane.f32.xlu0 %v2999_v14  ;;  %5252 = vrcp.f32 %v3374_v45 }
 0xe62   : > { %5254 = vrcp.f32 %v3365_v0 }
 0xe63   : > { %4641 = vmatprep.mubr.msk.bf16.mxu0 %vm1101_vm2, %v2410_v48  ;;  %5256 = vrcp.f32 %v3371_v33 }
 0xe64   : > { %v3368_v5 = vpop.xlane.xlu1 %3367  ;;  %4642 = vmatmul.mubr.msk.bf16.vlgmr.msra.gmra.mrb[20].mxu0 %vm1101_vm2, %v2411_v31 }
 0xe65   : > { %5258 = vrcp.f32 %v3368_v5  ;;  %v4637_v17 = vpop.f32.mrb[32].mxu0  ;;  %4670 = vmatpush3.bf16.msra.mxu0 %v2783_v22 }
 0xe66   : > { %v2395_v49 = vpop.f32.mrb[33].mxu0 }
 0xe67   : > { %v4638_v9 = vpop.f32.mrb[34].mxu0 }
 0xe68   : > { %v2413_v52 = vpack.c.bf16 %v4638_v9, %v4637_v17  ;;  %v2398_v54 = vpop.f32.mrb[35].mxu0  ;;  %v3573_v59 = vpop.permute.xlu1 %3572 }
 0xe69   : > { %v2412_v53 = vpack.c.bf16 %v2398_v54, %v2395_v49 }
 0xe6b   : > { %4645 = vmatprep.mubr.msk.bf16.mxu0 %vm1101_vm2, %v2412_v53  ;;  %v5253_v38 = vpop.eup %5252 }
 0xe6c   : > { %4646 = vmatmul.mubr.msk.bf16.gmra.mrb[24].mxu0 %vm1101_vm2, %v2413_v52  ;;  %v5255_v62 = vpop.eup %5254  ;;  %v3390_v3 = vmul.f32 %v5253_v38, %v6854_v24  ;;  %v3575_v44 = vpop.permute.xlu1 %3574 }
 0xe6d   : > { %4671 = vmatprep.mubr.msk.bf16.mxu0 %vm1101_vm2, %v2765_v4  ;;  %v5257_v35 = vpop.eup %5256  ;;  %v3387_v6 = vmul.f32 %v5255_v62, %v6850_v12  ;;  %v2990_v12 = vmul.f32 1.442695, %v2977_v8 }
 0xe6e   : > { %v3389_v11 = vmul.f32 %v5257_v35, %v6821_v41 }
 0xe6f   : > { %v5259_v50 = vpop.eup %5258 }
 0xe70   : > { %v3388_v56 = vmul.f32 %v5259_v50, %v6858_v32  ;;  %v3394_v55 = vpack.c.bf16 %v3390_v3, %v3389_v11 }
 0xe72   : > { %v3393_v21 = vpack.c.bf16 %v3388_v56, %v3387_v6 }
 0xe74   : > { %4672 = vmatmul.mubr.msk.bf16.vlgmr.msra.gmra.mrb[20].mxu0 %vm1101_vm2, %v2766_v1  ;;  %4725 = vmatprep.mubr.msk.bf16.mxu1 %vm1182_vm3, %v3393_v21 }
 0xe75   : > { %4675 = vmatprep.mubr.msk.bf16.mxu0 %vm1101_vm2, %v2767_v19  ;;  %4726 = vmatmul.mubr.msk.bf16.gmra.mrb[88].mxu1 %vm1182_vm3, %v3394_v55 }
 0xe76   : > { %4741 = vmatprep.mubr.msk.bf16.mxu1 %vm1101_vm2, %v3569_v58 }
 0xe7c   : > { %4676 = vmatmul.mubr.msk.bf16.gmra.mrb[24].mxu0 %vm1101_vm2, %v2768_v16  ;;  %v2971_v16 = vpop.xlane.xlu0 %2970 }
 0xe7d   : > { %4742 = vmatmul.mubr.msk.bf16.vlgmr.msra.gmra.mrb[92].mxu1 %vm1101_vm2, %v3571_v37  ;;  %v2979_v24 = vsub.f32 %v6779_v29, %v2971_v16 }
 0xe7e   : > { %4745 = vmatprep.mubr.msk.bf16.mxu1 %vm1101_vm2, %v3573_v59 }
 0xe7f   : > { %v2994_v36 = vmul.f32 1.442695, %v2979_v24 }
 0xe85   : > { %4746 = vmatmul.mubr.msk.bf16.gmra.mrb[96].mxu1 %vm1101_vm2, %v3575_v44 }
 0xe9d   : > { %v2950_v63 = vpop.xlane.xlu1 %2949 }
 0xe9e   : > { %v2972_v1 = vsub.f32 %v6767_v57, %v2950_v63 }
 0xea0   : > { %v2980_v4 = vmul.f32 1.442695, %v2972_v1 }
 0xea1   : > { %v2956_v13 = vpop.xlane.xlu1 %2955 }
 0xea2   : > { %5260 = vpow2.f32 %v2980_v4  ;;  %v2974_v18 = vsub.f32 %v6765_v20, %v2956_v13 }
 0xea4   : > { %v2984_v61 = vmul.f32 1.442695, %v2974_v18 }
 0xea5   : > { %v2959_v19 = vpop.xlane.xlu1 %2958 }
 0xea6   : > { %5262 = vpow2.f32 %v2984_v61  ;;  %v2975_v41 = vsub.f32 %v6769_v60, %v2959_v19 }
 0xea8   : > { %v2986_v32 = vmul.f32 1.442695, %v2975_v41 }
 0xea9   : > { %v2962_v51 = vpop.xlane.xlu1 %2961 }
 0xeaa   : > { %5264 = vpow2.f32 %v2986_v32  ;;  %v2976_v57 = vsub.f32 %v6777_v7, %v2962_v51 }
 0xeab   : > { %5266 = vpow2.f32 %v2990_v12 }
 0xeac   : > { %v5261_v25 = vpop.eup %5260  ;;  %v2988_v20 = vmul.f32 1.442695, %v2976_v57 }
 0xead   : > { %v2968_v23 = vpop.xlane.xlu1 %2967  ;;  %v2996_v30 = vsel %vm1182_vm3, %v5261_v25, 0.0 }
 0xeae   : > { %5268 = vpow2.f32 %v2988_v20  ;;  %v2978_v26 = vsub.f32 %v6775_v27, %v2968_v23  ;;  %2997 = vadd.xlane.f32.xlu1 %v2996_v30 }
 0xeaf   : > { %5270 = vpow2.f32 %v2994_v36 }
 0xeb0   : > { %v5263_v60 = vpop.eup %5262  ;;  %v2992_v28 = vmul.f32 1.442695, %v2978_v26 }
 0xeb1   : > { %v3002_v29 = vsel %vm1182_vm3, %v5263_v60, 0.0 }
 0xeb2   : > { %5272 = vpow2.f32 %v2992_v28  ;;  %3003 = vadd.xlane.f32.xlu1 %v3002_v29 }
 0xeb4   : > { %v5265_v33 = vpop.eup %5264 }
 0xeb5   : > { %v3005_v7 = vsel %vm1182_vm3, %v5265_v33, 0.0  ;;  %v6933_v37 = vpop.eup %5266 }
 0xeb6   : > { %3006 = vadd.xlane.f32.xlu0 %v3005_v7  ;;  %v3011_v27 = vsel %vm1182_vm3, %v6933_v37, 0.0 }
 0xeb8   : > { %v6935_v42 = vpop.eup %5268 }
 0xeb9   : > { %v3008_v10 = vsel %vm1182_vm3, %v6935_v42, 0.0  ;;  %v6941_v39 = vpop.eup %5270 }
 0xeba   : > { %3009 = vadd.xlane.f32.xlu1 %v3008_v10  ;;  %3012 = vadd.xlane.f32.xlu0 %v3011_v27  ;;  %v3017_v46 = vsel %vm1182_vm3, %v6941_v39, 0.0  ;;  %v3124_v10 = vld [vmem:[#allocation19 + $0x14] sm:$0xf] }
 0xebb   : > { %v3138_v27 = vsel %vm1644_vm4, %v3124_v10, 0 }
 0xebc   : > { %v6943_v58 = vpop.eup %5272 }
 0xebd   : > { %v3014_v0 = vsel %vm1182_vm3, %v6943_v58, 0.0 }
 0xebe   : > { %3015 = vadd.xlane.f32.xlu1 %v3014_v0  ;;  %3018 = vadd.xlane.f32.xlu0 %v3017_v46 }
 0xecf   : > { %3040 = vrot.lane.b32.xlu1 %v6337_v43, %s5805_s6 }
 0xeee   : > { %v3001_v48 = vpop.xlane.xlu0 %3000 }
 0xeef   : > { %5274 = vrcp.f32 %v3001_v48 }
 0xef9   : > { %v5275_v49 = vpop.eup %5274 }
 0xefa   : > { %v3029_v38 = vmul.f32 %v5275_v49, %v6888_v40 }
 0xf03   : > { %v6950_v15 = vpop.f32.mrb[84].mxu1 }
 0xf04   : > { %v6952_v47 = vpop.f32.mrb[85].mxu1 }
 0xf05   : > { %v6954_v31 = vpop.f32.mrb[86].mxu1 }
 0xf06   : > { %v3476_v45 = vpack.c.bf16 %v6954_v31, %v6950_v15  ;;  %v6958_v34 = vpop.f32.mrb[87].mxu1 }
 0xf07   : > { %v3475_v14 = vpack.c.bf16 %v6958_v34, %v6952_v47 }
 0xf3b   : > { %v2998_v22 = vpop.xlane.xlu1 %2997 }
 0xf3c   : > { %5276 = vrcp.f32 %v2998_v22 }
 0xf3f   : > { %v3004_v5 = vpop.xlane.xlu1 %3003 }
 0xf40   : > { %5278 = vrcp.f32 %v3004_v5 }
 0xf43   : > { %v3007_v17 = vpop.xlane.xlu0 %3006 }
 0xf44   : > { %5280 = vrcp.f32 %v3007_v17 }
 0xf46   : > { %v5277_v9 = vpop.eup %5276 }
 0xf47   : > { %v3010_v52 = vpop.xlane.xlu1 %3009  ;;  %v3013_v54 = vpop.xlane.xlu0 %3012  ;;  %v3028_v53 = vmul.f32 %v5277_v9, %v5261_v25 }
 0xf48   : > { %5282 = vrcp.f32 %v3010_v52  ;;  %v6963_v62 = vpop.f32.mrb[88].mxu1 }
 0xf49   : > { %5284 = vrcp.f32 %v3013_v54  ;;  %v6965_v35 = vpop.f32.mrb[89].mxu1  ;;  %v3036_v50 = vpack.c.bf16 %v3029_v38, %v3028_v53 }
 0xf4a   : > { %v6967_v3 = vpop.f32.mrb[90].mxu1  ;;  %v5279_v21 = vpop.eup %5278 }
 0xf4b   : > { %v3478_v6 = vpack.c.bf16 %v6967_v3, %v6963_v62  ;;  %v3016_v56 = vpop.xlane.xlu1 %3015  ;;  %4691 = vmatprep.mubr.msk.bf16.mxu0 %vm1182_vm3, %v3036_v50  ;;  %v6972_v11 = vpop.f32.mrb[91].mxu1  ;;  %v3030_v44 = vmul.f32 %v5279_v21, %v5263_v60 }
 0xf4c   : > { %5286 = vrcp.f32 %v3016_v56  ;;  %v3477_v40 = vpack.c.bf16 %v6972_v11, %v6965_v35  ;;  %v3019_v55 = vpop.xlane.xlu0 %3018 }
 0xf4d   : > { %5288 = vrcp.f32 %v3019_v55 }
 0xf4e   : > { %v5281_v59 = vpop.eup %5280 }
 0xf4f   : > { %v3031_v63 = vmul.f32 %v5281_v59, %v5265_v33  ;;  %v3041_v1 = vpop.permute.xlu1 %3040 }
 0xf50   : > { %4689 = vmatprep.subr.bf16.mxu0 %v3041_v1  ;;  %v4743_v2 = vpop.f32.mrb[92].mxu1 }
 0xf51   : > { %v3037_v4 = vpack.c.bf16 %v3031_v63, %v3030_v44  ;;  %4690 = vmatpush3.bf16.msra.mxu0 %v3041_v1  ;;  %v3627_v13 = vpop.f32.mrb[93].mxu1  ;;  %v3664_v18 = vsel %vm1182_vm3, %v4743_v2, -inf }
 0xf52   : > { %v5283_v8 = vpop.eup %5282  ;;  %v4744_v61 = vpop.f32.mrb[94].mxu1  ;;  %3665 = vmax.xlane.f32.xlu0 %v3664_v18  ;;  %v3658_v24 = vsel %vm1182_vm3, %v3627_v13, -inf  ;;  %4836 = vmatprep.subr.msk.bf16.mxu0 %vm1644_vm4, %v3124_v10 }
 0xf53   : > { %v5285_v16 = vpop.eup %5284  ;;  %v3630_v19 = vpop.f32.mrb[95].mxu1  ;;  %v3032_v41 = vmul.f32 %v5283_v8, %v6935_v42  ;;  %v3667_v30 = vsel %vm1182_vm3, %v4744_v61, -inf }
 0xf54   : > { %4692 = vmatmul.mubr.msk.bf16.vlgmr.msra.gmra.mrb[36].mxu0 %vm1182_vm3, %v3037_v4  ;;  %v3033_v12 = vmul.f32 %v5285_v16, %v6933_v37  ;;  %v3661_v33 = vsel %vm1182_vm3, %v3630_v19, -inf }
 0xf55   : > { %4700 = vmatpush3.bf16.msra.mxu0 %v3138_v27 }
 0xf56   : > { %v5287_v32 = vpop.eup %5286  ;;  %3659 = vmax.xlane.f32.xlu0 %v3658_v24  ;;  %v3038_v51 = vpack.c.bf16 %v3033_v12, %v3032_v41 }
 0xf57   : > { %v5289_v57 = vpop.eup %5288  ;;  %v3034_v25 = vmul.f32 %v5287_v32, %v6943_v58 }
 0xf58   : > { %4695 = vmatprep.mubr.msk.bf16.mxu0 %vm1182_vm3, %v3038_v51  ;;  %v4747_v36 = vpop.f32.mrb[96].mxu1  ;;  %v3035_v20 = vmul.f32 %v5289_v57, %v6941_v39  ;;  %v6993_v39 = vld [vmem:[#allocation19 + $0x18] sm:$0xf] }
 0xf59   : > { %v3643_v23 = vpop.f32.mrb[97].mxu1  ;;  %v3676_v37 = vsel %vm1182_vm3, %v4747_v36, -inf  ;;  %4838 = vmatprep.subr.msk.bf16.mxu0 %vm1644_vm4, %v6993_v39 }
 0xf5a   : > { %v4748_v26 = vpop.f32.mrb[98].mxu1  ;;  %3668 = vmax.xlane.f32.xlu0 %v3667_v30  ;;  %v3039_v60 = vpack.c.bf16 %v3035_v20, %v3034_v25  ;;  %v3670_v7 = vsel %vm1182_vm3, %v3643_v23, -inf }
 0xf5b   : > { %v3646_v28 = vpop.f32.mrb[99].mxu1  ;;  %v3679_v42 = vsel %vm1182_vm3, %v4748_v26, -inf }
 0xf5c   : > { %v3673_v29 = vsel %vm1182_vm3, %v3646_v28, -inf  ;;  %4696 = vmatmul.mubr.msk.bf16.gmra.mrb[40].mxu0 %vm1182_vm3, %v3039_v60 }
 0xf5d   : > { %3674 = vmax.xlane.f32.xlu1 %v3673_v29 }
 0xf5e   : > { %3662 = vmax.xlane.f32.xlu0 %v3661_v33 }
 0xf62   : > { %3671 = vmax.xlane.f32.xlu0 %v3670_v7 }
 0xf66   : > { %3677 = vmax.xlane.f32.xlu0 %v3676_v37  ;;  %v3493_v37 = vsel %vm1644_vm4, %v6993_v39, 0 }
 0xf6a   : > { %3680 = vmax.xlane.f32.xlu0 %v3679_v42 }
 0xfdf   : > { %v3666_v58 = vpop.xlane.xlu0 %3665 }
 0xfe0   : > { %v3684_v0 = vsub.f32 %v4743_v2, %v3666_v58 }
 0xfe2   : > { %v3694_v46 = vmul.f32 1.442695, %v3684_v0 }
 0xfe3   : > { %v3660_v48 = vpop.xlane.xlu0 %3659 }
 0xfe4   : > { %5290 = vpow2.f32 %v3694_v46  ;;  %v3682_v22 = vsub.f32 %v3627_v13, %v3660_v48 }
 0xfe6   : > { %v3690_v5 = vmul.f32 1.442695, %v3682_v22 }
 0xfe7   : > { %v3669_v17 = vpop.xlane.xlu0 %3668 }
 0xfe8   : > { %5292 = vpow2.f32 %v3690_v5  ;;  %v3685_v49 = vsub.f32 %v4744_v61, %v3669_v17 }
 0xfea   : > { %v3696_v9 = vmul.f32 1.442695, %v3685_v49  ;;  %v3675_v59 = vpop.xlane.xlu1 %3674 }
 0xfeb   : > { %v3663_v52 = vpop.xlane.xlu0 %3662  ;;  %v3687_v4 = vsub.f32 %v3646_v28, %v3675_v59 }
 0xfec   : > { %5294 = vpow2.f32 %v3696_v9  ;;  %v3683_v54 = vsub.f32 %v3630_v19, %v3663_v52 }
 0xfed   : > { %v3700_v41 = vmul.f32 1.442695, %v3687_v4 }
 0xfee   : > { %v6997_v53 = vpop.eup %5290  ;;  %v3692_v38 = vmul.f32 1.442695, %v3683_v54 }
 0xfef   : > { %v3672_v50 = vpop.xlane.xlu0 %3671  ;;  %v3712_v56 = vsel %vm1182_vm3, %v6997_v53, 0.0 }
 0xff0   : > { %5296 = vpow2.f32 %v3692_v38  ;;  %3713 = vadd.xlane.f32.xlu0 %v3712_v56  ;;  %v3686_v55 = vsub.f32 %v3643_v23, %v3672_v50 }
 0xff2   : > { %v7001_v21 = vpop.eup %5292  ;;  %v3698_v13 = vmul.f32 1.442695, %v3686_v55 }
 0xff3   : > { %v3678_v44 = vpop.xlane.xlu0 %3677  ;;  %v3706_v63 = vsel %vm1182_vm3, %v7001_v21, 0.0 }
 0xff4   : > { %v3688_v1 = vsub.f32 %v4747_v36, %v3678_v44  ;;  %3707 = vadd.xlane.f32.xlu0 %v3706_v63 }
 0xff6   : > { %v7005_v2 = vpop.eup %5294  ;;  %v3702_v18 = vmul.f32 1.442695, %v3688_v1 }
 0xff7   : > { %v3681_v8 = vpop.xlane.xlu0 %3680  ;;  %v3715_v61 = vsel %vm1182_vm3, %v7005_v2, 0.0 }
 0xff8   : > { %5298 = vpow2.f32 %v3702_v18  ;;  %v3689_v16 = vsub.f32 %v4748_v26, %v3681_v8  ;;  %3716 = vadd.xlane.f32.xlu0 %v3715_v61 }
 0xff9   : > { %5300 = vpow2.f32 %v3698_v13 }
 0xffa   : > { %v5297_v19 = vpop.eup %5296  ;;  %v3704_v12 = vmul.f32 1.442695, %v3689_v16 }
 0xffb   : > { %v3709_v24 = vsel %vm1182_vm3, %v5297_v19, 0.0 }
 0xffc   : > { %5302 = vpow2.f32 %v3704_v12  ;;  %3710 = vadd.xlane.f32.xlu0 %v3709_v24 }
 0xffd   : > { %5304 = vpow2.f32 %v3700_v41 }
0x1002   : > { %v7010_v32 = vpop.eup %5298 }
0x1003   : > { %v3724_v51 = vsel %vm1182_vm3, %v7010_v32, 0.0  ;;  %v7014_v57 = vpop.eup %5300 }
0x1004   : > { %3725 = vadd.xlane.f32.xlu0 %v3724_v51  ;;  %v3718_v36 = vsel %vm1182_vm3, %v7014_v57, 0.0 }
0x1006   : > { %v7016_v25 = vpop.eup %5302 }
0x1007   : > { %v3727_v20 = vsel %vm1182_vm3, %v7016_v25, 0.0  ;;  %v7022_v23 = vpop.eup %5304 }
0x1008   : > { %3719 = vadd.xlane.f32.xlu0 %v3718_v36  ;;  %3728 = vadd.xlane.f32.xlu1 %v3727_v20  ;;  %v3721_v30 = vsel %vm1182_vm3, %v7022_v23, 0.0 }
0x100c   : > { %3722 = vadd.xlane.f32.xlu0 %v3721_v30 }
0x1022   : > { %3750 = vrot.lane.b32.xlu0 %v6337_v43, %s5806_s8 }
0x1027   : > { %v4693_v26 = vpop.f32.mrb[36].mxu0 }
0x1028   : > { %v3089_v60 = vpop.f32.mrb[37].mxu0 }
0x1029   : > { %v4694_v28 = vpop.f32.mrb[38].mxu0 }
0x102a   : > { %v3121_v29 = vpack.c.bf16 %v4694_v28, %v4693_v26  ;;  %v3092_v33 = vpop.f32.mrb[39].mxu0 }
0x102b   : > { %v3120_v7 = vpack.c.bf16 %v3092_v33, %v3089_v60 }
0x102d   : > { %4701 = vmatprep.mubr.msk.bf16.mxu0 %vm1101_vm2, %v3120_v7 }
0x102e   : > { %4702 = vmatmul.mubr.msk.bf16.vlgmr.msra.gmra.mrb[20].mxu0 %vm1101_vm2, %v3121_v29 }
0x102f   : > { %v4697_v42 = vpop.f32.mrb[40].mxu0  ;;  %4730 = vmatpush3.bf16.msra.mxu0 %v3493_v37 }
0x1030   : > { %v3105_v10 = vpop.f32.mrb[41].mxu0 }
0x1031   : > { %v4698_v27 = vpop.f32.mrb[42].mxu0 }
0x1032   : > { %v3123_v58 = vpack.c.bf16 %v4698_v27, %v4697_v42  ;;  %v3108_v0 = vpop.f32.mrb[43].mxu0 }
0x1033   : > { %v3122_v43 = vpack.c.bf16 %v3108_v0, %v3105_v10 }
0x1035   : > { %4705 = vmatprep.mubr.msk.bf16.mxu0 %vm1101_vm2, %v3122_v43 }
0x1036   : > { %4706 = vmatmul.mubr.msk.bf16.gmra.mrb[24].mxu0 %vm1101_vm2, %v3123_v58 }
0x1037   : > { %4731 = vmatprep.mubr.msk.bf16.mxu0 %vm1101_vm2, %v3475_v14 }
0x103e   : > { %4732 = vmatmul.mubr.msk.bf16.vlgmr.msra.gmra.mrb[20].mxu0 %vm1101_vm2, %v3476_v45 }
0x103f   : > { %4735 = vmatprep.mubr.msk.bf16.mxu0 %vm1101_vm2, %v3477_v40 }
0x1046   : > { %4736 = vmatmul.mubr.msk.bf16.gmra.mrb[24].mxu0 %vm1101_vm2, %v3478_v6 }
0x107d   : > { %v3714_v39 = vpop.xlane.xlu0 %3713 }
0x1081   : > { %v3708_v46 = vpop.xlane.xlu0 %3707 }
0x1082   : > { %5306 = vrcp.f32 %v3708_v46 }
0x1085   : > { %v3717_v47 = vpop.xlane.xlu0 %3716 }
0x1089   : > { %v3711_v34 = vpop.xlane.xlu0 %3710 }
0x108a   : > { %5308 = vrcp.f32 %v3711_v34 }
0x108b   : > { %5310 = vrcp.f32 %v3717_v47 }
0x108c   : > { %5312 = vrcp.f32 %v3714_v39  ;;  %v5307_v31 = vpop.eup %5306 }
0x108d   : > { %v3738_v11 = vmul.f32 %v5307_v31, %v7001_v21 }
0x1091   : > { %v3726_v15 = vpop.xlane.xlu0 %3725 }
0x1094   : > { %v5309_v45 = vpop.eup %5308 }
0x1095   : > { %v3729_v14 = vpop.xlane.xlu1 %3728  ;;  %v3720_v35 = vpop.xlane.xlu0 %3719  ;;  %v3739_v40 = vmul.f32 %v5309_v45, %v5297_v19 }
0x1096   : > { %5314 = vrcp.f32 %v3729_v14  ;;  %v5311_v3 = vpop.eup %5310 }
0x1097   : > { %v3746_v62 = vpack.c.bf16 %v3739_v40, %v3738_v11  ;;  %5316 = vrcp.f32 %v3720_v35  ;;  %v5313_v48 = vpop.eup %5312  ;;  %v3741_v22 = vmul.f32 %v5311_v3, %v7005_v2 }
0x1098   : > { %5318 = vrcp.f32 %v3726_v15  ;;  %v3740_v17 = vmul.f32 %v5313_v48, %v6997_v53  ;;  %v3834_v53 = vld [vmem:[#allocation19 + $0x1c] sm:$0xf] }
0x1099   : > { %4751 = vmatprep.mubr.msk.bf16.mxu0 %vm1182_vm3, %v3746_v62  ;;  %v3723_v6 = vpop.xlane.xlu0 %3722  ;;  %v3848_v63 = vsel %vm1644_vm4, %v3834_v53, 0 }
0x109a   : > { %5320 = vrcp.f32 %v3723_v6  ;;  %v3747_v49 = vpack.c.bf16 %v3741_v22, %v3740_v17 }
0x109d   : > { %v3751_v5 = vpop.permute.xlu0 %3750 }
0x109e   : > { %4749 = vmatprep.subr.bf16.mxu0 %v3751_v5 }
0x109f   : > { %4750 = vmatpush3.bf16.msra.mxu0 %v3751_v5 }
0x10a0   : > { %v5315_v9 = vpop.eup %5314  ;;  %4840 = vmatprep.subr.msk.bf16.mxu0 %vm1644_vm4, %v3834_v53 }
0x10a1   : > { %v5317_v52 = vpop.eup %5316  ;;  %v3745_v50 = vmul.f32 %v5315_v9, %v7016_v25 }
0x10a2   : > { %4752 = vmatmul.mubr.msk.bf16.vlgmr.msra.gmra.mrb[44].mxu0 %vm1182_vm3, %v3747_v49  ;;  %v5319_v54 = vpop.eup %5318  ;;  %v3742_v56 = vmul.f32 %v5317_v52, %v7014_v57 }
0x10a3   : > { %v3744_v55 = vmul.f32 %v5319_v54, %v7010_v32  ;;  %4760 = vmatpush3.bf16.msra.mxu0 %v3848_v63  ;;  %v4337_v32 = vld [vmem:[#allocation20] ss:$0 sm:$0xff] }
0x10a4   : > { %v5321_v38 = vpop.eup %5320 }
0x10a5   : > { %v3743_v21 = vmul.f32 %v5321_v38, %v7022_v23  ;;  %v3749_v44 = vpack.c.bf16 %v3745_v50, %v3744_v55 }
0x10a7   : > { %v3748_v59 = vpack.c.bf16 %v3743_v21, %v3742_v56 }
0x10a9   : > { %4755 = vmatprep.mubr.msk.bf16.mxu0 %vm1182_vm3, %v3748_v59 }
0x10aa   : > { %4756 = vmatmul.mubr.msk.bf16.gmra.mrb[48].mxu0 %vm1182_vm3, %v3749_v44 }
0x1175   : > { %v4753_v1 = vpop.f32.mrb[44].mxu0 }
0x1176   : > { %v3799_v2 = vpop.f32.mrb[45].mxu0 }
0x1177   : > { %v4754_v4 = vpop.f32.mrb[46].mxu0 }
0x1178   : > { %v3831_v13 = vpack.c.bf16 %v4754_v4, %v4753_v1  ;;  %v3802_v18 = vpop.f32.mrb[47].mxu0 }
0x1179   : > { %v3830_v8 = vpack.c.bf16 %v3802_v18, %v3799_v2 }
0x117b   : > { %4761 = vmatprep.mubr.msk.bf16.mxu0 %vm1101_vm2, %v3830_v8 }
0x117c   : > { %4762 = vmatmul.mubr.msk.bf16.vlgmr.msra.gmra.mrb[20].mxu0 %vm1101_vm2, %v3831_v13 }
0x117d   : > { %v4757_v61 = vpop.f32.mrb[48].mxu0 }
0x117e   : > { %v3815_v16 = vpop.f32.mrb[49].mxu0 }
0x117f   : > { %v4758_v19 = vpop.f32.mrb[50].mxu0 }
0x1180   : > { %v3833_v41 = vpack.c.bf16 %v4758_v19, %v4757_v61  ;;  %v3818_v12 = vpop.f32.mrb[51].mxu0 }
0x1181   : > { %v3832_v24 = vpack.c.bf16 %v3818_v12, %v3815_v16 }
0x1183   : > { %4765 = vmatprep.mubr.msk.bf16.mxu0 %vm1101_vm2, %v3832_v24 }
0x1184   : > { %4766 = vmatmul.mubr.msk.bf16.gmra.mrb[24].mxu0 %vm1101_vm2, %v3833_v41 }
0x124f   : > { %v4763_v51 = vpop.f32.mrb[20].mxu0 }
0x1250   : > { %v3932_v57 = vadd.f32 %v4763_v51, %v4337_v32  ;;  %v3884_v25 = vpop.f32.mrb[21].mxu0 }
0x1251   : > { %v3930_v36 = vadd.f32 %v4337_v32, %v3884_v25  ;;  %v4764_v20 = vpop.f32.mrb[22].mxu0 }
0x1252   : > { %3940 = vst.msk [vmem:[%s622_s14 + $0x10] sm:$0xff] %vm693_vm0, %v3932_v57  ;;  %v3933_v23 = vadd.f32 %v4764_v20, %v4337_v32  ;;  %v3887_v30 = vpop.f32.mrb[23].mxu0 }
0x1253   : > { %3938 = vst.msk [vmem:[%s622_s14] sm:$0xff] %vm693_vm0, %v3930_v36  ;;  %v3931_v26 = vadd.f32 %v4337_v32, %v3887_v30 }
0x1254   : > { %3941 = vst.msk [vmem:[%s622_s14 + $0x18] sm:$0xff] %vm693_vm0, %v3933_v23 }
0x1255   : > { %3939 = vst.msk [vmem:[%s622_s14 + $0x8] sm:$0xff] %vm693_vm0, %v3931_v26 }
0x1257   : > { %v4767_v60 = vpop.f32.mrb[24].mxu0 }
0x1258   : > { %v3936_v28 = vadd.f32 %v4767_v60, %v4337_v32  ;;  %v3900_v29 = vpop.f32.mrb[25].mxu0 }
0x1259   : > { %v3934_v33 = vadd.f32 %v4337_v32, %v3900_v29  ;;  %v4768_v7 = vpop.f32.mrb[26].mxu0 }
0x125a   : > { %3944 = vst.msk [vmem:[%s622_s14 + $0x30] sm:$0xff] %vm693_vm0, %v3936_v28  ;;  %v3937_v37 = vadd.f32 %v4768_v7, %v4337_v32  ;;  %v3903_v42 = vpop.f32.mrb[27].mxu0 }
0x125b   : > { %3942 = vst.msk [vmem:[%s622_s14 + $0x20] sm:$0xff] %vm693_vm0, %v3934_v33  ;;  %v3935_v10 = vadd.f32 %v4337_v32, %v3903_v42 }
0x125c   : > { %3945 = vst.msk [vmem:[%s622_s14 + $0x38] sm:$0xff] %vm693_vm0, %v3937_v37 }
0x125d   : > { %3943 = vst.msk [vmem:[%s622_s14 + $0x28] sm:$0xff] %vm693_vm0, %v3935_v10 }
0x125e   : > { %5675 = shalt.err (!%p5672_p6)
}
0x125f   : > { %s5676_s3 = scalar_lea.hbm %s7077_s9, 1024  ;;  %s5680_s16 = scalar_lea.hbm %s7212_s19, 2048 }
0x1260   : > { %p5677_p2 = scmp.ne.s32.totalorder %s7077_s9, %s5676_s3  ;;  %p5681_p9 = scmp.lt.u32.totalorder %s7077_s9, %s7212_s19 }
0x1261   : > { %p5682_p0 = scmp.lt.u32.totalorder %s5680_s16, %s5676_s3  ;;  %p5684_p5 = scmp.lt.u32.totalorder %s5676_s3, %s7077_s9 }
0x1262   : > { %p5678_p13 = pnand %p5677_p2, %p7213_p1 }
0x1263   : > { %p5683_p7 = por %p5682_p0, %p5681_p9 }
0x1264   : > { %p5679_p4 = pneg %p5678_p13 }
0x1265   : > { %p5685_p10 = por %p5684_p5, %p5683_p7 }
0x1267   : > { %p5686_p12 = pnand %p5685_p10, %p5679_p4 }
0x1269   : > { %5689 = shalt.err (!%p5686_p12)
}
0x126a   : > { %s5808_s13 = smov 128  }
0x126b   : > { %4885 = dma.vmem_to_hbm [thread:$0]  (%p7213_p1), %s7080_s7, 1024, %s7077_s9, %s3947_s4, %s5808_s13, %s5808_s13, %s5806_s8  }
0x126c PF: > { %s3977_s30 = sand.u32 1, %s5752_s21   ;;  %p7214_p8 = scmp.ne.s32.totalorder %s7191_s12, 0 }
0x126d   : > { %p7215_p3 = scmp.ge.s32.totalorder %s5772_s26, 2  ;;  %s3978_s17 = scalar_lea.sflag [#allocation4], %s3977_s30 }
0x126f   : > { %p4926_p11 = pnand %p7215_p3, %p7214_p8 }
0x1271   : > { %5747 = dma.done.wait (!%p4926_p11), %s3978_s17, 1024  }
0x1272   : > { %5749 = vsyncadd (!%p4926_p11), %s3978_s17, 4294966272  ;;  %s36_s26 = sadd.s32 1, %s5772_s26   ;;  %s7216_s21 = smov %s5756_s22 }
0x1273   : > { %p33_p6 = scmp.ge.s32.totalorder %s36_s26, 4   ;;  %s7217_s22 = smov %s5760_s23 }
0x1274   : > { %s7218_s23 = smov %s6167_s29  ;;  %s7219_s24 = smov %s5768_s25 }
0x1275   : > { %s7220_s25 = smov %s7222_s20  ;;  %35 = sbr.rel (!%p33_p6) target bundleno = 25 (0x19), region = 166 }
0x127c   :  { %3983 = vsyncpa [#allocation3], 1 }
0x127d   :  { %3985 = vsyncpa [#allocation3 + $0x1], 1 }
0x127e   :  { %3986 = vsyncpa [#allocation6], 1 }
0x127f   :  { %3988 = vsyncpa [#allocation6 + $0x1], 1 }
0x1280   :  { %3989 = vsyncpa [#allocation9], 1 }
0x1281   :  { %3990 = vsyncpa [#allocation12], 1 }
0x1282   :  { %3991 = vsyncpa [#allocation15], 1 }
0x1283   :  { %3992 = vsyncpa [#allocation18], 1 }
0x1284   :  { %3993 = vsyncpa [#allocation21], 1 }
0x1285   :  { %3994 = vsyncpa [#allocation4], 1 }
0x1286   :  { %3996 = vsyncpa [#allocation4 + $0x1], 1 }

</bundles_post_ra>
